<compile_context>
chip_gen: v7x
topology: tpu7x:2x2x1
jax: 0.10.0
libtpu: 0.0.40
codegen_flags: <defaults>
</compile_context>

<pallas_src>
import jax
import jax.numpy as jnp
from jax import lax
from jax.experimental import pallas as pl
from jax.experimental.pallas import tpu as pltpu


KCONV = 5  # 5x5 conv kernels throughout


# ----------------------------------------------------------------------------
# Fused forward kernel (one grid step == one image)
# ----------------------------------------------------------------------------
def _pool_selectors(p, n):
    """0/1 matrices se, so of shape (p, n) with se[i, 2i] = 1, so[i, 2i+1] = 1.
    Horizontal 2x max-pool compaction: pooled = max(se @ v, so @ v)."""
    rows = lax.broadcasted_iota(jnp.int32, (p, n), 0)
    cols = lax.broadcasted_iota(jnp.int32, (p, n), 1)
    se = (cols == 2 * rows).astype(jnp.float32)
    so = (cols == 2 * rows + 1).astype(jnp.float32)
    return se, so


def _net_kernel(x_ref, w1_ref, b1_ref, w2_ref, b2_ref,
                f1w_ref, f1b_ref, f2w_ref, f2b_ref, f3w_ref, f3b_ref,
                out_ref, p1_ref, p2_ref, patch1_ref, patch2_ref, flat_ref):
    f32 = jnp.float32
    se1, so1 = _pool_selectors(14, 28)   # pool1: 28 -> 14 output columns
    se2, so2 = _pool_selectors(5, 10)    # pool2: 10 -> 5  output columns

    def conv_row(src_ref, patch_ref, row0, wo, cin, w_mat, bias):
        """One VALID conv output row: in-kernel im2col (25 static-offset stores into a
        VMEM patch buffer, column block (di*5+dj)*cin) + one MXU matmul + bias + ReLU."""
        for di in range(KCONV):
            for dj in range(KCONV):
                col = (di * KCONV + dj) * cin
                patch_ref[:, pl.ds(col, cin)] = src_ref[row0 + di, pl.ds(dj, wo), :]
        y = jnp.dot(patch_ref[...], w_mat, preferred_element_type=f32) + bias
        return jnp.maximum(y, 0.0)                              # (wo, cout)

    def conv_pool(src_ref, dst_ref, patch_ref, n_pool, wo, cin, w_mat, bias, se, so):
        """conv + relu + 2x2/stride-2 max-pool, fused: produce conv rows 2i and 2i+1,
        max them (vertical pool), compact column pairs via selection matmuls."""
        def body(i, carry):
            r0 = conv_row(src_ref, patch_ref, 2 * i, wo, cin, w_mat, bias)
            r1 = conv_row(src_ref, patch_ref, 2 * i + 1, wo, cin, w_mat, bias)
            vm = jnp.maximum(r0, r1)
            pooled = jnp.maximum(jnp.dot(se, vm, preferred_element_type=f32),
                                 jnp.dot(so, vm, preferred_element_type=f32))
            dst_ref[i] = pooled
            return carry
        lax.fori_loop(0, n_pool, body, 0)

    # conv1 (1 -> 6, 5x5) + relu + pool : x (32, 32, 1) -> p1 (14, 14, 6)
    conv_pool(x_ref, p1_ref, patch1_ref, 14, 28, 1, w1_ref[...], b1_ref[...], se1, so1)
    # conv2 (6 -> 16, 5x5) + relu + pool: p1 (14, 14, 6) -> p2 (5, 5, 16)
    conv_pool(p1_ref, p2_ref, patch2_ref, 5, 10, 6, w2_ref[...], b2_ref[...], se2, so2)

    # flatten in (h, w, c) order; fc1 weights were pre-permuted to match PyTorch's
    # (c, h, w) view order, so no activation transpose is needed.
    for h in range(5):
        for w_ in range(5):
            flat_ref[:, pl.ds((h * 5 + w_) * 16, 16)] = p2_ref[h, pl.ds(w_, 1), :]

    h1 = jnp.maximum(jnp.dot(flat_ref[...], f1w_ref[...],
                             preferred_element_type=f32) + f1b_ref[...], 0.0)   # (1, 120)
    h2 = jnp.maximum(jnp.dot(h1, f2w_ref[...],
                             preferred_element_type=f32) + f2b_ref[...], 0.0)   # (1, 84)
    out_ref[0] = jnp.dot(h2, f3w_ref[...], preferred_element_type=f32) + f3b_ref[...]


# ----------------------------------------------------------------------------
# One-time parameter re-layout (hoisted off the per-forward path)
# ----------------------------------------------------------------------------
def prepare_params(p):
    f32 = jnp.float32
    return {
        # conv weights -> (cin*kh*kw, cout) matmul form; column order (di, dj, c)
        "w1": p["conv1_w"].reshape(6, 25).T.astype(f32),                               # (25, 6)
        "b1": p["conv1_b"].reshape(1, 6).astype(f32),
        "w2": jnp.transpose(p["conv2_w"], (2, 3, 1, 0)).reshape(150, 16).astype(f32),  # (150, 16)
        "b2": p["conv2_b"].reshape(1, 16).astype(f32),
        # fc1 rows permuted from PyTorch's (c, h, w) flatten order to the kernel's (h, w, c)
        "f1w": jnp.transpose(p["fc1_w"].reshape(120, 16, 5, 5),
                             (2, 3, 1, 0)).reshape(400, 120).astype(f32),              # (400, 120)
        "f1b": p["fc1_b"].reshape(1, 120).astype(f32),
        "f2w": p["fc2_w"].T.astype(f32),                                               # (120, 84)
        "f2b": p["fc2_b"].reshape(1, 84).astype(f32),
        "f3w": p["fc3_w"].T.astype(f32),                                               # (84, 10)
        "f3b": p["fc3_b"].reshape(1, 10).astype(f32),
    }


# ----------------------------------------------------------------------------
# Forward pass (mirrors Net.forward) — a single pallas_call
# ----------------------------------------------------------------------------
def net_forward(w, x_nchw):
    B = x_nchw.shape[0]
    assert x_nchw.shape[1:] == (1, 32, 32), x_nchw.shape
    # NCHW with C=1 -> (B*H, W, 1): pure metadata reshape, no data movement.
    x = x_nchw.astype(jnp.float32).reshape(B * 32, 32, 1)

    full = lambda a: pl.BlockSpec(a.shape, lambda b: (0,) * a.ndim)

    out = pl.pallas_call(
        _net_kernel,
        out_shape=jax.ShapeDtypeStruct((B, 1, 10), jnp.float32),
        grid=(B,),
        in_specs=[pl.BlockSpec((32, 32, 1), lambda b: (b, 0, 0)),
                  full(w["w1"]), full(w["b1"]), full(w["w2"]), full(w["b2"]),
                  full(w["f1w"]), full(w["f1b"]), full(w["f2w"]), full(w["f2b"]),
                  full(w["f3w"]), full(w["f3b"])],
        out_specs=pl.BlockSpec((1, 1, 10), lambda b: (b, 0, 0)),
        scratch_shapes=[pltpu.VMEM((14, 14, 6), jnp.float32),   # pooled conv1 activations
                        pltpu.VMEM((5, 5, 16), jnp.float32),    # pooled conv2 activations
                        pltpu.VMEM((28, 25), jnp.float32),      # conv1 im2col patch buffer
                        pltpu.VMEM((10, 150), jnp.float32),     # conv2 im2col patch buffer
                        pltpu.VMEM((1, 400), jnp.float32)],     # flattened features
        compiler_params=pltpu.CompilerParams(
            dimension_semantics=("parallel",)),  # batch split across TCs on v7x
    )(x, w["w1"], w["b1"], w["w2"], w["b2"],
      w["f1w"], w["f1b"], w["f2w"], w["f2b"], w["f3w"], w["f3b"])
    return out.reshape(B, 10)


# ----------------------------------------------------------------------------
# Pure-JAX reference (correctness check of the fused Pallas path)
# ----------------------------------------------------------------------------
def net_forward_ref(params, x_nchw):
    x = jnp.transpose(x_nchw, (0, 2, 3, 1))
    def conv(x, w, b):
        w_hwio = jnp.transpose(w, (2, 3, 1, 0))
        y = lax.conv_general_dilated(x, w_hwio, (1, 1), "VALID",
                                     dimension_numbers=("NHWC", "HWIO", "NHWC"))
        return jnp.maximum(y + b, 0.0)
    def pool(x):
        return lax.reduce_window(x, -jnp.inf, lax.max,
                                 (1, 2, 2, 1), (1, 2, 2, 1), "VALID")
    x = pool(conv(x, params["conv1_w"], params["conv1_b"]))
    x = pool(conv(x, params["conv2_w"], params["conv2_b"]))
    B = x.shape[0]
    x = jnp.transpose(x, (0, 3, 1, 2)).reshape(B, -1)
    x = jnp.maximum(x @ params["fc1_w"].T + params["fc1_b"], 0.0)
    x = jnp.maximum(x @ params["fc2_w"].T + params["fc2_b"], 0.0)
    return x @ params["fc3_w"].T + params["fc3_b"]


def init_params(key):
    ks = jax.random.split(key, 10)
    def rnd(k, shape, scale):
        return (scale * jax.random.normal(k, shape)).astype(jnp.float32)
    return {
        "conv1_w": rnd(ks[0], (6, 1, 5, 5), 0.2),
        "conv1_b": rnd(ks[1], (6,), 0.1),
        "conv2_w": rnd(ks[2], (16, 6, 5, 5), 0.1),
        "conv2_b": rnd(ks[3], (16,), 0.1),
        "fc1_w": rnd(ks[4], (120, 400), 0.05),
        "fc1_b": rnd(ks[5], (120,), 0.05),
        "fc2_w": rnd(ks[6], (84, 120), 0.05),
        "fc2_b": rnd(ks[7], (84,), 0.05),
        "fc3_w": rnd(ks[8], (10, 84), 0.05),
        "fc3_b": rnd(ks[9], (10,), 0.05),
    }


if __name__ == "__main__":
    key = jax.random.PRNGKey(0)
    pkey, xkey = jax.random.split(key)
    torch_params = init_params(pkey)
    prepped = prepare_params(torch_params)   # one-time weight re-layout (not on hot path)
    # Input consistent with the module: 1 channel, 32x32 (needed for 16*5*5 flat features).
    x = jax.random.normal(xkey, (2, 1, 32, 32), dtype=jnp.float32)

    out = jax.block_until_ready(jax.jit(net_forward)(prepped, x))
    assert out.shape == (2, 10) and out.dtype == jnp.float32

    ref = jax.block_until_ready(jax.jit(net_forward_ref)(torch_params, x))
    assert jnp.allclose(out, ref, rtol=1e-3, atol=1e-3), (out, ref)

    print("KERNEL_OK")
</pallas_src>

<mosaic_0001>
module attributes {stable_mosaic.version = 11 : i64} {
  func.func @_net_kernel(%arg0: i32, %arg1: memref<32x32x1xf32, #tpu.memory_space<vmem>>, %arg2: memref<25x6xf32, #tpu.memory_space<vmem>>, %arg3: memref<1x6xf32, #tpu.memory_space<vmem>>, %arg4: memref<150x16xf32, #tpu.memory_space<vmem>>, %arg5: memref<1x16xf32, #tpu.memory_space<vmem>>, %arg6: memref<400x120xf32, #tpu.memory_space<vmem>>, %arg7: memref<1x120xf32, #tpu.memory_space<vmem>>, %arg8: memref<120x84xf32, #tpu.memory_space<vmem>>, %arg9: memref<1x84xf32, #tpu.memory_space<vmem>>, %arg10: memref<84x10xf32, #tpu.memory_space<vmem>>, %arg11: memref<1x10xf32, #tpu.memory_space<vmem>>, %arg12: memref<1x1x10xf32, #tpu.memory_space<vmem>>, %arg13: memref<14x14x6xf32, #tpu.memory_space<vmem>>, %arg14: memref<5x5x16xf32, #tpu.memory_space<vmem>>, %arg15: memref<28x25xf32, #tpu.memory_space<vmem>>, %arg16: memref<10x150xf32, #tpu.memory_space<vmem>>, %arg17: memref<1x400xf32, #tpu.memory_space<vmem>>) attributes {dimension_semantics = [#tpu.dimension_semantics<parallel>], iteration_bounds = array<i64: 2>, scalar_prefetch = 0 : i64, scratch_operands = 5 : i64, tpu.core_type = #tpu.core_type<tc>, window_params = [{transform_indices = @transform_0, window_bounds = array<i64: 32, 32, 1>}, {pipeline_mode = #tpu.pipeline_mode<synchronous>, transform_indices = @transform_1, window_bounds = array<i64: 25, 6>}, {pipeline_mode = #tpu.pipeline_mode<synchronous>, transform_indices = @transform_2, window_bounds = array<i64: 1, 6>}, {pipeline_mode = #tpu.pipeline_mode<synchronous>, transform_indices = @transform_3, window_bounds = array<i64: 150, 16>}, {pipeline_mode = #tpu.pipeline_mode<synchronous>, transform_indices = @transform_4, window_bounds = array<i64: 1, 16>}, {pipeline_mode = #tpu.pipeline_mode<synchronous>, transform_indices = @transform_5, window_bounds = array<i64: 400, 120>}, {pipeline_mode = #tpu.pipeline_mode<synchronous>, transform_indices = @transform_6, window_bounds = array<i64: 1, 120>}, {pipeline_mode = #tpu.pipeline_mode<synchronous>, transform_indices = @transform_7, window_bounds = array<i64: 120, 84>}, {pipeline_mode = #tpu.pipeline_mode<synchronous>, transform_indices = @transform_8, window_bounds = array<i64: 1, 84>}, {pipeline_mode = #tpu.pipeline_mode<synchronous>, transform_indices = @transform_9, window_bounds = array<i64: 84, 10>}, {pipeline_mode = #tpu.pipeline_mode<synchronous>, transform_indices = @transform_10, window_bounds = array<i64: 1, 10>}, {transform_indices = @transform_11, window_bounds = array<i64: 1, 1, 10>}]} {
    %0 = tpu.iota {dimensions = array<i32: 0>} : vector<14x28xi32>
    %1 = tpu.iota {dimensions = array<i32: 1>} : vector<14x28xi32>
    %c2_i32 = arith.constant 2 : i32
    %2 = vector.broadcast %c2_i32 : i32 to vector<14x28xi32>
    %3 = arith.muli %2, %0 : vector<14x28xi32>
    %4 = arith.cmpi eq, %1, %3 : vector<14x28xi32>
    %5 = arith.extui %4 : vector<14x28xi1> to vector<14x28xi32>
    %6 = arith.sitofp %5 : vector<14x28xi32> to vector<14x28xf32>
    %c2_i32_0 = arith.constant 2 : i32
    %7 = vector.broadcast %c2_i32_0 : i32 to vector<14x28xi32>
    %8 = arith.muli %7, %0 : vector<14x28xi32>
    %c1_i32 = arith.constant 1 : i32
    %9 = vector.broadcast %c1_i32 : i32 to vector<14x28xi32>
    %10 = arith.addi %8, %9 : vector<14x28xi32>
    %11 = arith.cmpi eq, %1, %10 : vector<14x28xi32>
    %12 = arith.extui %11 : vector<14x28xi1> to vector<14x28xi32>
    %13 = arith.sitofp %12 : vector<14x28xi32> to vector<14x28xf32>
    %14 = tpu.iota {dimensions = array<i32: 0>} : vector<5x10xi32>
    %15 = tpu.iota {dimensions = array<i32: 1>} : vector<5x10xi32>
    %c2_i32_1 = arith.constant 2 : i32
    %16 = vector.broadcast %c2_i32_1 : i32 to vector<5x10xi32>
    %17 = arith.muli %16, %14 : vector<5x10xi32>
    %18 = arith.cmpi eq, %15, %17 : vector<5x10xi32>
    %19 = arith.extui %18 : vector<5x10xi1> to vector<5x10xi32>
    %20 = arith.sitofp %19 : vector<5x10xi32> to vector<5x10xf32>
    %c2_i32_2 = arith.constant 2 : i32
    %21 = vector.broadcast %c2_i32_2 : i32 to vector<5x10xi32>
    %22 = arith.muli %21, %14 : vector<5x10xi32>
    %c1_i32_3 = arith.constant 1 : i32
    %23 = vector.broadcast %c1_i32_3 : i32 to vector<5x10xi32>
    %24 = arith.addi %22, %23 : vector<5x10xi32>
    %25 = arith.cmpi eq, %15, %24 : vector<5x10xi32>
    %26 = arith.extui %25 : vector<5x10xi1> to vector<5x10xi32>
    %27 = arith.sitofp %26 : vector<5x10xi32> to vector<5x10xf32>
    %c0 = arith.constant 0 : index
    %c0_4 = arith.constant 0 : index
    %28 = vector.load %arg2[%c0, %c0_4] : memref<25x6xf32, #tpu.memory_space<vmem>>, vector<25x6xf32>
    %c0_5 = arith.constant 0 : index
    %c0_6 = arith.constant 0 : index
    %29 = vector.load %arg3[%c0_5, %c0_6] : memref<1x6xf32, #tpu.memory_space<vmem>>, vector<1x6xf32>
    %c0_i32 = arith.constant 0 : i32
    %c14_i32 = arith.constant 14 : i32
    %30 = arith.addi %c0_i32, %c14_i32 : i32
    %c1_i32_7 = arith.constant 1 : i32
    scf.for %arg18 = %c0_i32 to %30 step %c1_i32_7  : i32 {
      %c2_i32_134 = arith.constant 2 : i32
      %129 = arith.muli %c2_i32_134, %arg18 : i32
      %c0_i32_135 = arith.constant 0 : i32
      %130 = arith.addi %129, %c0_i32_135 : i32
      %131 = arith.index_cast %130 : i32 to index
      %c0_136 = arith.constant 0 : index
      %c0_137 = arith.constant 0 : index
      %132 = vector.load %arg1[%131, %c0_136, %c0_137] : memref<32x32x1xf32, #tpu.memory_space<vmem>>, vector<1x28x1xf32>
      %133 = vector.shape_cast %132 : vector<1x28x1xf32> to vector<28x1xf32>
      %c0_138 = arith.constant 0 : index
      %c0_139 = arith.constant 0 : index
      %134 = vector.load %arg15[%c0_138, %c0_139] : memref<28x25xf32, #tpu.memory_space<vmem>>, vector<28x1xf32>
      tpu.vector_store %arg15[%c0_138, %c0_139], %133 {strides = array<i32>} : memref<28x25xf32, #tpu.memory_space<vmem>>, vector<28x1xf32>,
      %c0_i32_140 = arith.constant 0 : i32
      %135 = arith.addi %129, %c0_i32_140 : i32
      %136 = arith.index_cast %135 : i32 to index
      %c1_141 = arith.constant 1 : index
      %c0_142 = arith.constant 0 : index
      %137 = vector.load %arg1[%136, %c1_141, %c0_142] : memref<32x32x1xf32, #tpu.memory_space<vmem>>, vector<1x28x1xf32>
      %138 = vector.shape_cast %137 : vector<1x28x1xf32> to vector<28x1xf32>
      %c0_143 = arith.constant 0 : index
      %c1_144 = arith.constant 1 : index
      %139 = vector.load %arg15[%c0_143, %c1_144] : memref<28x25xf32, #tpu.memory_space<vmem>>, vector<28x1xf32>
      tpu.vector_store %arg15[%c0_143, %c1_144], %138 {strides = array<i32>} : memref<28x25xf32, #tpu.memory_space<vmem>>, vector<28x1xf32>,
      %c0_i32_145 = arith.constant 0 : i32
      %140 = arith.addi %129, %c0_i32_145 : i32
      %141 = arith.index_cast %140 : i32 to index
      %c2_146 = arith.constant 2 : index
      %c0_147 = arith.constant 0 : index
      %142 = vector.load %arg1[%141, %c2_146, %c0_147] : memref<32x32x1xf32, #tpu.memory_space<vmem>>, vector<1x28x1xf32>
      %143 = vector.shape_cast %142 : vector<1x28x1xf32> to vector<28x1xf32>
      %c0_148 = arith.constant 0 : index
      %c2_149 = arith.constant 2 : index
      %144 = vector.load %arg15[%c0_148, %c2_149] : memref<28x25xf32, #tpu.memory_space<vmem>>, vector<28x1xf32>
      tpu.vector_store %arg15[%c0_148, %c2_149], %143 {strides = array<i32>} : memref<28x25xf32, #tpu.memory_space<vmem>>, vector<28x1xf32>,
      %c0_i32_150 = arith.constant 0 : i32
      %145 = arith.addi %129, %c0_i32_150 : i32
      %146 = arith.index_cast %145 : i32 to index
      %c3_151 = arith.constant 3 : index
      %c0_152 = arith.constant 0 : index
      %147 = vector.load %arg1[%146, %c3_151, %c0_152] : memref<32x32x1xf32, #tpu.memory_space<vmem>>, vector<1x28x1xf32>
      %148 = vector.shape_cast %147 : vector<1x28x1xf32> to vector<28x1xf32>
      %c0_153 = arith.constant 0 : index
      %c3_154 = arith.constant 3 : index
      %149 = vector.load %arg15[%c0_153, %c3_154] : memref<28x25xf32, #tpu.memory_space<vmem>>, vector<28x1xf32>
      tpu.vector_store %arg15[%c0_153, %c3_154], %148 {strides = array<i32>} : memref<28x25xf32, #tpu.memory_space<vmem>>, vector<28x1xf32>,
      %c0_i32_155 = arith.constant 0 : i32
      %150 = arith.addi %129, %c0_i32_155 : i32
      %151 = arith.index_cast %150 : i32 to index
      %c4_156 = arith.constant 4 : index
      %c0_157 = arith.constant 0 : index
      %152 = vector.load %arg1[%151, %c4_156, %c0_157] : memref<32x32x1xf32, #tpu.memory_space<vmem>>, vector<1x28x1xf32>
      %153 = vector.shape_cast %152 : vector<1x28x1xf32> to vector<28x1xf32>
      %c0_158 = arith.constant 0 : index
      %c4_159 = arith.constant 4 : index
      %154 = vector.load %arg15[%c0_158, %c4_159] : memref<28x25xf32, #tpu.memory_space<vmem>>, vector<28x1xf32>
      tpu.vector_store %arg15[%c0_158, %c4_159], %153 {strides = array<i32>} : memref<28x25xf32, #tpu.memory_space<vmem>>, vector<28x1xf32>,
      %c1_i32_160 = arith.constant 1 : i32
      %155 = arith.addi %129, %c1_i32_160 : i32
      %156 = arith.index_cast %155 : i32 to index
      %c0_161 = arith.constant 0 : index
      %c0_162 = arith.constant 0 : index
      %157 = vector.load %arg1[%156, %c0_161, %c0_162] : memref<32x32x1xf32, #tpu.memory_space<vmem>>, vector<1x28x1xf32>
      %158 = vector.shape_cast %157 : vector<1x28x1xf32> to vector<28x1xf32>
      %c0_163 = arith.constant 0 : index
      %c5 = arith.constant 5 : index
      %159 = vector.load %arg15[%c0_163, %c5] : memref<28x25xf32, #tpu.memory_space<vmem>>, vector<28x1xf32>
      tpu.vector_store %arg15[%c0_163, %c5], %158 {strides = array<i32>} : memref<28x25xf32, #tpu.memory_space<vmem>>, vector<28x1xf32>,
      %c1_i32_164 = arith.constant 1 : i32
      %160 = arith.addi %129, %c1_i32_164 : i32
      %161 = arith.index_cast %160 : i32 to index
      %c1_165 = arith.constant 1 : index
      %c0_166 = arith.constant 0 : index
      %162 = vector.load %arg1[%161, %c1_165, %c0_166] : memref<32x32x1xf32, #tpu.memory_space<vmem>>, vector<1x28x1xf32>
      %163 = vector.shape_cast %162 : vector<1x28x1xf32> to vector<28x1xf32>
      %c0_167 = arith.constant 0 : index
      %c6 = arith.constant 6 : index
      %164 = vector.load %arg15[%c0_167, %c6] : memref<28x25xf32, #tpu.memory_space<vmem>>, vector<28x1xf32>
      tpu.vector_store %arg15[%c0_167, %c6], %163 {strides = array<i32>} : memref<28x25xf32, #tpu.memory_space<vmem>>, vector<28x1xf32>,
      %c1_i32_168 = arith.constant 1 : i32
      %165 = arith.addi %129, %c1_i32_168 : i32
      %166 = arith.index_cast %165 : i32 to index
      %c2_169 = arith.constant 2 : index
      %c0_170 = arith.constant 0 : index
      %167 = vector.load %arg1[%166, %c2_169, %c0_170] : memref<32x32x1xf32, #tpu.memory_space<vmem>>, vector<1x28x1xf32>
      %168 = vector.shape_cast %167 : vector<1x28x1xf32> to vector<28x1xf32>
      %c0_171 = arith.constant 0 : index
      %c7 = arith.constant 7 : index
      %169 = vector.load %arg15[%c0_171, %c7] : memref<28x25xf32, #tpu.memory_space<vmem>>, vector<28x1xf32>
      tpu.vector_store %arg15[%c0_171, %c7], %168 {strides = array<i32>} : memref<28x25xf32, #tpu.memory_space<vmem>>, vector<28x1xf32>,
      %c1_i32_172 = arith.constant 1 : i32
      %170 = arith.addi %129, %c1_i32_172 : i32
      %171 = arith.index_cast %170 : i32 to index
      %c3_173 = arith.constant 3 : index
      %c0_174 = arith.constant 0 : index
      %172 = vector.load %arg1[%171, %c3_173, %c0_174] : memref<32x32x1xf32, #tpu.memory_space<vmem>>, vector<1x28x1xf32>
      %173 = vector.shape_cast %172 : vector<1x28x1xf32> to vector<28x1xf32>
      %c0_175 = arith.constant 0 : index
      %c8 = arith.constant 8 : index
      %174 = vector.load %arg15[%c0_175, %c8] : memref<28x25xf32, #tpu.memory_space<vmem>>, vector<28x1xf32>
      tpu.vector_store %arg15[%c0_175, %c8], %173 {strides = array<i32>} : memref<28x25xf32, #tpu.memory_space<vmem>>, vector<28x1xf32>,
      %c1_i32_176 = arith.constant 1 : i32
      %175 = arith.addi %129, %c1_i32_176 : i32
      %176 = arith.index_cast %175 : i32 to index
      %c4_177 = arith.constant 4 : index
      %c0_178 = arith.constant 0 : index
      %177 = vector.load %arg1[%176, %c4_177, %c0_178] : memref<32x32x1xf32, #tpu.memory_space<vmem>>, vector<1x28x1xf32>
      %178 = vector.shape_cast %177 : vector<1x28x1xf32> to vector<28x1xf32>
      %c0_179 = arith.constant 0 : index
      %c9 = arith.constant 9 : index
      %179 = vector.load %arg15[%c0_179, %c9] : memref<28x25xf32, #tpu.memory_space<vmem>>, vector<28x1xf32>
      tpu.vector_store %arg15[%c0_179, %c9], %178 {strides = array<i32>} : memref<28x25xf32, #tpu.memory_space<vmem>>, vector<28x1xf32>,
      %c2_i32_180 = arith.constant 2 : i32
      %180 = arith.addi %129, %c2_i32_180 : i32
      %181 = arith.index_cast %180 : i32 to index
      %c0_181 = arith.constant 0 : index
      %c0_182 = arith.constant 0 : index
      %182 = vector.load %arg1[%181, %c0_181, %c0_182] : memref<32x32x1xf32, #tpu.memory_space<vmem>>, vector<1x28x1xf32>
      %183 = vector.shape_cast %182 : vector<1x28x1xf32> to vector<28x1xf32>
      %c0_183 = arith.constant 0 : index
      %c10 = arith.constant 10 : index
      %184 = vector.load %arg15[%c0_183, %c10] : memref<28x25xf32, #tpu.memory_space<vmem>>, vector<28x1xf32>
      tpu.vector_store %arg15[%c0_183, %c10], %183 {strides = array<i32>} : memref<28x25xf32, #tpu.memory_space<vmem>>, vector<28x1xf32>,
      %c2_i32_184 = arith.constant 2 : i32
      %185 = arith.addi %129, %c2_i32_184 : i32
      %186 = arith.index_cast %185 : i32 to index
      %c1_185 = arith.constant 1 : index
      %c0_186 = arith.constant 0 : index
      %187 = vector.load %arg1[%186, %c1_185, %c0_186] : memref<32x32x1xf32, #tpu.memory_space<vmem>>, vector<1x28x1xf32>
      %188 = vector.shape_cast %187 : vector<1x28x1xf32> to vector<28x1xf32>
      %c0_187 = arith.constant 0 : index
      %c11 = arith.constant 11 : index
      %189 = vector.load %arg15[%c0_187, %c11] : memref<28x25xf32, #tpu.memory_space<vmem>>, vector<28x1xf32>
      tpu.vector_store %arg15[%c0_187, %c11], %188 {strides = array<i32>} : memref<28x25xf32, #tpu.memory_space<vmem>>, vector<28x1xf32>,
      %c2_i32_188 = arith.constant 2 : i32
      %190 = arith.addi %129, %c2_i32_188 : i32
      %191 = arith.index_cast %190 : i32 to index
      %c2_189 = arith.constant 2 : index
      %c0_190 = arith.constant 0 : index
      %192 = vector.load %arg1[%191, %c2_189, %c0_190] : memref<32x32x1xf32, #tpu.memory_space<vmem>>, vector<1x28x1xf32>
      %193 = vector.shape_cast %192 : vector<1x28x1xf32> to vector<28x1xf32>
      %c0_191 = arith.constant 0 : index
      %c12 = arith.constant 12 : index
      %194 = vector.load %arg15[%c0_191, %c12] : memref<28x25xf32, #tpu.memory_space<vmem>>, vector<28x1xf32>
      tpu.vector_store %arg15[%c0_191, %c12], %193 {strides = array<i32>} : memref<28x25xf32, #tpu.memory_space<vmem>>, vector<28x1xf32>,
      %c2_i32_192 = arith.constant 2 : i32
      %195 = arith.addi %129, %c2_i32_192 : i32
      %196 = arith.index_cast %195 : i32 to index
      %c3_193 = arith.constant 3 : index
      %c0_194 = arith.constant 0 : index
      %197 = vector.load %arg1[%196, %c3_193, %c0_194] : memref<32x32x1xf32, #tpu.memory_space<vmem>>, vector<1x28x1xf32>
      %198 = vector.shape_cast %197 : vector<1x28x1xf32> to vector<28x1xf32>
      %c0_195 = arith.constant 0 : index
      %c13 = arith.constant 13 : index
      %199 = vector.load %arg15[%c0_195, %c13] : memref<28x25xf32, #tpu.memory_space<vmem>>, vector<28x1xf32>
      tpu.vector_store %arg15[%c0_195, %c13], %198 {strides = array<i32>} : memref<28x25xf32, #tpu.memory_space<vmem>>, vector<28x1xf32>,
      %c2_i32_196 = arith.constant 2 : i32
      %200 = arith.addi %129, %c2_i32_196 : i32
      %201 = arith.index_cast %200 : i32 to index
      %c4_197 = arith.constant 4 : index
      %c0_198 = arith.constant 0 : index
      %202 = vector.load %arg1[%201, %c4_197, %c0_198] : memref<32x32x1xf32, #tpu.memory_space<vmem>>, vector<1x28x1xf32>
      %203 = vector.shape_cast %202 : vector<1x28x1xf32> to vector<28x1xf32>
      %c0_199 = arith.constant 0 : index
      %c14 = arith.constant 14 : index
      %204 = vector.load %arg15[%c0_199, %c14] : memref<28x25xf32, #tpu.memory_space<vmem>>, vector<28x1xf32>
      tpu.vector_store %arg15[%c0_199, %c14], %203 {strides = array<i32>} : memref<28x25xf32, #tpu.memory_space<vmem>>, vector<28x1xf32>,
      %c3_i32 = arith.constant 3 : i32
      %205 = arith.addi %129, %c3_i32 : i32
      %206 = arith.index_cast %205 : i32 to index
      %c0_200 = arith.constant 0 : index
      %c0_201 = arith.constant 0 : index
      %207 = vector.load %arg1[%206, %c0_200, %c0_201] : memref<32x32x1xf32, #tpu.memory_space<vmem>>, vector<1x28x1xf32>
      %208 = vector.shape_cast %207 : vector<1x28x1xf32> to vector<28x1xf32>
      %c0_202 = arith.constant 0 : index
      %c15 = arith.constant 15 : index
      %209 = vector.load %arg15[%c0_202, %c15] : memref<28x25xf32, #tpu.memory_space<vmem>>, vector<28x1xf32>
      tpu.vector_store %arg15[%c0_202, %c15], %208 {strides = array<i32>} : memref<28x25xf32, #tpu.memory_space<vmem>>, vector<28x1xf32>,
      %c3_i32_203 = arith.constant 3 : i32
      %210 = arith.addi %129, %c3_i32_203 : i32
      %211 = arith.index_cast %210 : i32 to index
      %c1_204 = arith.constant 1 : index
      %c0_205 = arith.constant 0 : index
      %212 = vector.load %arg1[%211, %c1_204, %c0_205] : memref<32x32x1xf32, #tpu.memory_space<vmem>>, vector<1x28x1xf32>
      %213 = vector.shape_cast %212 : vector<1x28x1xf32> to vector<28x1xf32>
      %c0_206 = arith.constant 0 : index
      %c16_207 = arith.constant 16 : index
      %214 = vector.load %arg15[%c0_206, %c16_207] : memref<28x25xf32, #tpu.memory_space<vmem>>, vector<28x1xf32>
      tpu.vector_store %arg15[%c0_206, %c16_207], %213 {strides = array<i32>} : memref<28x25xf32, #tpu.memory_space<vmem>>, vector<28x1xf32>,
      %c3_i32_208 = arith.constant 3 : i32
      %215 = arith.addi %129, %c3_i32_208 : i32
      %216 = arith.index_cast %215 : i32 to index
      %c2_209 = arith.constant 2 : index
      %c0_210 = arith.constant 0 : index
      %217 = vector.load %arg1[%216, %c2_209, %c0_210] : memref<32x32x1xf32, #tpu.memory_space<vmem>>, vector<1x28x1xf32>
      %218 = vector.shape_cast %217 : vector<1x28x1xf32> to vector<28x1xf32>
      %c0_211 = arith.constant 0 : index
      %c17 = arith.constant 17 : index
      %219 = vector.load %arg15[%c0_211, %c17] : memref<28x25xf32, #tpu.memory_space<vmem>>, vector<28x1xf32>
      tpu.vector_store %arg15[%c0_211, %c17], %218 {strides = array<i32>} : memref<28x25xf32, #tpu.memory_space<vmem>>, vector<28x1xf32>,
      %c3_i32_212 = arith.constant 3 : i32
      %220 = arith.addi %129, %c3_i32_212 : i32
      %221 = arith.index_cast %220 : i32 to index
      %c3_213 = arith.constant 3 : index
      %c0_214 = arith.constant 0 : index
      %222 = vector.load %arg1[%221, %c3_213, %c0_214] : memref<32x32x1xf32, #tpu.memory_space<vmem>>, vector<1x28x1xf32>
      %223 = vector.shape_cast %222 : vector<1x28x1xf32> to vector<28x1xf32>
      %c0_215 = arith.constant 0 : index
      %c18 = arith.constant 18 : index
      %224 = vector.load %arg15[%c0_215, %c18] : memref<28x25xf32, #tpu.memory_space<vmem>>, vector<28x1xf32>
      tpu.vector_store %arg15[%c0_215, %c18], %223 {strides = array<i32>} : memref<28x25xf32, #tpu.memory_space<vmem>>, vector<28x1xf32>,
      %c3_i32_216 = arith.constant 3 : i32
      %225 = arith.addi %129, %c3_i32_216 : i32
      %226 = arith.index_cast %225 : i32 to index
      %c4_217 = arith.constant 4 : index
      %c0_218 = arith.constant 0 : index
      %227 = vector.load %arg1[%226, %c4_217, %c0_218] : memref<32x32x1xf32, #tpu.memory_space<vmem>>, vector<1x28x1xf32>
      %228 = vector.shape_cast %227 : vector<1x28x1xf32> to vector<28x1xf32>
      %c0_219 = arith.constant 0 : index
      %c19 = arith.constant 19 : index
      %229 = vector.load %arg15[%c0_219, %c19] : memref<28x25xf32, #tpu.memory_space<vmem>>, vector<28x1xf32>
      tpu.vector_store %arg15[%c0_219, %c19], %228 {strides = array<i32>} : memref<28x25xf32, #tpu.memory_space<vmem>>, vector<28x1xf32>,
      %c4_i32 = arith.constant 4 : i32
      %230 = arith.addi %129, %c4_i32 : i32
      %231 = arith.index_cast %230 : i32 to index
      %c0_220 = arith.constant 0 : index
      %c0_221 = arith.constant 0 : index
      %232 = vector.load %arg1[%231, %c0_220, %c0_221] : memref<32x32x1xf32, #tpu.memory_space<vmem>>, vector<1x28x1xf32>
      %233 = vector.shape_cast %232 : vector<1x28x1xf32> to vector<28x1xf32>
      %c0_222 = arith.constant 0 : index
      %c20 = arith.constant 20 : index
      %234 = vector.load %arg15[%c0_222, %c20] : memref<28x25xf32, #tpu.memory_space<vmem>>, vector<28x1xf32>
      tpu.vector_store %arg15[%c0_222, %c20], %233 {strides = array<i32>} : memref<28x25xf32, #tpu.memory_space<vmem>>, vector<28x1xf32>,
      %c4_i32_223 = arith.constant 4 : i32
      %235 = arith.addi %129, %c4_i32_223 : i32
      %236 = arith.index_cast %235 : i32 to index
      %c1_224 = arith.constant 1 : index
      %c0_225 = arith.constant 0 : index
      %237 = vector.load %arg1[%236, %c1_224, %c0_225] : memref<32x32x1xf32, #tpu.memory_space<vmem>>, vector<1x28x1xf32>
      %238 = vector.shape_cast %237 : vector<1x28x1xf32> to vector<28x1xf32>
      %c0_226 = arith.constant 0 : index
      %c21 = arith.constant 21 : index
      %239 = vector.load %arg15[%c0_226, %c21] : memref<28x25xf32, #tpu.memory_space<vmem>>, vector<28x1xf32>
      tpu.vector_store %arg15[%c0_226, %c21], %238 {strides = array<i32>} : memref<28x25xf32, #tpu.memory_space<vmem>>, vector<28x1xf32>,
      %c4_i32_227 = arith.constant 4 : i32
      %240 = arith.addi %129, %c4_i32_227 : i32
      %241 = arith.index_cast %240 : i32 to index
      %c2_228 = arith.constant 2 : index
      %c0_229 = arith.constant 0 : index
      %242 = vector.load %arg1[%241, %c2_228, %c0_229] : memref<32x32x1xf32, #tpu.memory_space<vmem>>, vector<1x28x1xf32>
      %243 = vector.shape_cast %242 : vector<1x28x1xf32> to vector<28x1xf32>
      %c0_230 = arith.constant 0 : index
      %c22 = arith.constant 22 : index
      %244 = vector.load %arg15[%c0_230, %c22] : memref<28x25xf32, #tpu.memory_space<vmem>>, vector<28x1xf32>
      tpu.vector_store %arg15[%c0_230, %c22], %243 {strides = array<i32>} : memref<28x25xf32, #tpu.memory_space<vmem>>, vector<28x1xf32>,
      %c4_i32_231 = arith.constant 4 : i32
      %245 = arith.addi %129, %c4_i32_231 : i32
      %246 = arith.index_cast %245 : i32 to index
      %c3_232 = arith.constant 3 : index
      %c0_233 = arith.constant 0 : index
      %247 = vector.load %arg1[%246, %c3_232, %c0_233] : memref<32x32x1xf32, #tpu.memory_space<vmem>>, vector<1x28x1xf32>
      %248 = vector.shape_cast %247 : vector<1x28x1xf32> to vector<28x1xf32>
      %c0_234 = arith.constant 0 : index
      %c23 = arith.constant 23 : index
      %249 = vector.load %arg15[%c0_234, %c23] : memref<28x25xf32, #tpu.memory_space<vmem>>, vector<28x1xf32>
      tpu.vector_store %arg15[%c0_234, %c23], %248 {strides = array<i32>} : memref<28x25xf32, #tpu.memory_space<vmem>>, vector<28x1xf32>,
      %c4_i32_235 = arith.constant 4 : i32
      %250 = arith.addi %129, %c4_i32_235 : i32
      %251 = arith.index_cast %250 : i32 to index
      %c4_236 = arith.constant 4 : index
      %c0_237 = arith.constant 0 : index
      %252 = vector.load %arg1[%251, %c4_236, %c0_237] : memref<32x32x1xf32, #tpu.memory_space<vmem>>, vector<1x28x1xf32>
      %253 = vector.shape_cast %252 : vector<1x28x1xf32> to vector<28x1xf32>
      %c0_238 = arith.constant 0 : index
      %c24 = arith.constant 24 : index
      %254 = vector.load %arg15[%c0_238, %c24] : memref<28x25xf32, #tpu.memory_space<vmem>>, vector<28x1xf32>
      tpu.vector_store %arg15[%c0_238, %c24], %253 {strides = array<i32>} : memref<28x25xf32, #tpu.memory_space<vmem>>, vector<28x1xf32>,
      %c0_239 = arith.constant 0 : index
      %c0_240 = arith.constant 0 : index
      %255 = vector.load %arg15[%c0_239, %c0_240] : memref<28x25xf32, #tpu.memory_space<vmem>>, vector<28x25xf32>
      %cst_241 = arith.constant dense<0.000000e+00> : vector<28x6xf32>
      %256 = tpu.matmul %255, %28, %cst_241 {dimension_numbers = #tpu.dot_dimension_numbers<[1], [0], [0], [1], [0, 0, 1, 1], [], []>} : vector<28x25xf32>, vector<25x6xf32>, vector<28x6xf32> -> vector<28x6xf32>
      %257 = vector.broadcast %29 : vector<1x6xf32> to vector<28x6xf32>
      %258 = arith.addf %256, %257 : vector<28x6xf32>
      %cst_242 = arith.constant 0.000000e+00 : f32
      %259 = vector.broadcast %cst_242 : f32 to vector<28x6xf32>
      %260 = arith.maximumf %258, %259 : vector<28x6xf32>
      %c2_i32_243 = arith.constant 2 : i32
      %261 = arith.muli %c2_i32_243, %arg18 : i32
      %c1_i32_244 = arith.constant 1 : i32
      %262 = arith.addi %261, %c1_i32_244 : i32
      %c0_i32_245 = arith.constant 0 : i32
      %263 = arith.addi %262, %c0_i32_245 : i32
      %264 = arith.index_cast %263 : i32 to index
      %c0_246 = arith.constant 0 : index
      %c0_247 = arith.constant 0 : index
      %265 = vector.load %arg1[%264, %c0_246, %c0_247] : memref<32x32x1xf32, #tpu.memory_space<vmem>>, vector<1x28x1xf32>
      %266 = vector.shape_cast %265 : vector<1x28x1xf32> to vector<28x1xf32>
      %c0_248 = arith.constant 0 : index
      %c0_249 = arith.constant 0 : index
      %267 = vector.load %arg15[%c0_248, %c0_249] : memref<28x25xf32, #tpu.memory_space<vmem>>, vector<28x1xf32>
      tpu.vector_store %arg15[%c0_248, %c0_249], %266 {strides = array<i32>} : memref<28x25xf32, #tpu.memory_space<vmem>>, vector<28x1xf32>,
      %c0_i32_250 = arith.constant 0 : i32
      %268 = arith.addi %262, %c0_i32_250 : i32
      %269 = arith.index_cast %268 : i32 to index
      %c1_251 = arith.constant 1 : index
      %c0_252 = arith.constant 0 : index
      %270 = vector.load %arg1[%269, %c1_251, %c0_252] : memref<32x32x1xf32, #tpu.memory_space<vmem>>, vector<1x28x1xf32>
      %271 = vector.shape_cast %270 : vector<1x28x1xf32> to vector<28x1xf32>
      %c0_253 = arith.constant 0 : index
      %c1_254 = arith.constant 1 : index
      %272 = vector.load %arg15[%c0_253, %c1_254] : memref<28x25xf32, #tpu.memory_space<vmem>>, vector<28x1xf32>
      tpu.vector_store %arg15[%c0_253, %c1_254], %271 {strides = array<i32>} : memref<28x25xf32, #tpu.memory_space<vmem>>, vector<28x1xf32>,
      %c0_i32_255 = arith.constant 0 : i32
      %273 = arith.addi %262, %c0_i32_255 : i32
      %274 = arith.index_cast %273 : i32 to index
      %c2_256 = arith.constant 2 : index
      %c0_257 = arith.constant 0 : index
      %275 = vector.load %arg1[%274, %c2_256, %c0_257] : memref<32x32x1xf32, #tpu.memory_space<vmem>>, vector<1x28x1xf32>
      %276 = vector.shape_cast %275 : vector<1x28x1xf32> to vector<28x1xf32>
      %c0_258 = arith.constant 0 : index
      %c2_259 = arith.constant 2 : index
      %277 = vector.load %arg15[%c0_258, %c2_259] : memref<28x25xf32, #tpu.memory_space<vmem>>, vector<28x1xf32>
      tpu.vector_store %arg15[%c0_258, %c2_259], %276 {strides = array<i32>} : memref<28x25xf32, #tpu.memory_space<vmem>>, vector<28x1xf32>,
      %c0_i32_260 = arith.constant 0 : i32
      %278 = arith.addi %262, %c0_i32_260 : i32
      %279 = arith.index_cast %278 : i32 to index
      %c3_261 = arith.constant 3 : index
      %c0_262 = arith.constant 0 : index
      %280 = vector.load %arg1[%279, %c3_261, %c0_262] : memref<32x32x1xf32, #tpu.memory_space<vmem>>, vector<1x28x1xf32>
      %281 = vector.shape_cast %280 : vector<1x28x1xf32> to vector<28x1xf32>
      %c0_263 = arith.constant 0 : index
      %c3_264 = arith.constant 3 : index
      %282 = vector.load %arg15[%c0_263, %c3_264] : memref<28x25xf32, #tpu.memory_space<vmem>>, vector<28x1xf32>
      tpu.vector_store %arg15[%c0_263, %c3_264], %281 {strides = array<i32>} : memref<28x25xf32, #tpu.memory_space<vmem>>, vector<28x1xf32>,
      %c0_i32_265 = arith.constant 0 : i32
      %283 = arith.addi %262, %c0_i32_265 : i32
      %284 = arith.index_cast %283 : i32 to index
      %c4_266 = arith.constant 4 : index
      %c0_267 = arith.constant 0 : index
      %285 = vector.load %arg1[%284, %c4_266, %c0_267] : memref<32x32x1xf32, #tpu.memory_space<vmem>>, vector<1x28x1xf32>
      %286 = vector.shape_cast %285 : vector<1x28x1xf32> to vector<28x1xf32>
      %c0_268 = arith.constant 0 : index
      %c4_269 = arith.constant 4 : index
      %287 = vector.load %arg15[%c0_268, %c4_269] : memref<28x25xf32, #tpu.memory_space<vmem>>, vector<28x1xf32>
      tpu.vector_store %arg15[%c0_268, %c4_269], %286 {strides = array<i32>} : memref<28x25xf32, #tpu.memory_space<vmem>>, vector<28x1xf32>,
      %c1_i32_270 = arith.constant 1 : i32
      %288 = arith.addi %262, %c1_i32_270 : i32
      %289 = arith.index_cast %288 : i32 to index
      %c0_271 = arith.constant 0 : index
      %c0_272 = arith.constant 0 : index
      %290 = vector.load %arg1[%289, %c0_271, %c0_272] : memref<32x32x1xf32, #tpu.memory_space<vmem>>, vector<1x28x1xf32>
      %291 = vector.shape_cast %290 : vector<1x28x1xf32> to vector<28x1xf32>
      %c0_273 = arith.constant 0 : index
      %c5_274 = arith.constant 5 : index
      %292 = vector.load %arg15[%c0_273, %c5_274] : memref<28x25xf32, #tpu.memory_space<vmem>>, vector<28x1xf32>
      tpu.vector_store %arg15[%c0_273, %c5_274], %291 {strides = array<i32>} : memref<28x25xf32, #tpu.memory_space<vmem>>, vector<28x1xf32>,
      %c1_i32_275 = arith.constant 1 : i32
      %293 = arith.addi %262, %c1_i32_275 : i32
      %294 = arith.index_cast %293 : i32 to index
      %c1_276 = arith.constant 1 : index
      %c0_277 = arith.constant 0 : index
      %295 = vector.load %arg1[%294, %c1_276, %c0_277] : memref<32x32x1xf32, #tpu.memory_space<vmem>>, vector<1x28x1xf32>
      %296 = vector.shape_cast %295 : vector<1x28x1xf32> to vector<28x1xf32>
      %c0_278 = arith.constant 0 : index
      %c6_279 = arith.constant 6 : index
      %297 = vector.load %arg15[%c0_278, %c6_279] : memref<28x25xf32, #tpu.memory_space<vmem>>, vector<28x1xf32>
      tpu.vector_store %arg15[%c0_278, %c6_279], %296 {strides = array<i32>} : memref<28x25xf32, #tpu.memory_space<vmem>>, vector<28x1xf32>,
      %c1_i32_280 = arith.constant 1 : i32
      %298 = arith.addi %262, %c1_i32_280 : i32
      %299 = arith.index_cast %298 : i32 to index
      %c2_281 = arith.constant 2 : index
      %c0_282 = arith.constant 0 : index
      %300 = vector.load %arg1[%299, %c2_281, %c0_282] : memref<32x32x1xf32, #tpu.memory_space<vmem>>, vector<1x28x1xf32>
      %301 = vector.shape_cast %300 : vector<1x28x1xf32> to vector<28x1xf32>
      %c0_283 = arith.constant 0 : index
      %c7_284 = arith.constant 7 : index
      %302 = vector.load %arg15[%c0_283, %c7_284] : memref<28x25xf32, #tpu.memory_space<vmem>>, vector<28x1xf32>
      tpu.vector_store %arg15[%c0_283, %c7_284], %301 {strides = array<i32>} : memref<28x25xf32, #tpu.memory_space<vmem>>, vector<28x1xf32>,
      %c1_i32_285 = arith.constant 1 : i32
      %303 = arith.addi %262, %c1_i32_285 : i32
      %304 = arith.index_cast %303 : i32 to index
      %c3_286 = arith.constant 3 : index
      %c0_287 = arith.constant 0 : index
      %305 = vector.load %arg1[%304, %c3_286, %c0_287] : memref<32x32x1xf32, #tpu.memory_space<vmem>>, vector<1x28x1xf32>
      %306 = vector.shape_cast %305 : vector<1x28x1xf32> to vector<28x1xf32>
      %c0_288 = arith.constant 0 : index
      %c8_289 = arith.constant 8 : index
      %307 = vector.load %arg15[%c0_288, %c8_289] : memref<28x25xf32, #tpu.memory_space<vmem>>, vector<28x1xf32>
      tpu.vector_store %arg15[%c0_288, %c8_289], %306 {strides = array<i32>} : memref<28x25xf32, #tpu.memory_space<vmem>>, vector<28x1xf32>,
      %c1_i32_290 = arith.constant 1 : i32
      %308 = arith.addi %262, %c1_i32_290 : i32
      %309 = arith.index_cast %308 : i32 to index
      %c4_291 = arith.constant 4 : index
      %c0_292 = arith.constant 0 : index
      %310 = vector.load %arg1[%309, %c4_291, %c0_292] : memref<32x32x1xf32, #tpu.memory_space<vmem>>, vector<1x28x1xf32>
      %311 = vector.shape_cast %310 : vector<1x28x1xf32> to vector<28x1xf32>
      %c0_293 = arith.constant 0 : index
      %c9_294 = arith.constant 9 : index
      %312 = vector.load %arg15[%c0_293, %c9_294] : memref<28x25xf32, #tpu.memory_space<vmem>>, vector<28x1xf32>
      tpu.vector_store %arg15[%c0_293, %c9_294], %311 {strides = array<i32>} : memref<28x25xf32, #tpu.memory_space<vmem>>, vector<28x1xf32>,
      %c2_i32_295 = arith.constant 2 : i32
      %313 = arith.addi %262, %c2_i32_295 : i32
      %314 = arith.index_cast %313 : i32 to index
      %c0_296 = arith.constant 0 : index
      %c0_297 = arith.constant 0 : index
      %315 = vector.load %arg1[%314, %c0_296, %c0_297] : memref<32x32x1xf32, #tpu.memory_space<vmem>>, vector<1x28x1xf32>
      %316 = vector.shape_cast %315 : vector<1x28x1xf32> to vector<28x1xf32>
      %c0_298 = arith.constant 0 : index
      %c10_299 = arith.constant 10 : index
      %317 = vector.load %arg15[%c0_298, %c10_299] : memref<28x25xf32, #tpu.memory_space<vmem>>, vector<28x1xf32>
      tpu.vector_store %arg15[%c0_298, %c10_299], %316 {strides = array<i32>} : memref<28x25xf32, #tpu.memory_space<vmem>>, vector<28x1xf32>,
      %c2_i32_300 = arith.constant 2 : i32
      %318 = arith.addi %262, %c2_i32_300 : i32
      %319 = arith.index_cast %318 : i32 to index
      %c1_301 = arith.constant 1 : index
      %c0_302 = arith.constant 0 : index
      %320 = vector.load %arg1[%319, %c1_301, %c0_302] : memref<32x32x1xf32, #tpu.memory_space<vmem>>, vector<1x28x1xf32>
      %321 = vector.shape_cast %320 : vector<1x28x1xf32> to vector<28x1xf32>
      %c0_303 = arith.constant 0 : index
      %c11_304 = arith.constant 11 : index
      %322 = vector.load %arg15[%c0_303, %c11_304] : memref<28x25xf32, #tpu.memory_space<vmem>>, vector<28x1xf32>
      tpu.vector_store %arg15[%c0_303, %c11_304], %321 {strides = array<i32>} : memref<28x25xf32, #tpu.memory_space<vmem>>, vector<28x1xf32>,
      %c2_i32_305 = arith.constant 2 : i32
      %323 = arith.addi %262, %c2_i32_305 : i32
      %324 = arith.index_cast %323 : i32 to index
      %c2_306 = arith.constant 2 : index
      %c0_307 = arith.constant 0 : index
      %325 = vector.load %arg1[%324, %c2_306, %c0_307] : memref<32x32x1xf32, #tpu.memory_space<vmem>>, vector<1x28x1xf32>
      %326 = vector.shape_cast %325 : vector<1x28x1xf32> to vector<28x1xf32>
      %c0_308 = arith.constant 0 : index
      %c12_309 = arith.constant 12 : index
      %327 = vector.load %arg15[%c0_308, %c12_309] : memref<28x25xf32, #tpu.memory_space<vmem>>, vector<28x1xf32>
      tpu.vector_store %arg15[%c0_308, %c12_309], %326 {strides = array<i32>} : memref<28x25xf32, #tpu.memory_space<vmem>>, vector<28x1xf32>,
      %c2_i32_310 = arith.constant 2 : i32
      %328 = arith.addi %262, %c2_i32_310 : i32
      %329 = arith.index_cast %328 : i32 to index
      %c3_311 = arith.constant 3 : index
      %c0_312 = arith.constant 0 : index
      %330 = vector.load %arg1[%329, %c3_311, %c0_312] : memref<32x32x1xf32, #tpu.memory_space<vmem>>, vector<1x28x1xf32>
      %331 = vector.shape_cast %330 : vector<1x28x1xf32> to vector<28x1xf32>
      %c0_313 = arith.constant 0 : index
      %c13_314 = arith.constant 13 : index
      %332 = vector.load %arg15[%c0_313, %c13_314] : memref<28x25xf32, #tpu.memory_space<vmem>>, vector<28x1xf32>
      tpu.vector_store %arg15[%c0_313, %c13_314], %331 {strides = array<i32>} : memref<28x25xf32, #tpu.memory_space<vmem>>, vector<28x1xf32>,
      %c2_i32_315 = arith.constant 2 : i32
      %333 = arith.addi %262, %c2_i32_315 : i32
      %334 = arith.index_cast %333 : i32 to index
      %c4_316 = arith.constant 4 : index
      %c0_317 = arith.constant 0 : index
      %335 = vector.load %arg1[%334, %c4_316, %c0_317] : memref<32x32x1xf32, #tpu.memory_space<vmem>>, vector<1x28x1xf32>
      %336 = vector.shape_cast %335 : vector<1x28x1xf32> to vector<28x1xf32>
      %c0_318 = arith.constant 0 : index
      %c14_319 = arith.constant 14 : index
      %337 = vector.load %arg15[%c0_318, %c14_319] : memref<28x25xf32, #tpu.memory_space<vmem>>, vector<28x1xf32>
      tpu.vector_store %arg15[%c0_318, %c14_319], %336 {strides = array<i32>} : memref<28x25xf32, #tpu.memory_space<vmem>>, vector<28x1xf32>,
      %c3_i32_320 = arith.constant 3 : i32
      %338 = arith.addi %262, %c3_i32_320 : i32
      %339 = arith.index_cast %338 : i32 to index
      %c0_321 = arith.constant 0 : index
      %c0_322 = arith.constant 0 : index
      %340 = vector.load %arg1[%339, %c0_321, %c0_322] : memref<32x32x1xf32, #tpu.memory_space<vmem>>, vector<1x28x1xf32>
      %341 = vector.shape_cast %340 : vector<1x28x1xf32> to vector<28x1xf32>
      %c0_323 = arith.constant 0 : index
      %c15_324 = arith.constant 15 : index
      %342 = vector.load %arg15[%c0_323, %c15_324] : memref<28x25xf32, #tpu.memory_space<vmem>>, vector<28x1xf32>
      tpu.vector_store %arg15[%c0_323, %c15_324], %341 {strides = array<i32>} : memref<28x25xf32, #tpu.memory_space<vmem>>, vector<28x1xf32>,
      %c3_i32_325 = arith.constant 3 : i32
      %343 = arith.addi %262, %c3_i32_325 : i32
      %344 = arith.index_cast %343 : i32 to index
      %c1_326 = arith.constant 1 : index
      %c0_327 = arith.constant 0 : index
      %345 = vector.load %arg1[%344, %c1_326, %c0_327] : memref<32x32x1xf32, #tpu.memory_space<vmem>>, vector<1x28x1xf32>
      %346 = vector.shape_cast %345 : vector<1x28x1xf32> to vector<28x1xf32>
      %c0_328 = arith.constant 0 : index
      %c16_329 = arith.constant 16 : index
      %347 = vector.load %arg15[%c0_328, %c16_329] : memref<28x25xf32, #tpu.memory_space<vmem>>, vector<28x1xf32>
      tpu.vector_store %arg15[%c0_328, %c16_329], %346 {strides = array<i32>} : memref<28x25xf32, #tpu.memory_space<vmem>>, vector<28x1xf32>,
      %c3_i32_330 = arith.constant 3 : i32
      %348 = arith.addi %262, %c3_i32_330 : i32
      %349 = arith.index_cast %348 : i32 to index
      %c2_331 = arith.constant 2 : index
      %c0_332 = arith.constant 0 : index
      %350 = vector.load %arg1[%349, %c2_331, %c0_332] : memref<32x32x1xf32, #tpu.memory_space<vmem>>, vector<1x28x1xf32>
      %351 = vector.shape_cast %350 : vector<1x28x1xf32> to vector<28x1xf32>
      %c0_333 = arith.constant 0 : index
      %c17_334 = arith.constant 17 : index
      %352 = vector.load %arg15[%c0_333, %c17_334] : memref<28x25xf32, #tpu.memory_space<vmem>>, vector<28x1xf32>
      tpu.vector_store %arg15[%c0_333, %c17_334], %351 {strides = array<i32>} : memref<28x25xf32, #tpu.memory_space<vmem>>, vector<28x1xf32>,
      %c3_i32_335 = arith.constant 3 : i32
      %353 = arith.addi %262, %c3_i32_335 : i32
      %354 = arith.index_cast %353 : i32 to index
      %c3_336 = arith.constant 3 : index
      %c0_337 = arith.constant 0 : index
      %355 = vector.load %arg1[%354, %c3_336, %c0_337] : memref<32x32x1xf32, #tpu.memory_space<vmem>>, vector<1x28x1xf32>
      %356 = vector.shape_cast %355 : vector<1x28x1xf32> to vector<28x1xf32>
      %c0_338 = arith.constant 0 : index
      %c18_339 = arith.constant 18 : index
      %357 = vector.load %arg15[%c0_338, %c18_339] : memref<28x25xf32, #tpu.memory_space<vmem>>, vector<28x1xf32>
      tpu.vector_store %arg15[%c0_338, %c18_339], %356 {strides = array<i32>} : memref<28x25xf32, #tpu.memory_space<vmem>>, vector<28x1xf32>,
      %c3_i32_340 = arith.constant 3 : i32
      %358 = arith.addi %262, %c3_i32_340 : i32
      %359 = arith.index_cast %358 : i32 to index
      %c4_341 = arith.constant 4 : index
      %c0_342 = arith.constant 0 : index
      %360 = vector.load %arg1[%359, %c4_341, %c0_342] : memref<32x32x1xf32, #tpu.memory_space<vmem>>, vector<1x28x1xf32>
      %361 = vector.shape_cast %360 : vector<1x28x1xf32> to vector<28x1xf32>
      %c0_343 = arith.constant 0 : index
      %c19_344 = arith.constant 19 : index
      %362 = vector.load %arg15[%c0_343, %c19_344] : memref<28x25xf32, #tpu.memory_space<vmem>>, vector<28x1xf32>
      tpu.vector_store %arg15[%c0_343, %c19_344], %361 {strides = array<i32>} : memref<28x25xf32, #tpu.memory_space<vmem>>, vector<28x1xf32>,
      %c4_i32_345 = arith.constant 4 : i32
      %363 = arith.addi %262, %c4_i32_345 : i32
      %364 = arith.index_cast %363 : i32 to index
      %c0_346 = arith.constant 0 : index
      %c0_347 = arith.constant 0 : index
      %365 = vector.load %arg1[%364, %c0_346, %c0_347] : memref<32x32x1xf32, #tpu.memory_space<vmem>>, vector<1x28x1xf32>
      %366 = vector.shape_cast %365 : vector<1x28x1xf32> to vector<28x1xf32>
      %c0_348 = arith.constant 0 : index
      %c20_349 = arith.constant 20 : index
      %367 = vector.load %arg15[%c0_348, %c20_349] : memref<28x25xf32, #tpu.memory_space<vmem>>, vector<28x1xf32>
      tpu.vector_store %arg15[%c0_348, %c20_349], %366 {strides = array<i32>} : memref<28x25xf32, #tpu.memory_space<vmem>>, vector<28x1xf32>,
      %c4_i32_350 = arith.constant 4 : i32
      %368 = arith.addi %262, %c4_i32_350 : i32
      %369 = arith.index_cast %368 : i32 to index
      %c1_351 = arith.constant 1 : index
      %c0_352 = arith.constant 0 : index
      %370 = vector.load %arg1[%369, %c1_351, %c0_352] : memref<32x32x1xf32, #tpu.memory_space<vmem>>, vector<1x28x1xf32>
      %371 = vector.shape_cast %370 : vector<1x28x1xf32> to vector<28x1xf32>
      %c0_353 = arith.constant 0 : index
      %c21_354 = arith.constant 21 : index
      %372 = vector.load %arg15[%c0_353, %c21_354] : memref<28x25xf32, #tpu.memory_space<vmem>>, vector<28x1xf32>
      tpu.vector_store %arg15[%c0_353, %c21_354], %371 {strides = array<i32>} : memref<28x25xf32, #tpu.memory_space<vmem>>, vector<28x1xf32>,
      %c4_i32_355 = arith.constant 4 : i32
      %373 = arith.addi %262, %c4_i32_355 : i32
      %374 = arith.index_cast %373 : i32 to index
      %c2_356 = arith.constant 2 : index
      %c0_357 = arith.constant 0 : index
      %375 = vector.load %arg1[%374, %c2_356, %c0_357] : memref<32x32x1xf32, #tpu.memory_space<vmem>>, vector<1x28x1xf32>
      %376 = vector.shape_cast %375 : vector<1x28x1xf32> to vector<28x1xf32>
      %c0_358 = arith.constant 0 : index
      %c22_359 = arith.constant 22 : index
      %377 = vector.load %arg15[%c0_358, %c22_359] : memref<28x25xf32, #tpu.memory_space<vmem>>, vector<28x1xf32>
      tpu.vector_store %arg15[%c0_358, %c22_359], %376 {strides = array<i32>} : memref<28x25xf32, #tpu.memory_space<vmem>>, vector<28x1xf32>,
      %c4_i32_360 = arith.constant 4 : i32
      %378 = arith.addi %262, %c4_i32_360 : i32
      %379 = arith.index_cast %378 : i32 to index
      %c3_361 = arith.constant 3 : index
      %c0_362 = arith.constant 0 : index
      %380 = vector.load %arg1[%379, %c3_361, %c0_362] : memref<32x32x1xf32, #tpu.memory_space<vmem>>, vector<1x28x1xf32>
      %381 = vector.shape_cast %380 : vector<1x28x1xf32> to vector<28x1xf32>
      %c0_363 = arith.constant 0 : index
      %c23_364 = arith.constant 23 : index
      %382 = vector.load %arg15[%c0_363, %c23_364] : memref<28x25xf32, #tpu.memory_space<vmem>>, vector<28x1xf32>
      tpu.vector_store %arg15[%c0_363, %c23_364], %381 {strides = array<i32>} : memref<28x25xf32, #tpu.memory_space<vmem>>, vector<28x1xf32>,
      %c4_i32_365 = arith.constant 4 : i32
      %383 = arith.addi %262, %c4_i32_365 : i32
      %384 = arith.index_cast %383 : i32 to index
      %c4_366 = arith.constant 4 : index
      %c0_367 = arith.constant 0 : index
      %385 = vector.load %arg1[%384, %c4_366, %c0_367] : memref<32x32x1xf32, #tpu.memory_space<vmem>>, vector<1x28x1xf32>
      %386 = vector.shape_cast %385 : vector<1x28x1xf32> to vector<28x1xf32>
      %c0_368 = arith.constant 0 : index
      %c24_369 = arith.constant 24 : index
      %387 = vector.load %arg15[%c0_368, %c24_369] : memref<28x25xf32, #tpu.memory_space<vmem>>, vector<28x1xf32>
      tpu.vector_store %arg15[%c0_368, %c24_369], %386 {strides = array<i32>} : memref<28x25xf32, #tpu.memory_space<vmem>>, vector<28x1xf32>,
      %c0_370 = arith.constant 0 : index
      %c0_371 = arith.constant 0 : index
      %388 = vector.load %arg15[%c0_370, %c0_371] : memref<28x25xf32, #tpu.memory_space<vmem>>, vector<28x25xf32>
      %cst_372 = arith.constant dense<0.000000e+00> : vector<28x6xf32>
      %389 = tpu.matmul %388, %28, %cst_372 {dimension_numbers = #tpu.dot_dimension_numbers<[1], [0], [0], [1], [0, 0, 1, 1], [], []>} : vector<28x25xf32>, vector<25x6xf32>, vector<28x6xf32> -> vector<28x6xf32>
      %390 = vector.broadcast %29 : vector<1x6xf32> to vector<28x6xf32>
      %391 = arith.addf %389, %390 : vector<28x6xf32>
      %cst_373 = arith.constant 0.000000e+00 : f32
      %392 = vector.broadcast %cst_373 : f32 to vector<28x6xf32>
      %393 = arith.maximumf %391, %392 : vector<28x6xf32>
      %394 = arith.maximumf %260, %393 : vector<28x6xf32>
      %cst_374 = arith.constant dense<0.000000e+00> : vector<14x6xf32>
      %395 = tpu.matmul %6, %394, %cst_374 {dimension_numbers = #tpu.dot_dimension_numbers<[1], [0], [0], [1], [0, 0, 1, 1], [], []>} : vector<14x28xf32>, vector<28x6xf32>, vector<14x6xf32> -> vector<14x6xf32>
      %cst_375 = arith.constant dense<0.000000e+00> : vector<14x6xf32>
      %396 = tpu.matmul %13, %394, %cst_375 {dimension_numbers = #tpu.dot_dimension_numbers<[1], [0], [0], [1], [0, 0, 1, 1], [], []>} : vector<14x28xf32>, vector<28x6xf32>, vector<14x6xf32> -> vector<14x6xf32>
      %397 = arith.maximumf %395, %396 : vector<14x6xf32>
      %398 = arith.index_cast %arg18 : i32 to index
      %c0_376 = arith.constant 0 : index
      %c0_377 = arith.constant 0 : index
      %399 = vector.load %arg13[%398, %c0_376, %c0_377] : memref<14x14x6xf32, #tpu.memory_space<vmem>>, vector<1x14x6xf32>
      %400 = vector.shape_cast %399 : vector<1x14x6xf32> to vector<14x6xf32>
      %401 = vector.shape_cast %397 : vector<14x6xf32> to vector<1x14x6xf32>
      tpu.vector_store %arg13[%398, %c0_376, %c0_377], %401 {strides = array<i32>} : memref<14x14x6xf32, #tpu.memory_space<vmem>>, vector<1x14x6xf32>,
    }
    %c14_i32_8 = arith.constant 14 : i32
    %c0_9 = arith.constant 0 : index
    %c0_10 = arith.constant 0 : index
    %31 = vector.load %arg4[%c0_9, %c0_10] : memref<150x16xf32, #tpu.memory_space<vmem>>, vector<150x16xf32>
    %c0_11 = arith.constant 0 : index
    %c0_12 = arith.constant 0 : index
    %32 = vector.load %arg5[%c0_11, %c0_12] : memref<1x16xf32, #tpu.memory_space<vmem>>, vector<1x16xf32>
    %c0_i32_13 = arith.constant 0 : i32
    %c5_i32 = arith.constant 5 : i32
    %33 = arith.addi %c0_i32_13, %c5_i32 : i32
    %c1_i32_14 = arith.constant 1 : i32
    scf.for %arg18 = %c0_i32_13 to %33 step %c1_i32_14  : i32 {
      %c2_i32_134 = arith.constant 2 : i32
      %129 = arith.muli %c2_i32_134, %arg18 : i32
      %c0_i32_135 = arith.constant 0 : i32
      %130 = arith.addi %129, %c0_i32_135 : i32
      %131 = arith.index_cast %130 : i32 to index
      %c0_136 = arith.constant 0 : index
      %c0_137 = arith.constant 0 : index
      %132 = vector.load %arg13[%131, %c0_136, %c0_137] : memref<14x14x6xf32, #tpu.memory_space<vmem>>, vector<1x10x6xf32>
      %133 = vector.shape_cast %132 : vector<1x10x6xf32> to vector<10x6xf32>
      %c0_138 = arith.constant 0 : index
      %c0_139 = arith.constant 0 : index
      %134 = vector.load %arg16[%c0_138, %c0_139] : memref<10x150xf32, #tpu.memory_space<vmem>>, vector<10x6xf32>
      tpu.vector_store %arg16[%c0_138, %c0_139], %133 {strides = array<i32>} : memref<10x150xf32, #tpu.memory_space<vmem>>, vector<10x6xf32>,
      %c0_i32_140 = arith.constant 0 : i32
      %135 = arith.addi %129, %c0_i32_140 : i32
      %136 = arith.index_cast %135 : i32 to index
      %c1_141 = arith.constant 1 : index
      %c0_142 = arith.constant 0 : index
      %137 = vector.load %arg13[%136, %c1_141, %c0_142] : memref<14x14x6xf32, #tpu.memory_space<vmem>>, vector<1x10x6xf32>
      %138 = vector.shape_cast %137 : vector<1x10x6xf32> to vector<10x6xf32>
      %c0_143 = arith.constant 0 : index
      %c6 = arith.constant 6 : index
      %139 = vector.load %arg16[%c0_143, %c6] : memref<10x150xf32, #tpu.memory_space<vmem>>, vector<10x6xf32>
      tpu.vector_store %arg16[%c0_143, %c6], %138 {strides = array<i32>} : memref<10x150xf32, #tpu.memory_space<vmem>>, vector<10x6xf32>,
      %c0_i32_144 = arith.constant 0 : i32
      %140 = arith.addi %129, %c0_i32_144 : i32
      %141 = arith.index_cast %140 : i32 to index
      %c2_145 = arith.constant 2 : index
      %c0_146 = arith.constant 0 : index
      %142 = vector.load %arg13[%141, %c2_145, %c0_146] : memref<14x14x6xf32, #tpu.memory_space<vmem>>, vector<1x10x6xf32>
      %143 = vector.shape_cast %142 : vector<1x10x6xf32> to vector<10x6xf32>
      %c0_147 = arith.constant 0 : index
      %c12 = arith.constant 12 : index
      %144 = vector.load %arg16[%c0_147, %c12] : memref<10x150xf32, #tpu.memory_space<vmem>>, vector<10x6xf32>
      tpu.vector_store %arg16[%c0_147, %c12], %143 {strides = array<i32>} : memref<10x150xf32, #tpu.memory_space<vmem>>, vector<10x6xf32>,
      %c0_i32_148 = arith.constant 0 : i32
      %145 = arith.addi %129, %c0_i32_148 : i32
      %146 = arith.index_cast %145 : i32 to index
      %c3_149 = arith.constant 3 : index
      %c0_150 = arith.constant 0 : index
      %147 = vector.load %arg13[%146, %c3_149, %c0_150] : memref<14x14x6xf32, #tpu.memory_space<vmem>>, vector<1x10x6xf32>
      %148 = vector.shape_cast %147 : vector<1x10x6xf32> to vector<10x6xf32>
      %c0_151 = arith.constant 0 : index
      %c18 = arith.constant 18 : index
      %149 = vector.load %arg16[%c0_151, %c18] : memref<10x150xf32, #tpu.memory_space<vmem>>, vector<10x6xf32>
      tpu.vector_store %arg16[%c0_151, %c18], %148 {strides = array<i32>} : memref<10x150xf32, #tpu.memory_space<vmem>>, vector<10x6xf32>,
      %c0_i32_152 = arith.constant 0 : i32
      %150 = arith.addi %129, %c0_i32_152 : i32
      %151 = arith.index_cast %150 : i32 to index
      %c4_153 = arith.constant 4 : index
      %c0_154 = arith.constant 0 : index
      %152 = vector.load %arg13[%151, %c4_153, %c0_154] : memref<14x14x6xf32, #tpu.memory_space<vmem>>, vector<1x10x6xf32>
      %153 = vector.shape_cast %152 : vector<1x10x6xf32> to vector<10x6xf32>
      %c0_155 = arith.constant 0 : index
      %c24 = arith.constant 24 : index
      %154 = vector.load %arg16[%c0_155, %c24] : memref<10x150xf32, #tpu.memory_space<vmem>>, vector<10x6xf32>
      tpu.vector_store %arg16[%c0_155, %c24], %153 {strides = array<i32>} : memref<10x150xf32, #tpu.memory_space<vmem>>, vector<10x6xf32>,
      %c1_i32_156 = arith.constant 1 : i32
      %155 = arith.addi %129, %c1_i32_156 : i32
      %156 = arith.index_cast %155 : i32 to index
      %c0_157 = arith.constant 0 : index
      %c0_158 = arith.constant 0 : index
      %157 = vector.load %arg13[%156, %c0_157, %c0_158] : memref<14x14x6xf32, #tpu.memory_space<vmem>>, vector<1x10x6xf32>
      %158 = vector.shape_cast %157 : vector<1x10x6xf32> to vector<10x6xf32>
      %c0_159 = arith.constant 0 : index
      %c30 = arith.constant 30 : index
      %159 = vector.load %arg16[%c0_159, %c30] : memref<10x150xf32, #tpu.memory_space<vmem>>, vector<10x6xf32>
      tpu.vector_store %arg16[%c0_159, %c30], %158 {strides = array<i32>} : memref<10x150xf32, #tpu.memory_space<vmem>>, vector<10x6xf32>,
      %c1_i32_160 = arith.constant 1 : i32
      %160 = arith.addi %129, %c1_i32_160 : i32
      %161 = arith.index_cast %160 : i32 to index
      %c1_161 = arith.constant 1 : index
      %c0_162 = arith.constant 0 : index
      %162 = vector.load %arg13[%161, %c1_161, %c0_162] : memref<14x14x6xf32, #tpu.memory_space<vmem>>, vector<1x10x6xf32>
      %163 = vector.shape_cast %162 : vector<1x10x6xf32> to vector<10x6xf32>
      %c0_163 = arith.constant 0 : index
      %c36 = arith.constant 36 : index
      %164 = vector.load %arg16[%c0_163, %c36] : memref<10x150xf32, #tpu.memory_space<vmem>>, vector<10x6xf32>
      tpu.vector_store %arg16[%c0_163, %c36], %163 {strides = array<i32>} : memref<10x150xf32, #tpu.memory_space<vmem>>, vector<10x6xf32>,
      %c1_i32_164 = arith.constant 1 : i32
      %165 = arith.addi %129, %c1_i32_164 : i32
      %166 = arith.index_cast %165 : i32 to index
      %c2_165 = arith.constant 2 : index
      %c0_166 = arith.constant 0 : index
      %167 = vector.load %arg13[%166, %c2_165, %c0_166] : memref<14x14x6xf32, #tpu.memory_space<vmem>>, vector<1x10x6xf32>
      %168 = vector.shape_cast %167 : vector<1x10x6xf32> to vector<10x6xf32>
      %c0_167 = arith.constant 0 : index
      %c42 = arith.constant 42 : index
      %169 = vector.load %arg16[%c0_167, %c42] : memref<10x150xf32, #tpu.memory_space<vmem>>, vector<10x6xf32>
      tpu.vector_store %arg16[%c0_167, %c42], %168 {strides = array<i32>} : memref<10x150xf32, #tpu.memory_space<vmem>>, vector<10x6xf32>,
      %c1_i32_168 = arith.constant 1 : i32
      %170 = arith.addi %129, %c1_i32_168 : i32
      %171 = arith.index_cast %170 : i32 to index
      %c3_169 = arith.constant 3 : index
      %c0_170 = arith.constant 0 : index
      %172 = vector.load %arg13[%171, %c3_169, %c0_170] : memref<14x14x6xf32, #tpu.memory_space<vmem>>, vector<1x10x6xf32>
      %173 = vector.shape_cast %172 : vector<1x10x6xf32> to vector<10x6xf32>
      %c0_171 = arith.constant 0 : index
      %c48_172 = arith.constant 48 : index
      %174 = vector.load %arg16[%c0_171, %c48_172] : memref<10x150xf32, #tpu.memory_space<vmem>>, vector<10x6xf32>
      tpu.vector_store %arg16[%c0_171, %c48_172], %173 {strides = array<i32>} : memref<10x150xf32, #tpu.memory_space<vmem>>, vector<10x6xf32>,
      %c1_i32_173 = arith.constant 1 : i32
      %175 = arith.addi %129, %c1_i32_173 : i32
      %176 = arith.index_cast %175 : i32 to index
      %c4_174 = arith.constant 4 : index
      %c0_175 = arith.constant 0 : index
      %177 = vector.load %arg13[%176, %c4_174, %c0_175] : memref<14x14x6xf32, #tpu.memory_space<vmem>>, vector<1x10x6xf32>
      %178 = vector.shape_cast %177 : vector<1x10x6xf32> to vector<10x6xf32>
      %c0_176 = arith.constant 0 : index
      %c54 = arith.constant 54 : index
      %179 = vector.load %arg16[%c0_176, %c54] : memref<10x150xf32, #tpu.memory_space<vmem>>, vector<10x6xf32>
      tpu.vector_store %arg16[%c0_176, %c54], %178 {strides = array<i32>} : memref<10x150xf32, #tpu.memory_space<vmem>>, vector<10x6xf32>,
      %c2_i32_177 = arith.constant 2 : i32
      %180 = arith.addi %129, %c2_i32_177 : i32
      %181 = arith.index_cast %180 : i32 to index
      %c0_178 = arith.constant 0 : index
      %c0_179 = arith.constant 0 : index
      %182 = vector.load %arg13[%181, %c0_178, %c0_179] : memref<14x14x6xf32, #tpu.memory_space<vmem>>, vector<1x10x6xf32>
      %183 = vector.shape_cast %182 : vector<1x10x6xf32> to vector<10x6xf32>
      %c0_180 = arith.constant 0 : index
      %c60 = arith.constant 60 : index
      %184 = vector.load %arg16[%c0_180, %c60] : memref<10x150xf32, #tpu.memory_space<vmem>>, vector<10x6xf32>
      tpu.vector_store %arg16[%c0_180, %c60], %183 {strides = array<i32>} : memref<10x150xf32, #tpu.memory_space<vmem>>, vector<10x6xf32>,
      %c2_i32_181 = arith.constant 2 : i32
      %185 = arith.addi %129, %c2_i32_181 : i32
      %186 = arith.index_cast %185 : i32 to index
      %c1_182 = arith.constant 1 : index
      %c0_183 = arith.constant 0 : index
      %187 = vector.load %arg13[%186, %c1_182, %c0_183] : memref<14x14x6xf32, #tpu.memory_space<vmem>>, vector<1x10x6xf32>
      %188 = vector.shape_cast %187 : vector<1x10x6xf32> to vector<10x6xf32>
      %c0_184 = arith.constant 0 : index
      %c66 = arith.constant 66 : index
      %189 = vector.load %arg16[%c0_184, %c66] : memref<10x150xf32, #tpu.memory_space<vmem>>, vector<10x6xf32>
      tpu.vector_store %arg16[%c0_184, %c66], %188 {strides = array<i32>} : memref<10x150xf32, #tpu.memory_space<vmem>>, vector<10x6xf32>,
      %c2_i32_185 = arith.constant 2 : i32
      %190 = arith.addi %129, %c2_i32_185 : i32
      %191 = arith.index_cast %190 : i32 to index
      %c2_186 = arith.constant 2 : index
      %c0_187 = arith.constant 0 : index
      %192 = vector.load %arg13[%191, %c2_186, %c0_187] : memref<14x14x6xf32, #tpu.memory_space<vmem>>, vector<1x10x6xf32>
      %193 = vector.shape_cast %192 : vector<1x10x6xf32> to vector<10x6xf32>
      %c0_188 = arith.constant 0 : index
      %c72 = arith.constant 72 : index
      %194 = vector.load %arg16[%c0_188, %c72] : memref<10x150xf32, #tpu.memory_space<vmem>>, vector<10x6xf32>
      tpu.vector_store %arg16[%c0_188, %c72], %193 {strides = array<i32>} : memref<10x150xf32, #tpu.memory_space<vmem>>, vector<10x6xf32>,
      %c2_i32_189 = arith.constant 2 : i32
      %195 = arith.addi %129, %c2_i32_189 : i32
      %196 = arith.index_cast %195 : i32 to index
      %c3_190 = arith.constant 3 : index
      %c0_191 = arith.constant 0 : index
      %197 = vector.load %arg13[%196, %c3_190, %c0_191] : memref<14x14x6xf32, #tpu.memory_space<vmem>>, vector<1x10x6xf32>
      %198 = vector.shape_cast %197 : vector<1x10x6xf32> to vector<10x6xf32>
      %c0_192 = arith.constant 0 : index
      %c78 = arith.constant 78 : index
      %199 = vector.load %arg16[%c0_192, %c78] : memref<10x150xf32, #tpu.memory_space<vmem>>, vector<10x6xf32>
      tpu.vector_store %arg16[%c0_192, %c78], %198 {strides = array<i32>} : memref<10x150xf32, #tpu.memory_space<vmem>>, vector<10x6xf32>,
      %c2_i32_193 = arith.constant 2 : i32
      %200 = arith.addi %129, %c2_i32_193 : i32
      %201 = arith.index_cast %200 : i32 to index
      %c4_194 = arith.constant 4 : index
      %c0_195 = arith.constant 0 : index
      %202 = vector.load %arg13[%201, %c4_194, %c0_195] : memref<14x14x6xf32, #tpu.memory_space<vmem>>, vector<1x10x6xf32>
      %203 = vector.shape_cast %202 : vector<1x10x6xf32> to vector<10x6xf32>
      %c0_196 = arith.constant 0 : index
      %c84 = arith.constant 84 : index
      %204 = vector.load %arg16[%c0_196, %c84] : memref<10x150xf32, #tpu.memory_space<vmem>>, vector<10x6xf32>
      tpu.vector_store %arg16[%c0_196, %c84], %203 {strides = array<i32>} : memref<10x150xf32, #tpu.memory_space<vmem>>, vector<10x6xf32>,
      %c3_i32 = arith.constant 3 : i32
      %205 = arith.addi %129, %c3_i32 : i32
      %206 = arith.index_cast %205 : i32 to index
      %c0_197 = arith.constant 0 : index
      %c0_198 = arith.constant 0 : index
      %207 = vector.load %arg13[%206, %c0_197, %c0_198] : memref<14x14x6xf32, #tpu.memory_space<vmem>>, vector<1x10x6xf32>
      %208 = vector.shape_cast %207 : vector<1x10x6xf32> to vector<10x6xf32>
      %c0_199 = arith.constant 0 : index
      %c90 = arith.constant 90 : index
      %209 = vector.load %arg16[%c0_199, %c90] : memref<10x150xf32, #tpu.memory_space<vmem>>, vector<10x6xf32>
      tpu.vector_store %arg16[%c0_199, %c90], %208 {strides = array<i32>} : memref<10x150xf32, #tpu.memory_space<vmem>>, vector<10x6xf32>,
      %c3_i32_200 = arith.constant 3 : i32
      %210 = arith.addi %129, %c3_i32_200 : i32
      %211 = arith.index_cast %210 : i32 to index
      %c1_201 = arith.constant 1 : index
      %c0_202 = arith.constant 0 : index
      %212 = vector.load %arg13[%211, %c1_201, %c0_202] : memref<14x14x6xf32, #tpu.memory_space<vmem>>, vector<1x10x6xf32>
      %213 = vector.shape_cast %212 : vector<1x10x6xf32> to vector<10x6xf32>
      %c0_203 = arith.constant 0 : index
      %c96_204 = arith.constant 96 : index
      %214 = vector.load %arg16[%c0_203, %c96_204] : memref<10x150xf32, #tpu.memory_space<vmem>>, vector<10x6xf32>
      tpu.vector_store %arg16[%c0_203, %c96_204], %213 {strides = array<i32>} : memref<10x150xf32, #tpu.memory_space<vmem>>, vector<10x6xf32>,
      %c3_i32_205 = arith.constant 3 : i32
      %215 = arith.addi %129, %c3_i32_205 : i32
      %216 = arith.index_cast %215 : i32 to index
      %c2_206 = arith.constant 2 : index
      %c0_207 = arith.constant 0 : index
      %217 = vector.load %arg13[%216, %c2_206, %c0_207] : memref<14x14x6xf32, #tpu.memory_space<vmem>>, vector<1x10x6xf32>
      %218 = vector.shape_cast %217 : vector<1x10x6xf32> to vector<10x6xf32>
      %c0_208 = arith.constant 0 : index
      %c102 = arith.constant 102 : index
      %219 = vector.load %arg16[%c0_208, %c102] : memref<10x150xf32, #tpu.memory_space<vmem>>, vector<10x6xf32>
      tpu.vector_store %arg16[%c0_208, %c102], %218 {strides = array<i32>} : memref<10x150xf32, #tpu.memory_space<vmem>>, vector<10x6xf32>,
      %c3_i32_209 = arith.constant 3 : i32
      %220 = arith.addi %129, %c3_i32_209 : i32
      %221 = arith.index_cast %220 : i32 to index
      %c3_210 = arith.constant 3 : index
      %c0_211 = arith.constant 0 : index
      %222 = vector.load %arg13[%221, %c3_210, %c0_211] : memref<14x14x6xf32, #tpu.memory_space<vmem>>, vector<1x10x6xf32>
      %223 = vector.shape_cast %222 : vector<1x10x6xf32> to vector<10x6xf32>
      %c0_212 = arith.constant 0 : index
      %c108 = arith.constant 108 : index
      %224 = vector.load %arg16[%c0_212, %c108] : memref<10x150xf32, #tpu.memory_space<vmem>>, vector<10x6xf32>
      tpu.vector_store %arg16[%c0_212, %c108], %223 {strides = array<i32>} : memref<10x150xf32, #tpu.memory_space<vmem>>, vector<10x6xf32>,
      %c3_i32_213 = arith.constant 3 : i32
      %225 = arith.addi %129, %c3_i32_213 : i32
      %226 = arith.index_cast %225 : i32 to index
      %c4_214 = arith.constant 4 : index
      %c0_215 = arith.constant 0 : index
      %227 = vector.load %arg13[%226, %c4_214, %c0_215] : memref<14x14x6xf32, #tpu.memory_space<vmem>>, vector<1x10x6xf32>
      %228 = vector.shape_cast %227 : vector<1x10x6xf32> to vector<10x6xf32>
      %c0_216 = arith.constant 0 : index
      %c114 = arith.constant 114 : index
      %229 = vector.load %arg16[%c0_216, %c114] : memref<10x150xf32, #tpu.memory_space<vmem>>, vector<10x6xf32>
      tpu.vector_store %arg16[%c0_216, %c114], %228 {strides = array<i32>} : memref<10x150xf32, #tpu.memory_space<vmem>>, vector<10x6xf32>,
      %c4_i32 = arith.constant 4 : i32
      %230 = arith.addi %129, %c4_i32 : i32
      %231 = arith.index_cast %230 : i32 to index
      %c0_217 = arith.constant 0 : index
      %c0_218 = arith.constant 0 : index
      %232 = vector.load %arg13[%231, %c0_217, %c0_218] : memref<14x14x6xf32, #tpu.memory_space<vmem>>, vector<1x10x6xf32>
      %233 = vector.shape_cast %232 : vector<1x10x6xf32> to vector<10x6xf32>
      %c0_219 = arith.constant 0 : index
      %c120 = arith.constant 120 : index
      %234 = vector.load %arg16[%c0_219, %c120] : memref<10x150xf32, #tpu.memory_space<vmem>>, vector<10x6xf32>
      tpu.vector_store %arg16[%c0_219, %c120], %233 {strides = array<i32>} : memref<10x150xf32, #tpu.memory_space<vmem>>, vector<10x6xf32>,
      %c4_i32_220 = arith.constant 4 : i32
      %235 = arith.addi %129, %c4_i32_220 : i32
      %236 = arith.index_cast %235 : i32 to index
      %c1_221 = arith.constant 1 : index
      %c0_222 = arith.constant 0 : index
      %237 = vector.load %arg13[%236, %c1_221, %c0_222] : memref<14x14x6xf32, #tpu.memory_space<vmem>>, vector<1x10x6xf32>
      %238 = vector.shape_cast %237 : vector<1x10x6xf32> to vector<10x6xf32>
      %c0_223 = arith.constant 0 : index
      %c126 = arith.constant 126 : index
      %239 = vector.load %arg16[%c0_223, %c126] : memref<10x150xf32, #tpu.memory_space<vmem>>, vector<10x6xf32>
      tpu.vector_store %arg16[%c0_223, %c126], %238 {strides = array<i32>} : memref<10x150xf32, #tpu.memory_space<vmem>>, vector<10x6xf32>,
      %c4_i32_224 = arith.constant 4 : i32
      %240 = arith.addi %129, %c4_i32_224 : i32
      %241 = arith.index_cast %240 : i32 to index
      %c2_225 = arith.constant 2 : index
      %c0_226 = arith.constant 0 : index
      %242 = vector.load %arg13[%241, %c2_225, %c0_226] : memref<14x14x6xf32, #tpu.memory_space<vmem>>, vector<1x10x6xf32>
      %243 = vector.shape_cast %242 : vector<1x10x6xf32> to vector<10x6xf32>
      %c0_227 = arith.constant 0 : index
      %c132 = arith.constant 132 : index
      %244 = vector.load %arg16[%c0_227, %c132] : memref<10x150xf32, #tpu.memory_space<vmem>>, vector<10x6xf32>
      tpu.vector_store %arg16[%c0_227, %c132], %243 {strides = array<i32>} : memref<10x150xf32, #tpu.memory_space<vmem>>, vector<10x6xf32>,
      %c4_i32_228 = arith.constant 4 : i32
      %245 = arith.addi %129, %c4_i32_228 : i32
      %246 = arith.index_cast %245 : i32 to index
      %c3_229 = arith.constant 3 : index
      %c0_230 = arith.constant 0 : index
      %247 = vector.load %arg13[%246, %c3_229, %c0_230] : memref<14x14x6xf32, #tpu.memory_space<vmem>>, vector<1x10x6xf32>
      %248 = vector.shape_cast %247 : vector<1x10x6xf32> to vector<10x6xf32>
      %c0_231 = arith.constant 0 : index
      %c138 = arith.constant 138 : index
      %249 = vector.load %arg16[%c0_231, %c138] : memref<10x150xf32, #tpu.memory_space<vmem>>, vector<10x6xf32>
      tpu.vector_store %arg16[%c0_231, %c138], %248 {strides = array<i32>} : memref<10x150xf32, #tpu.memory_space<vmem>>, vector<10x6xf32>,
      %c4_i32_232 = arith.constant 4 : i32
      %250 = arith.addi %129, %c4_i32_232 : i32
      %251 = arith.index_cast %250 : i32 to index
      %c4_233 = arith.constant 4 : index
      %c0_234 = arith.constant 0 : index
      %252 = vector.load %arg13[%251, %c4_233, %c0_234] : memref<14x14x6xf32, #tpu.memory_space<vmem>>, vector<1x10x6xf32>
      %253 = vector.shape_cast %252 : vector<1x10x6xf32> to vector<10x6xf32>
      %c0_235 = arith.constant 0 : index
      %c144_236 = arith.constant 144 : index
      %254 = vector.load %arg16[%c0_235, %c144_236] : memref<10x150xf32, #tpu.memory_space<vmem>>, vector<10x6xf32>
      tpu.vector_store %arg16[%c0_235, %c144_236], %253 {strides = array<i32>} : memref<10x150xf32, #tpu.memory_space<vmem>>, vector<10x6xf32>,
      %c0_237 = arith.constant 0 : index
      %c0_238 = arith.constant 0 : index
      %255 = vector.load %arg16[%c0_237, %c0_238] : memref<10x150xf32, #tpu.memory_space<vmem>>, vector<10x150xf32>
      %cst_239 = arith.constant dense<0.000000e+00> : vector<10x16xf32>
      %256 = tpu.matmul %255, %31, %cst_239 {dimension_numbers = #tpu.dot_dimension_numbers<[1], [0], [0], [1], [0, 0, 1, 1], [], []>} : vector<10x150xf32>, vector<150x16xf32>, vector<10x16xf32> -> vector<10x16xf32>
      %257 = vector.broadcast %32 : vector<1x16xf32> to vector<10x16xf32>
      %258 = arith.addf %256, %257 : vector<10x16xf32>
      %cst_240 = arith.constant 0.000000e+00 : f32
      %259 = vector.broadcast %cst_240 : f32 to vector<10x16xf32>
      %260 = arith.maximumf %258, %259 : vector<10x16xf32>
      %c2_i32_241 = arith.constant 2 : i32
      %261 = arith.muli %c2_i32_241, %arg18 : i32
      %c1_i32_242 = arith.constant 1 : i32
      %262 = arith.addi %261, %c1_i32_242 : i32
      %c0_i32_243 = arith.constant 0 : i32
      %263 = arith.addi %262, %c0_i32_243 : i32
      %264 = arith.index_cast %263 : i32 to index
      %c0_244 = arith.constant 0 : index
      %c0_245 = arith.constant 0 : index
      %265 = vector.load %arg13[%264, %c0_244, %c0_245] : memref<14x14x6xf32, #tpu.memory_space<vmem>>, vector<1x10x6xf32>
      %266 = vector.shape_cast %265 : vector<1x10x6xf32> to vector<10x6xf32>
      %c0_246 = arith.constant 0 : index
      %c0_247 = arith.constant 0 : index
      %267 = vector.load %arg16[%c0_246, %c0_247] : memref<10x150xf32, #tpu.memory_space<vmem>>, vector<10x6xf32>
      tpu.vector_store %arg16[%c0_246, %c0_247], %266 {strides = array<i32>} : memref<10x150xf32, #tpu.memory_space<vmem>>, vector<10x6xf32>,
      %c0_i32_248 = arith.constant 0 : i32
      %268 = arith.addi %262, %c0_i32_248 : i32
      %269 = arith.index_cast %268 : i32 to index
      %c1_249 = arith.constant 1 : index
      %c0_250 = arith.constant 0 : index
      %270 = vector.load %arg13[%269, %c1_249, %c0_250] : memref<14x14x6xf32, #tpu.memory_space<vmem>>, vector<1x10x6xf32>
      %271 = vector.shape_cast %270 : vector<1x10x6xf32> to vector<10x6xf32>
      %c0_251 = arith.constant 0 : index
      %c6_252 = arith.constant 6 : index
      %272 = vector.load %arg16[%c0_251, %c6_252] : memref<10x150xf32, #tpu.memory_space<vmem>>, vector<10x6xf32>
      tpu.vector_store %arg16[%c0_251, %c6_252], %271 {strides = array<i32>} : memref<10x150xf32, #tpu.memory_space<vmem>>, vector<10x6xf32>,
      %c0_i32_253 = arith.constant 0 : i32
      %273 = arith.addi %262, %c0_i32_253 : i32
      %274 = arith.index_cast %273 : i32 to index
      %c2_254 = arith.constant 2 : index
      %c0_255 = arith.constant 0 : index
      %275 = vector.load %arg13[%274, %c2_254, %c0_255] : memref<14x14x6xf32, #tpu.memory_space<vmem>>, vector<1x10x6xf32>
      %276 = vector.shape_cast %275 : vector<1x10x6xf32> to vector<10x6xf32>
      %c0_256 = arith.constant 0 : index
      %c12_257 = arith.constant 12 : index
      %277 = vector.load %arg16[%c0_256, %c12_257] : memref<10x150xf32, #tpu.memory_space<vmem>>, vector<10x6xf32>
      tpu.vector_store %arg16[%c0_256, %c12_257], %276 {strides = array<i32>} : memref<10x150xf32, #tpu.memory_space<vmem>>, vector<10x6xf32>,
      %c0_i32_258 = arith.constant 0 : i32
      %278 = arith.addi %262, %c0_i32_258 : i32
      %279 = arith.index_cast %278 : i32 to index
      %c3_259 = arith.constant 3 : index
      %c0_260 = arith.constant 0 : index
      %280 = vector.load %arg13[%279, %c3_259, %c0_260] : memref<14x14x6xf32, #tpu.memory_space<vmem>>, vector<1x10x6xf32>
      %281 = vector.shape_cast %280 : vector<1x10x6xf32> to vector<10x6xf32>
      %c0_261 = arith.constant 0 : index
      %c18_262 = arith.constant 18 : index
      %282 = vector.load %arg16[%c0_261, %c18_262] : memref<10x150xf32, #tpu.memory_space<vmem>>, vector<10x6xf32>
      tpu.vector_store %arg16[%c0_261, %c18_262], %281 {strides = array<i32>} : memref<10x150xf32, #tpu.memory_space<vmem>>, vector<10x6xf32>,
      %c0_i32_263 = arith.constant 0 : i32
      %283 = arith.addi %262, %c0_i32_263 : i32
      %284 = arith.index_cast %283 : i32 to index
      %c4_264 = arith.constant 4 : index
      %c0_265 = arith.constant 0 : index
      %285 = vector.load %arg13[%284, %c4_264, %c0_265] : memref<14x14x6xf32, #tpu.memory_space<vmem>>, vector<1x10x6xf32>
      %286 = vector.shape_cast %285 : vector<1x10x6xf32> to vector<10x6xf32>
      %c0_266 = arith.constant 0 : index
      %c24_267 = arith.constant 24 : index
      %287 = vector.load %arg16[%c0_266, %c24_267] : memref<10x150xf32, #tpu.memory_space<vmem>>, vector<10x6xf32>
      tpu.vector_store %arg16[%c0_266, %c24_267], %286 {strides = array<i32>} : memref<10x150xf32, #tpu.memory_space<vmem>>, vector<10x6xf32>,
      %c1_i32_268 = arith.constant 1 : i32
      %288 = arith.addi %262, %c1_i32_268 : i32
      %289 = arith.index_cast %288 : i32 to index
      %c0_269 = arith.constant 0 : index
      %c0_270 = arith.constant 0 : index
      %290 = vector.load %arg13[%289, %c0_269, %c0_270] : memref<14x14x6xf32, #tpu.memory_space<vmem>>, vector<1x10x6xf32>
      %291 = vector.shape_cast %290 : vector<1x10x6xf32> to vector<10x6xf32>
      %c0_271 = arith.constant 0 : index
      %c30_272 = arith.constant 30 : index
      %292 = vector.load %arg16[%c0_271, %c30_272] : memref<10x150xf32, #tpu.memory_space<vmem>>, vector<10x6xf32>
      tpu.vector_store %arg16[%c0_271, %c30_272], %291 {strides = array<i32>} : memref<10x150xf32, #tpu.memory_space<vmem>>, vector<10x6xf32>,
      %c1_i32_273 = arith.constant 1 : i32
      %293 = arith.addi %262, %c1_i32_273 : i32
      %294 = arith.index_cast %293 : i32 to index
      %c1_274 = arith.constant 1 : index
      %c0_275 = arith.constant 0 : index
      %295 = vector.load %arg13[%294, %c1_274, %c0_275] : memref<14x14x6xf32, #tpu.memory_space<vmem>>, vector<1x10x6xf32>
      %296 = vector.shape_cast %295 : vector<1x10x6xf32> to vector<10x6xf32>
      %c0_276 = arith.constant 0 : index
      %c36_277 = arith.constant 36 : index
      %297 = vector.load %arg16[%c0_276, %c36_277] : memref<10x150xf32, #tpu.memory_space<vmem>>, vector<10x6xf32>
      tpu.vector_store %arg16[%c0_276, %c36_277], %296 {strides = array<i32>} : memref<10x150xf32, #tpu.memory_space<vmem>>, vector<10x6xf32>,
      %c1_i32_278 = arith.constant 1 : i32
      %298 = arith.addi %262, %c1_i32_278 : i32
      %299 = arith.index_cast %298 : i32 to index
      %c2_279 = arith.constant 2 : index
      %c0_280 = arith.constant 0 : index
      %300 = vector.load %arg13[%299, %c2_279, %c0_280] : memref<14x14x6xf32, #tpu.memory_space<vmem>>, vector<1x10x6xf32>
      %301 = vector.shape_cast %300 : vector<1x10x6xf32> to vector<10x6xf32>
      %c0_281 = arith.constant 0 : index
      %c42_282 = arith.constant 42 : index
      %302 = vector.load %arg16[%c0_281, %c42_282] : memref<10x150xf32, #tpu.memory_space<vmem>>, vector<10x6xf32>
      tpu.vector_store %arg16[%c0_281, %c42_282], %301 {strides = array<i32>} : memref<10x150xf32, #tpu.memory_space<vmem>>, vector<10x6xf32>,
      %c1_i32_283 = arith.constant 1 : i32
      %303 = arith.addi %262, %c1_i32_283 : i32
      %304 = arith.index_cast %303 : i32 to index
      %c3_284 = arith.constant 3 : index
      %c0_285 = arith.constant 0 : index
      %305 = vector.load %arg13[%304, %c3_284, %c0_285] : memref<14x14x6xf32, #tpu.memory_space<vmem>>, vector<1x10x6xf32>
      %306 = vector.shape_cast %305 : vector<1x10x6xf32> to vector<10x6xf32>
      %c0_286 = arith.constant 0 : index
      %c48_287 = arith.constant 48 : index
      %307 = vector.load %arg16[%c0_286, %c48_287] : memref<10x150xf32, #tpu.memory_space<vmem>>, vector<10x6xf32>
      tpu.vector_store %arg16[%c0_286, %c48_287], %306 {strides = array<i32>} : memref<10x150xf32, #tpu.memory_space<vmem>>, vector<10x6xf32>,
      %c1_i32_288 = arith.constant 1 : i32
      %308 = arith.addi %262, %c1_i32_288 : i32
      %309 = arith.index_cast %308 : i32 to index
      %c4_289 = arith.constant 4 : index
      %c0_290 = arith.constant 0 : index
      %310 = vector.load %arg13[%309, %c4_289, %c0_290] : memref<14x14x6xf32, #tpu.memory_space<vmem>>, vector<1x10x6xf32>
      %311 = vector.shape_cast %310 : vector<1x10x6xf32> to vector<10x6xf32>
      %c0_291 = arith.constant 0 : index
      %c54_292 = arith.constant 54 : index
      %312 = vector.load %arg16[%c0_291, %c54_292] : memref<10x150xf32, #tpu.memory_space<vmem>>, vector<10x6xf32>
      tpu.vector_store %arg16[%c0_291, %c54_292], %311 {strides = array<i32>} : memref<10x150xf32, #tpu.memory_space<vmem>>, vector<10x6xf32>,
      %c2_i32_293 = arith.constant 2 : i32
      %313 = arith.addi %262, %c2_i32_293 : i32
      %314 = arith.index_cast %313 : i32 to index
      %c0_294 = arith.constant 0 : index
      %c0_295 = arith.constant 0 : index
      %315 = vector.load %arg13[%314, %c0_294, %c0_295] : memref<14x14x6xf32, #tpu.memory_space<vmem>>, vector<1x10x6xf32>
      %316 = vector.shape_cast %315 : vector<1x10x6xf32> to vector<10x6xf32>
      %c0_296 = arith.constant 0 : index
      %c60_297 = arith.constant 60 : index
      %317 = vector.load %arg16[%c0_296, %c60_297] : memref<10x150xf32, #tpu.memory_space<vmem>>, vector<10x6xf32>
      tpu.vector_store %arg16[%c0_296, %c60_297], %316 {strides = array<i32>} : memref<10x150xf32, #tpu.memory_space<vmem>>, vector<10x6xf32>,
      %c2_i32_298 = arith.constant 2 : i32
      %318 = arith.addi %262, %c2_i32_298 : i32
      %319 = arith.index_cast %318 : i32 to index
      %c1_299 = arith.constant 1 : index
      %c0_300 = arith.constant 0 : index
      %320 = vector.load %arg13[%319, %c1_299, %c0_300] : memref<14x14x6xf32, #tpu.memory_space<vmem>>, vector<1x10x6xf32>
      %321 = vector.shape_cast %320 : vector<1x10x6xf32> to vector<10x6xf32>
      %c0_301 = arith.constant 0 : index
      %c66_302 = arith.constant 66 : index
      %322 = vector.load %arg16[%c0_301, %c66_302] : memref<10x150xf32, #tpu.memory_space<vmem>>, vector<10x6xf32>
      tpu.vector_store %arg16[%c0_301, %c66_302], %321 {strides = array<i32>} : memref<10x150xf32, #tpu.memory_space<vmem>>, vector<10x6xf32>,
      %c2_i32_303 = arith.constant 2 : i32
      %323 = arith.addi %262, %c2_i32_303 : i32
      %324 = arith.index_cast %323 : i32 to index
      %c2_304 = arith.constant 2 : index
      %c0_305 = arith.constant 0 : index
      %325 = vector.load %arg13[%324, %c2_304, %c0_305] : memref<14x14x6xf32, #tpu.memory_space<vmem>>, vector<1x10x6xf32>
      %326 = vector.shape_cast %325 : vector<1x10x6xf32> to vector<10x6xf32>
      %c0_306 = arith.constant 0 : index
      %c72_307 = arith.constant 72 : index
      %327 = vector.load %arg16[%c0_306, %c72_307] : memref<10x150xf32, #tpu.memory_space<vmem>>, vector<10x6xf32>
      tpu.vector_store %arg16[%c0_306, %c72_307], %326 {strides = array<i32>} : memref<10x150xf32, #tpu.memory_space<vmem>>, vector<10x6xf32>,
      %c2_i32_308 = arith.constant 2 : i32
      %328 = arith.addi %262, %c2_i32_308 : i32
      %329 = arith.index_cast %328 : i32 to index
      %c3_309 = arith.constant 3 : index
      %c0_310 = arith.constant 0 : index
      %330 = vector.load %arg13[%329, %c3_309, %c0_310] : memref<14x14x6xf32, #tpu.memory_space<vmem>>, vector<1x10x6xf32>
      %331 = vector.shape_cast %330 : vector<1x10x6xf32> to vector<10x6xf32>
      %c0_311 = arith.constant 0 : index
      %c78_312 = arith.constant 78 : index
      %332 = vector.load %arg16[%c0_311, %c78_312] : memref<10x150xf32, #tpu.memory_space<vmem>>, vector<10x6xf32>
      tpu.vector_store %arg16[%c0_311, %c78_312], %331 {strides = array<i32>} : memref<10x150xf32, #tpu.memory_space<vmem>>, vector<10x6xf32>,
      %c2_i32_313 = arith.constant 2 : i32
      %333 = arith.addi %262, %c2_i32_313 : i32
      %334 = arith.index_cast %333 : i32 to index
      %c4_314 = arith.constant 4 : index
      %c0_315 = arith.constant 0 : index
      %335 = vector.load %arg13[%334, %c4_314, %c0_315] : memref<14x14x6xf32, #tpu.memory_space<vmem>>, vector<1x10x6xf32>
      %336 = vector.shape_cast %335 : vector<1x10x6xf32> to vector<10x6xf32>
      %c0_316 = arith.constant 0 : index
      %c84_317 = arith.constant 84 : index
      %337 = vector.load %arg16[%c0_316, %c84_317] : memref<10x150xf32, #tpu.memory_space<vmem>>, vector<10x6xf32>
      tpu.vector_store %arg16[%c0_316, %c84_317], %336 {strides = array<i32>} : memref<10x150xf32, #tpu.memory_space<vmem>>, vector<10x6xf32>,
      %c3_i32_318 = arith.constant 3 : i32
      %338 = arith.addi %262, %c3_i32_318 : i32
      %339 = arith.index_cast %338 : i32 to index
      %c0_319 = arith.constant 0 : index
      %c0_320 = arith.constant 0 : index
      %340 = vector.load %arg13[%339, %c0_319, %c0_320] : memref<14x14x6xf32, #tpu.memory_space<vmem>>, vector<1x10x6xf32>
      %341 = vector.shape_cast %340 : vector<1x10x6xf32> to vector<10x6xf32>
      %c0_321 = arith.constant 0 : index
      %c90_322 = arith.constant 90 : index
      %342 = vector.load %arg16[%c0_321, %c90_322] : memref<10x150xf32, #tpu.memory_space<vmem>>, vector<10x6xf32>
      tpu.vector_store %arg16[%c0_321, %c90_322], %341 {strides = array<i32>} : memref<10x150xf32, #tpu.memory_space<vmem>>, vector<10x6xf32>,
      %c3_i32_323 = arith.constant 3 : i32
      %343 = arith.addi %262, %c3_i32_323 : i32
      %344 = arith.index_cast %343 : i32 to index
      %c1_324 = arith.constant 1 : index
      %c0_325 = arith.constant 0 : index
      %345 = vector.load %arg13[%344, %c1_324, %c0_325] : memref<14x14x6xf32, #tpu.memory_space<vmem>>, vector<1x10x6xf32>
      %346 = vector.shape_cast %345 : vector<1x10x6xf32> to vector<10x6xf32>
      %c0_326 = arith.constant 0 : index
      %c96_327 = arith.constant 96 : index
      %347 = vector.load %arg16[%c0_326, %c96_327] : memref<10x150xf32, #tpu.memory_space<vmem>>, vector<10x6xf32>
      tpu.vector_store %arg16[%c0_326, %c96_327], %346 {strides = array<i32>} : memref<10x150xf32, #tpu.memory_space<vmem>>, vector<10x6xf32>,
      %c3_i32_328 = arith.constant 3 : i32
      %348 = arith.addi %262, %c3_i32_328 : i32
      %349 = arith.index_cast %348 : i32 to index
      %c2_329 = arith.constant 2 : index
      %c0_330 = arith.constant 0 : index
      %350 = vector.load %arg13[%349, %c2_329, %c0_330] : memref<14x14x6xf32, #tpu.memory_space<vmem>>, vector<1x10x6xf32>
      %351 = vector.shape_cast %350 : vector<1x10x6xf32> to vector<10x6xf32>
      %c0_331 = arith.constant 0 : index
      %c102_332 = arith.constant 102 : index
      %352 = vector.load %arg16[%c0_331, %c102_332] : memref<10x150xf32, #tpu.memory_space<vmem>>, vector<10x6xf32>
      tpu.vector_store %arg16[%c0_331, %c102_332], %351 {strides = array<i32>} : memref<10x150xf32, #tpu.memory_space<vmem>>, vector<10x6xf32>,
      %c3_i32_333 = arith.constant 3 : i32
      %353 = arith.addi %262, %c3_i32_333 : i32
      %354 = arith.index_cast %353 : i32 to index
      %c3_334 = arith.constant 3 : index
      %c0_335 = arith.constant 0 : index
      %355 = vector.load %arg13[%354, %c3_334, %c0_335] : memref<14x14x6xf32, #tpu.memory_space<vmem>>, vector<1x10x6xf32>
      %356 = vector.shape_cast %355 : vector<1x10x6xf32> to vector<10x6xf32>
      %c0_336 = arith.constant 0 : index
      %c108_337 = arith.constant 108 : index
      %357 = vector.load %arg16[%c0_336, %c108_337] : memref<10x150xf32, #tpu.memory_space<vmem>>, vector<10x6xf32>
      tpu.vector_store %arg16[%c0_336, %c108_337], %356 {strides = array<i32>} : memref<10x150xf32, #tpu.memory_space<vmem>>, vector<10x6xf32>,
      %c3_i32_338 = arith.constant 3 : i32
      %358 = arith.addi %262, %c3_i32_338 : i32
      %359 = arith.index_cast %358 : i32 to index
      %c4_339 = arith.constant 4 : index
      %c0_340 = arith.constant 0 : index
      %360 = vector.load %arg13[%359, %c4_339, %c0_340] : memref<14x14x6xf32, #tpu.memory_space<vmem>>, vector<1x10x6xf32>
      %361 = vector.shape_cast %360 : vector<1x10x6xf32> to vector<10x6xf32>
      %c0_341 = arith.constant 0 : index
      %c114_342 = arith.constant 114 : index
      %362 = vector.load %arg16[%c0_341, %c114_342] : memref<10x150xf32, #tpu.memory_space<vmem>>, vector<10x6xf32>
      tpu.vector_store %arg16[%c0_341, %c114_342], %361 {strides = array<i32>} : memref<10x150xf32, #tpu.memory_space<vmem>>, vector<10x6xf32>,
      %c4_i32_343 = arith.constant 4 : i32
      %363 = arith.addi %262, %c4_i32_343 : i32
      %364 = arith.index_cast %363 : i32 to index
      %c0_344 = arith.constant 0 : index
      %c0_345 = arith.constant 0 : index
      %365 = vector.load %arg13[%364, %c0_344, %c0_345] : memref<14x14x6xf32, #tpu.memory_space<vmem>>, vector<1x10x6xf32>
      %366 = vector.shape_cast %365 : vector<1x10x6xf32> to vector<10x6xf32>
      %c0_346 = arith.constant 0 : index
      %c120_347 = arith.constant 120 : index
      %367 = vector.load %arg16[%c0_346, %c120_347] : memref<10x150xf32, #tpu.memory_space<vmem>>, vector<10x6xf32>
      tpu.vector_store %arg16[%c0_346, %c120_347], %366 {strides = array<i32>} : memref<10x150xf32, #tpu.memory_space<vmem>>, vector<10x6xf32>,
      %c4_i32_348 = arith.constant 4 : i32
      %368 = arith.addi %262, %c4_i32_348 : i32
      %369 = arith.index_cast %368 : i32 to index
      %c1_349 = arith.constant 1 : index
      %c0_350 = arith.constant 0 : index
      %370 = vector.load %arg13[%369, %c1_349, %c0_350] : memref<14x14x6xf32, #tpu.memory_space<vmem>>, vector<1x10x6xf32>
      %371 = vector.shape_cast %370 : vector<1x10x6xf32> to vector<10x6xf32>
      %c0_351 = arith.constant 0 : index
      %c126_352 = arith.constant 126 : index
      %372 = vector.load %arg16[%c0_351, %c126_352] : memref<10x150xf32, #tpu.memory_space<vmem>>, vector<10x6xf32>
      tpu.vector_store %arg16[%c0_351, %c126_352], %371 {strides = array<i32>} : memref<10x150xf32, #tpu.memory_space<vmem>>, vector<10x6xf32>,
      %c4_i32_353 = arith.constant 4 : i32
      %373 = arith.addi %262, %c4_i32_353 : i32
      %374 = arith.index_cast %373 : i32 to index
      %c2_354 = arith.constant 2 : index
      %c0_355 = arith.constant 0 : index
      %375 = vector.load %arg13[%374, %c2_354, %c0_355] : memref<14x14x6xf32, #tpu.memory_space<vmem>>, vector<1x10x6xf32>
      %376 = vector.shape_cast %375 : vector<1x10x6xf32> to vector<10x6xf32>
      %c0_356 = arith.constant 0 : index
      %c132_357 = arith.constant 132 : index
      %377 = vector.load %arg16[%c0_356, %c132_357] : memref<10x150xf32, #tpu.memory_space<vmem>>, vector<10x6xf32>
      tpu.vector_store %arg16[%c0_356, %c132_357], %376 {strides = array<i32>} : memref<10x150xf32, #tpu.memory_space<vmem>>, vector<10x6xf32>,
      %c4_i32_358 = arith.constant 4 : i32
      %378 = arith.addi %262, %c4_i32_358 : i32
      %379 = arith.index_cast %378 : i32 to index
      %c3_359 = arith.constant 3 : index
      %c0_360 = arith.constant 0 : index
      %380 = vector.load %arg13[%379, %c3_359, %c0_360] : memref<14x14x6xf32, #tpu.memory_space<vmem>>, vector<1x10x6xf32>
      %381 = vector.shape_cast %380 : vector<1x10x6xf32> to vector<10x6xf32>
      %c0_361 = arith.constant 0 : index
      %c138_362 = arith.constant 138 : index
      %382 = vector.load %arg16[%c0_361, %c138_362] : memref<10x150xf32, #tpu.memory_space<vmem>>, vector<10x6xf32>
      tpu.vector_store %arg16[%c0_361, %c138_362], %381 {strides = array<i32>} : memref<10x150xf32, #tpu.memory_space<vmem>>, vector<10x6xf32>,
      %c4_i32_363 = arith.constant 4 : i32
      %383 = arith.addi %262, %c4_i32_363 : i32
      %384 = arith.index_cast %383 : i32 to index
      %c4_364 = arith.constant 4 : index
      %c0_365 = arith.constant 0 : index
      %385 = vector.load %arg13[%384, %c4_364, %c0_365] : memref<14x14x6xf32, #tpu.memory_space<vmem>>, vector<1x10x6xf32>
      %386 = vector.shape_cast %385 : vector<1x10x6xf32> to vector<10x6xf32>
      %c0_366 = arith.constant 0 : index
      %c144_367 = arith.constant 144 : index
      %387 = vector.load %arg16[%c0_366, %c144_367] : memref<10x150xf32, #tpu.memory_space<vmem>>, vector<10x6xf32>
      tpu.vector_store %arg16[%c0_366, %c144_367], %386 {strides = array<i32>} : memref<10x150xf32, #tpu.memory_space<vmem>>, vector<10x6xf32>,
      %c0_368 = arith.constant 0 : index
      %c0_369 = arith.constant 0 : index
      %388 = vector.load %arg16[%c0_368, %c0_369] : memref<10x150xf32, #tpu.memory_space<vmem>>, vector<10x150xf32>
      %cst_370 = arith.constant dense<0.000000e+00> : vector<10x16xf32>
      %389 = tpu.matmul %388, %31, %cst_370 {dimension_numbers = #tpu.dot_dimension_numbers<[1], [0], [0], [1], [0, 0, 1, 1], [], []>} : vector<10x150xf32>, vector<150x16xf32>, vector<10x16xf32> -> vector<10x16xf32>
      %390 = vector.broadcast %32 : vector<1x16xf32> to vector<10x16xf32>
      %391 = arith.addf %389, %390 : vector<10x16xf32>
      %cst_371 = arith.constant 0.000000e+00 : f32
      %392 = vector.broadcast %cst_371 : f32 to vector<10x16xf32>
      %393 = arith.maximumf %391, %392 : vector<10x16xf32>
      %394 = arith.maximumf %260, %393 : vector<10x16xf32>
      %cst_372 = arith.constant dense<0.000000e+00> : vector<5x16xf32>
      %395 = tpu.matmul %20, %394, %cst_372 {dimension_numbers = #tpu.dot_dimension_numbers<[1], [0], [0], [1], [0, 0, 1, 1], [], []>} : vector<5x10xf32>, vector<10x16xf32>, vector<5x16xf32> -> vector<5x16xf32>
      %cst_373 = arith.constant dense<0.000000e+00> : vector<5x16xf32>
      %396 = tpu.matmul %27, %394, %cst_373 {dimension_numbers = #tpu.dot_dimension_numbers<[1], [0], [0], [1], [0, 0, 1, 1], [], []>} : vector<5x10xf32>, vector<10x16xf32>, vector<5x16xf32> -> vector<5x16xf32>
      %397 = arith.maximumf %395, %396 : vector<5x16xf32>
      %398 = arith.index_cast %arg18 : i32 to index
      %c0_374 = arith.constant 0 : index
      %c0_375 = arith.constant 0 : index
      %399 = vector.load %arg14[%398, %c0_374, %c0_375] : memref<5x5x16xf32, #tpu.memory_space<vmem>>, vector<1x5x16xf32>
      %400 = vector.shape_cast %399 : vector<1x5x16xf32> to vector<5x16xf32>
      %401 = vector.shape_cast %397 : vector<5x16xf32> to vector<1x5x16xf32>
      tpu.vector_store %arg14[%398, %c0_374, %c0_375], %401 {strides = array<i32>} : memref<5x5x16xf32, #tpu.memory_space<vmem>>, vector<1x5x16xf32>,
    }
    %c5_i32_15 = arith.constant 5 : i32
    %c0_16 = arith.constant 0 : index
    %c0_17 = arith.constant 0 : index
    %c0_18 = arith.constant 0 : index
    %34 = vector.load %arg14[%c0_16, %c0_17, %c0_18] : memref<5x5x16xf32, #tpu.memory_space<vmem>>, vector<1x1x16xf32>
    %35 = vector.shape_cast %34 : vector<1x1x16xf32> to vector<1x16xf32>
    %c0_19 = arith.constant 0 : index
    %c0_20 = arith.constant 0 : index
    %36 = vector.load %arg17[%c0_19, %c0_20] : memref<1x400xf32, #tpu.memory_space<vmem>>, vector<1x16xf32>
    tpu.vector_store %arg17[%c0_19, %c0_20], %35 {strides = array<i32>} : memref<1x400xf32, #tpu.memory_space<vmem>>, vector<1x16xf32>,
    %c0_21 = arith.constant 0 : index
    %c1 = arith.constant 1 : index
    %c0_22 = arith.constant 0 : index
    %37 = vector.load %arg14[%c0_21, %c1, %c0_22] : memref<5x5x16xf32, #tpu.memory_space<vmem>>, vector<1x1x16xf32>
    %38 = vector.shape_cast %37 : vector<1x1x16xf32> to vector<1x16xf32>
    %c0_23 = arith.constant 0 : index
    %c16 = arith.constant 16 : index
    %39 = vector.load %arg17[%c0_23, %c16] : memref<1x400xf32, #tpu.memory_space<vmem>>, vector<1x16xf32>
    tpu.vector_store %arg17[%c0_23, %c16], %38 {strides = array<i32>} : memref<1x400xf32, #tpu.memory_space<vmem>>, vector<1x16xf32>,
    %c0_24 = arith.constant 0 : index
    %c2 = arith.constant 2 : index
    %c0_25 = arith.constant 0 : index
    %40 = vector.load %arg14[%c0_24, %c2, %c0_25] : memref<5x5x16xf32, #tpu.memory_space<vmem>>, vector<1x1x16xf32>
    %41 = vector.shape_cast %40 : vector<1x1x16xf32> to vector<1x16xf32>
    %c0_26 = arith.constant 0 : index
    %c32 = arith.constant 32 : index
    %42 = vector.load %arg17[%c0_26, %c32] : memref<1x400xf32, #tpu.memory_space<vmem>>, vector<1x16xf32>
    tpu.vector_store %arg17[%c0_26, %c32], %41 {strides = array<i32>} : memref<1x400xf32, #tpu.memory_space<vmem>>, vector<1x16xf32>,
    %c0_27 = arith.constant 0 : index
    %c3 = arith.constant 3 : index
    %c0_28 = arith.constant 0 : index
    %43 = vector.load %arg14[%c0_27, %c3, %c0_28] : memref<5x5x16xf32, #tpu.memory_space<vmem>>, vector<1x1x16xf32>
    %44 = vector.shape_cast %43 : vector<1x1x16xf32> to vector<1x16xf32>
    %c0_29 = arith.constant 0 : index
    %c48 = arith.constant 48 : index
    %45 = vector.load %arg17[%c0_29, %c48] : memref<1x400xf32, #tpu.memory_space<vmem>>, vector<1x16xf32>
    tpu.vector_store %arg17[%c0_29, %c48], %44 {strides = array<i32>} : memref<1x400xf32, #tpu.memory_space<vmem>>, vector<1x16xf32>,
    %c0_30 = arith.constant 0 : index
    %c4 = arith.constant 4 : index
    %c0_31 = arith.constant 0 : index
    %46 = vector.load %arg14[%c0_30, %c4, %c0_31] : memref<5x5x16xf32, #tpu.memory_space<vmem>>, vector<1x1x16xf32>
    %47 = vector.shape_cast %46 : vector<1x1x16xf32> to vector<1x16xf32>
    %c0_32 = arith.constant 0 : index
    %c64 = arith.constant 64 : index
    %48 = vector.load %arg17[%c0_32, %c64] : memref<1x400xf32, #tpu.memory_space<vmem>>, vector<1x16xf32>
    tpu.vector_store %arg17[%c0_32, %c64], %47 {strides = array<i32>} : memref<1x400xf32, #tpu.memory_space<vmem>>, vector<1x16xf32>,
    %c1_33 = arith.constant 1 : index
    %c0_34 = arith.constant 0 : index
    %c0_35 = arith.constant 0 : index
    %49 = vector.load %arg14[%c1_33, %c0_34, %c0_35] : memref<5x5x16xf32, #tpu.memory_space<vmem>>, vector<1x1x16xf32>
    %50 = vector.shape_cast %49 : vector<1x1x16xf32> to vector<1x16xf32>
    %c0_36 = arith.constant 0 : index
    %c80 = arith.constant 80 : index
    %51 = vector.load %arg17[%c0_36, %c80] : memref<1x400xf32, #tpu.memory_space<vmem>>, vector<1x16xf32>
    tpu.vector_store %arg17[%c0_36, %c80], %50 {strides = array<i32>} : memref<1x400xf32, #tpu.memory_space<vmem>>, vector<1x16xf32>,
    %c1_37 = arith.constant 1 : index
    %c1_38 = arith.constant 1 : index
    %c0_39 = arith.constant 0 : index
    %52 = vector.load %arg14[%c1_37, %c1_38, %c0_39] : memref<5x5x16xf32, #tpu.memory_space<vmem>>, vector<1x1x16xf32>
    %53 = vector.shape_cast %52 : vector<1x1x16xf32> to vector<1x16xf32>
    %c0_40 = arith.constant 0 : index
    %c96 = arith.constant 96 : index
    %54 = vector.load %arg17[%c0_40, %c96] : memref<1x400xf32, #tpu.memory_space<vmem>>, vector<1x16xf32>
    tpu.vector_store %arg17[%c0_40, %c96], %53 {strides = array<i32>} : memref<1x400xf32, #tpu.memory_space<vmem>>, vector<1x16xf32>,
    %c1_41 = arith.constant 1 : index
    %c2_42 = arith.constant 2 : index
    %c0_43 = arith.constant 0 : index
    %55 = vector.load %arg14[%c1_41, %c2_42, %c0_43] : memref<5x5x16xf32, #tpu.memory_space<vmem>>, vector<1x1x16xf32>
    %56 = vector.shape_cast %55 : vector<1x1x16xf32> to vector<1x16xf32>
    %c0_44 = arith.constant 0 : index
    %c112 = arith.constant 112 : index
    %57 = vector.load %arg17[%c0_44, %c112] : memref<1x400xf32, #tpu.memory_space<vmem>>, vector<1x16xf32>
    tpu.vector_store %arg17[%c0_44, %c112], %56 {strides = array<i32>} : memref<1x400xf32, #tpu.memory_space<vmem>>, vector<1x16xf32>,
    %c1_45 = arith.constant 1 : index
    %c3_46 = arith.constant 3 : index
    %c0_47 = arith.constant 0 : index
    %58 = vector.load %arg14[%c1_45, %c3_46, %c0_47] : memref<5x5x16xf32, #tpu.memory_space<vmem>>, vector<1x1x16xf32>
    %59 = vector.shape_cast %58 : vector<1x1x16xf32> to vector<1x16xf32>
    %c0_48 = arith.constant 0 : index
    %c128 = arith.constant 128 : index
    %60 = vector.load %arg17[%c0_48, %c128] : memref<1x400xf32, #tpu.memory_space<vmem>>, vector<1x16xf32>
    tpu.vector_store %arg17[%c0_48, %c128], %59 {strides = array<i32>} : memref<1x400xf32, #tpu.memory_space<vmem>>, vector<1x16xf32>,
    %c1_49 = arith.constant 1 : index
    %c4_50 = arith.constant 4 : index
    %c0_51 = arith.constant 0 : index
    %61 = vector.load %arg14[%c1_49, %c4_50, %c0_51] : memref<5x5x16xf32, #tpu.memory_space<vmem>>, vector<1x1x16xf32>
    %62 = vector.shape_cast %61 : vector<1x1x16xf32> to vector<1x16xf32>
    %c0_52 = arith.constant 0 : index
    %c144 = arith.constant 144 : index
    %63 = vector.load %arg17[%c0_52, %c144] : memref<1x400xf32, #tpu.memory_space<vmem>>, vector<1x16xf32>
    tpu.vector_store %arg17[%c0_52, %c144], %62 {strides = array<i32>} : memref<1x400xf32, #tpu.memory_space<vmem>>, vector<1x16xf32>,
    %c2_53 = arith.constant 2 : index
    %c0_54 = arith.constant 0 : index
    %c0_55 = arith.constant 0 : index
    %64 = vector.load %arg14[%c2_53, %c0_54, %c0_55] : memref<5x5x16xf32, #tpu.memory_space<vmem>>, vector<1x1x16xf32>
    %65 = vector.shape_cast %64 : vector<1x1x16xf32> to vector<1x16xf32>
    %c0_56 = arith.constant 0 : index
    %c160 = arith.constant 160 : index
    %66 = vector.load %arg17[%c0_56, %c160] : memref<1x400xf32, #tpu.memory_space<vmem>>, vector<1x16xf32>
    tpu.vector_store %arg17[%c0_56, %c160], %65 {strides = array<i32>} : memref<1x400xf32, #tpu.memory_space<vmem>>, vector<1x16xf32>,
    %c2_57 = arith.constant 2 : index
    %c1_58 = arith.constant 1 : index
    %c0_59 = arith.constant 0 : index
    %67 = vector.load %arg14[%c2_57, %c1_58, %c0_59] : memref<5x5x16xf32, #tpu.memory_space<vmem>>, vector<1x1x16xf32>
    %68 = vector.shape_cast %67 : vector<1x1x16xf32> to vector<1x16xf32>
    %c0_60 = arith.constant 0 : index
    %c176 = arith.constant 176 : index
    %69 = vector.load %arg17[%c0_60, %c176] : memref<1x400xf32, #tpu.memory_space<vmem>>, vector<1x16xf32>
    tpu.vector_store %arg17[%c0_60, %c176], %68 {strides = array<i32>} : memref<1x400xf32, #tpu.memory_space<vmem>>, vector<1x16xf32>,
    %c2_61 = arith.constant 2 : index
    %c2_62 = arith.constant 2 : index
    %c0_63 = arith.constant 0 : index
    %70 = vector.load %arg14[%c2_61, %c2_62, %c0_63] : memref<5x5x16xf32, #tpu.memory_space<vmem>>, vector<1x1x16xf32>
    %71 = vector.shape_cast %70 : vector<1x1x16xf32> to vector<1x16xf32>
    %c0_64 = arith.constant 0 : index
    %c192 = arith.constant 192 : index
    %72 = vector.load %arg17[%c0_64, %c192] : memref<1x400xf32, #tpu.memory_space<vmem>>, vector<1x16xf32>
    tpu.vector_store %arg17[%c0_64, %c192], %71 {strides = array<i32>} : memref<1x400xf32, #tpu.memory_space<vmem>>, vector<1x16xf32>,
    %c2_65 = arith.constant 2 : index
    %c3_66 = arith.constant 3 : index
    %c0_67 = arith.constant 0 : index
    %73 = vector.load %arg14[%c2_65, %c3_66, %c0_67] : memref<5x5x16xf32, #tpu.memory_space<vmem>>, vector<1x1x16xf32>
    %74 = vector.shape_cast %73 : vector<1x1x16xf32> to vector<1x16xf32>
    %c0_68 = arith.constant 0 : index
    %c208 = arith.constant 208 : index
    %75 = vector.load %arg17[%c0_68, %c208] : memref<1x400xf32, #tpu.memory_space<vmem>>, vector<1x16xf32>
    tpu.vector_store %arg17[%c0_68, %c208], %74 {strides = array<i32>} : memref<1x400xf32, #tpu.memory_space<vmem>>, vector<1x16xf32>,
    %c2_69 = arith.constant 2 : index
    %c4_70 = arith.constant 4 : index
    %c0_71 = arith.constant 0 : index
    %76 = vector.load %arg14[%c2_69, %c4_70, %c0_71] : memref<5x5x16xf32, #tpu.memory_space<vmem>>, vector<1x1x16xf32>
    %77 = vector.shape_cast %76 : vector<1x1x16xf32> to vector<1x16xf32>
    %c0_72 = arith.constant 0 : index
    %c224 = arith.constant 224 : index
    %78 = vector.load %arg17[%c0_72, %c224] : memref<1x400xf32, #tpu.memory_space<vmem>>, vector<1x16xf32>
    tpu.vector_store %arg17[%c0_72, %c224], %77 {strides = array<i32>} : memref<1x400xf32, #tpu.memory_space<vmem>>, vector<1x16xf32>,
    %c3_73 = arith.constant 3 : index
    %c0_74 = arith.constant 0 : index
    %c0_75 = arith.constant 0 : index
    %79 = vector.load %arg14[%c3_73, %c0_74, %c0_75] : memref<5x5x16xf32, #tpu.memory_space<vmem>>, vector<1x1x16xf32>
    %80 = vector.shape_cast %79 : vector<1x1x16xf32> to vector<1x16xf32>
    %c0_76 = arith.constant 0 : index
    %c240 = arith.constant 240 : index
    %81 = vector.load %arg17[%c0_76, %c240] : memref<1x400xf32, #tpu.memory_space<vmem>>, vector<1x16xf32>
    tpu.vector_store %arg17[%c0_76, %c240], %80 {strides = array<i32>} : memref<1x400xf32, #tpu.memory_space<vmem>>, vector<1x16xf32>,
    %c3_77 = arith.constant 3 : index
    %c1_78 = arith.constant 1 : index
    %c0_79 = arith.constant 0 : index
    %82 = vector.load %arg14[%c3_77, %c1_78, %c0_79] : memref<5x5x16xf32, #tpu.memory_space<vmem>>, vector<1x1x16xf32>
    %83 = vector.shape_cast %82 : vector<1x1x16xf32> to vector<1x16xf32>
    %c0_80 = arith.constant 0 : index
    %c256 = arith.constant 256 : index
    %84 = vector.load %arg17[%c0_80, %c256] : memref<1x400xf32, #tpu.memory_space<vmem>>, vector<1x16xf32>
    tpu.vector_store %arg17[%c0_80, %c256], %83 {strides = array<i32>} : memref<1x400xf32, #tpu.memory_space<vmem>>, vector<1x16xf32>,
    %c3_81 = arith.constant 3 : index
    %c2_82 = arith.constant 2 : index
    %c0_83 = arith.constant 0 : index
    %85 = vector.load %arg14[%c3_81, %c2_82, %c0_83] : memref<5x5x16xf32, #tpu.memory_space<vmem>>, vector<1x1x16xf32>
    %86 = vector.shape_cast %85 : vector<1x1x16xf32> to vector<1x16xf32>
    %c0_84 = arith.constant 0 : index
    %c272 = arith.constant 272 : index
    %87 = vector.load %arg17[%c0_84, %c272] : memref<1x400xf32, #tpu.memory_space<vmem>>, vector<1x16xf32>
    tpu.vector_store %arg17[%c0_84, %c272], %86 {strides = array<i32>} : memref<1x400xf32, #tpu.memory_space<vmem>>, vector<1x16xf32>,
    %c3_85 = arith.constant 3 : index
    %c3_86 = arith.constant 3 : index
    %c0_87 = arith.constant 0 : index
    %88 = vector.load %arg14[%c3_85, %c3_86, %c0_87] : memref<5x5x16xf32, #tpu.memory_space<vmem>>, vector<1x1x16xf32>
    %89 = vector.shape_cast %88 : vector<1x1x16xf32> to vector<1x16xf32>
    %c0_88 = arith.constant 0 : index
    %c288 = arith.constant 288 : index
    %90 = vector.load %arg17[%c0_88, %c288] : memref<1x400xf32, #tpu.memory_space<vmem>>, vector<1x16xf32>
    tpu.vector_store %arg17[%c0_88, %c288], %89 {strides = array<i32>} : memref<1x400xf32, #tpu.memory_space<vmem>>, vector<1x16xf32>,
    %c3_89 = arith.constant 3 : index
    %c4_90 = arith.constant 4 : index
    %c0_91 = arith.constant 0 : index
    %91 = vector.load %arg14[%c3_89, %c4_90, %c0_91] : memref<5x5x16xf32, #tpu.memory_space<vmem>>, vector<1x1x16xf32>
    %92 = vector.shape_cast %91 : vector<1x1x16xf32> to vector<1x16xf32>
    %c0_92 = arith.constant 0 : index
    %c304 = arith.constant 304 : index
    %93 = vector.load %arg17[%c0_92, %c304] : memref<1x400xf32, #tpu.memory_space<vmem>>, vector<1x16xf32>
    tpu.vector_store %arg17[%c0_92, %c304], %92 {strides = array<i32>} : memref<1x400xf32, #tpu.memory_space<vmem>>, vector<1x16xf32>,
    %c4_93 = arith.constant 4 : index
    %c0_94 = arith.constant 0 : index
    %c0_95 = arith.constant 0 : index
    %94 = vector.load %arg14[%c4_93, %c0_94, %c0_95] : memref<5x5x16xf32, #tpu.memory_space<vmem>>, vector<1x1x16xf32>
    %95 = vector.shape_cast %94 : vector<1x1x16xf32> to vector<1x16xf32>
    %c0_96 = arith.constant 0 : index
    %c320 = arith.constant 320 : index
    %96 = vector.load %arg17[%c0_96, %c320] : memref<1x400xf32, #tpu.memory_space<vmem>>, vector<1x16xf32>
    tpu.vector_store %arg17[%c0_96, %c320], %95 {strides = array<i32>} : memref<1x400xf32, #tpu.memory_space<vmem>>, vector<1x16xf32>,
    %c4_97 = arith.constant 4 : index
    %c1_98 = arith.constant 1 : index
    %c0_99 = arith.constant 0 : index
    %97 = vector.load %arg14[%c4_97, %c1_98, %c0_99] : memref<5x5x16xf32, #tpu.memory_space<vmem>>, vector<1x1x16xf32>
    %98 = vector.shape_cast %97 : vector<1x1x16xf32> to vector<1x16xf32>
    %c0_100 = arith.constant 0 : index
    %c336 = arith.constant 336 : index
    %99 = vector.load %arg17[%c0_100, %c336] : memref<1x400xf32, #tpu.memory_space<vmem>>, vector<1x16xf32>
    tpu.vector_store %arg17[%c0_100, %c336], %98 {strides = array<i32>} : memref<1x400xf32, #tpu.memory_space<vmem>>, vector<1x16xf32>,
    %c4_101 = arith.constant 4 : index
    %c2_102 = arith.constant 2 : index
    %c0_103 = arith.constant 0 : index
    %100 = vector.load %arg14[%c4_101, %c2_102, %c0_103] : memref<5x5x16xf32, #tpu.memory_space<vmem>>, vector<1x1x16xf32>
    %101 = vector.shape_cast %100 : vector<1x1x16xf32> to vector<1x16xf32>
    %c0_104 = arith.constant 0 : index
    %c352 = arith.constant 352 : index
    %102 = vector.load %arg17[%c0_104, %c352] : memref<1x400xf32, #tpu.memory_space<vmem>>, vector<1x16xf32>
    tpu.vector_store %arg17[%c0_104, %c352], %101 {strides = array<i32>} : memref<1x400xf32, #tpu.memory_space<vmem>>, vector<1x16xf32>,
    %c4_105 = arith.constant 4 : index
    %c3_106 = arith.constant 3 : index
    %c0_107 = arith.constant 0 : index
    %103 = vector.load %arg14[%c4_105, %c3_106, %c0_107] : memref<5x5x16xf32, #tpu.memory_space<vmem>>, vector<1x1x16xf32>
    %104 = vector.shape_cast %103 : vector<1x1x16xf32> to vector<1x16xf32>
    %c0_108 = arith.constant 0 : index
    %c368 = arith.constant 368 : index
    %105 = vector.load %arg17[%c0_108, %c368] : memref<1x400xf32, #tpu.memory_space<vmem>>, vector<1x16xf32>
    tpu.vector_store %arg17[%c0_108, %c368], %104 {strides = array<i32>} : memref<1x400xf32, #tpu.memory_space<vmem>>, vector<1x16xf32>,
    %c4_109 = arith.constant 4 : index
    %c4_110 = arith.constant 4 : index
    %c0_111 = arith.constant 0 : index
    %106 = vector.load %arg14[%c4_109, %c4_110, %c0_111] : memref<5x5x16xf32, #tpu.memory_space<vmem>>, vector<1x1x16xf32>
    %107 = vector.shape_cast %106 : vector<1x1x16xf32> to vector<1x16xf32>
    %c0_112 = arith.constant 0 : index
    %c384 = arith.constant 384 : index
    %108 = vector.load %arg17[%c0_112, %c384] : memref<1x400xf32, #tpu.memory_space<vmem>>, vector<1x16xf32>
    tpu.vector_store %arg17[%c0_112, %c384], %107 {strides = array<i32>} : memref<1x400xf32, #tpu.memory_space<vmem>>, vector<1x16xf32>,
    %c0_113 = arith.constant 0 : index
    %c0_114 = arith.constant 0 : index
    %109 = vector.load %arg17[%c0_113, %c0_114] : memref<1x400xf32, #tpu.memory_space<vmem>>, vector<1x400xf32>
    %c0_115 = arith.constant 0 : index
    %c0_116 = arith.constant 0 : index
    %110 = vector.load %arg6[%c0_115, %c0_116] : memref<400x120xf32, #tpu.memory_space<vmem>>, vector<400x120xf32>
    %cst = arith.constant dense<0.000000e+00> : vector<1x120xf32>
    %111 = tpu.matmul %109, %110, %cst {dimension_numbers = #tpu.dot_dimension_numbers<[1], [0], [0], [1], [0, 0, 1, 1], [], []>} : vector<1x400xf32>, vector<400x120xf32>, vector<1x120xf32> -> vector<1x120xf32>
    %c0_117 = arith.constant 0 : index
    %c0_118 = arith.constant 0 : index
    %112 = vector.load %arg7[%c0_117, %c0_118] : memref<1x120xf32, #tpu.memory_space<vmem>>, vector<1x120xf32>
    %113 = arith.addf %111, %112 : vector<1x120xf32>
    %cst_119 = arith.constant 0.000000e+00 : f32
    %114 = vector.broadcast %cst_119 : f32 to vector<1x120xf32>
    %115 = arith.maximumf %113, %114 : vector<1x120xf32>
    %c0_120 = arith.constant 0 : index
    %c0_121 = arith.constant 0 : index
    %116 = vector.load %arg8[%c0_120, %c0_121] : memref<120x84xf32, #tpu.memory_space<vmem>>, vector<120x84xf32>
    %cst_122 = arith.constant dense<0.000000e+00> : vector<1x84xf32>
    %117 = tpu.matmul %115, %116, %cst_122 {dimension_numbers = #tpu.dot_dimension_numbers<[1], [0], [0], [1], [0, 0, 1, 1], [], []>} : vector<1x120xf32>, vector<120x84xf32>, vector<1x84xf32> -> vector<1x84xf32>
    %c0_123 = arith.constant 0 : index
    %c0_124 = arith.constant 0 : index
    %118 = vector.load %arg9[%c0_123, %c0_124] : memref<1x84xf32, #tpu.memory_space<vmem>>, vector<1x84xf32>
    %119 = arith.addf %117, %118 : vector<1x84xf32>
    %cst_125 = arith.constant 0.000000e+00 : f32
    %120 = vector.broadcast %cst_125 : f32 to vector<1x84xf32>
    %121 = arith.maximumf %119, %120 : vector<1x84xf32>
    %c0_126 = arith.constant 0 : index
    %c0_127 = arith.constant 0 : index
    %122 = vector.load %arg10[%c0_126, %c0_127] : memref<84x10xf32, #tpu.memory_space<vmem>>, vector<84x10xf32>
    %cst_128 = arith.constant dense<0.000000e+00> : vector<1x10xf32>
    %123 = tpu.matmul %121, %122, %cst_128 {dimension_numbers = #tpu.dot_dimension_numbers<[1], [0], [0], [1], [0, 0, 1, 1], [], []>} : vector<1x84xf32>, vector<84x10xf32>, vector<1x10xf32> -> vector<1x10xf32>
    %c0_129 = arith.constant 0 : index
    %c0_130 = arith.constant 0 : index
    %124 = vector.load %arg11[%c0_129, %c0_130] : memref<1x10xf32, #tpu.memory_space<vmem>>, vector<1x10xf32>
    %125 = arith.addf %123, %124 : vector<1x10xf32>
    %c0_131 = arith.constant 0 : index
    %c0_132 = arith.constant 0 : index
    %c0_133 = arith.constant 0 : index
    %126 = vector.load %arg12[%c0_131, %c0_132, %c0_133] : memref<1x1x10xf32, #tpu.memory_space<vmem>>, vector<1x1x10xf32>
    %127 = vector.shape_cast %126 : vector<1x1x10xf32> to vector<1x10xf32>
    %128 = vector.shape_cast %125 : vector<1x10xf32> to vector<1x1x10xf32>
    tpu.vector_store %arg12[%c0_131, %c0_132, %c0_133], %128 {strides = array<i32>} : memref<1x1x10xf32, #tpu.memory_space<vmem>>, vector<1x1x10xf32>,
    return
  }
  func.func @transform_0(%arg0: i32) -> (i32, i32, i32) {
    %c0_i32 = arith.constant 0 : i32
    %c0_i32_0 = arith.constant 0 : i32
    %c0_i32_1 = arith.constant 0 : i32
    return %arg0, %c0_i32, %c0_i32_0 : i32, i32, i32
  }
  func.func @transform_1(%arg0: i32) -> (i32, i32) {
    %c0_i32 = arith.constant 0 : i32
    %c0_i32_0 = arith.constant 0 : i32
    %c0_i32_1 = arith.constant 0 : i32
    return %c0_i32, %c0_i32_0 : i32, i32
  }
  func.func @transform_2(%arg0: i32) -> (i32, i32) {
    %c0_i32 = arith.constant 0 : i32
    %c0_i32_0 = arith.constant 0 : i32
    %c0_i32_1 = arith.constant 0 : i32
    return %c0_i32, %c0_i32_0 : i32, i32
  }
  func.func @transform_3(%arg0: i32) -> (i32, i32) {
    %c0_i32 = arith.constant 0 : i32
    %c0_i32_0 = arith.constant 0 : i32
    %c0_i32_1 = arith.constant 0 : i32
    return %c0_i32, %c0_i32_0 : i32, i32
  }
  func.func @transform_4(%arg0: i32) -> (i32, i32) {
    %c0_i32 = arith.constant 0 : i32
    %c0_i32_0 = arith.constant 0 : i32
    %c0_i32_1 = arith.constant 0 : i32
    return %c0_i32, %c0_i32_0 : i32, i32
  }
  func.func @transform_5(%arg0: i32) -> (i32, i32) {
    %c0_i32 = arith.constant 0 : i32
    %c0_i32_0 = arith.constant 0 : i32
    %c0_i32_1 = arith.constant 0 : i32
    return %c0_i32, %c0_i32_0 : i32, i32
  }
  func.func @transform_6(%arg0: i32) -> (i32, i32) {
    %c0_i32 = arith.constant 0 : i32
    %c0_i32_0 = arith.constant 0 : i32
    %c0_i32_1 = arith.constant 0 : i32
    return %c0_i32, %c0_i32_0 : i32, i32
  }
  func.func @transform_7(%arg0: i32) -> (i32, i32) {
    %c0_i32 = arith.constant 0 : i32
    %c0_i32_0 = arith.constant 0 : i32
    %c0_i32_1 = arith.constant 0 : i32
    return %c0_i32, %c0_i32_0 : i32, i32
  }
  func.func @transform_8(%arg0: i32) -> (i32, i32) {
    %c0_i32 = arith.constant 0 : i32
    %c0_i32_0 = arith.constant 0 : i32
    %c0_i32_1 = arith.constant 0 : i32
    return %c0_i32, %c0_i32_0 : i32, i32
  }
  func.func @transform_9(%arg0: i32) -> (i32, i32) {
    %c0_i32 = arith.constant 0 : i32
    %c0_i32_0 = arith.constant 0 : i32
    %c0_i32_1 = arith.constant 0 : i32
    return %c0_i32, %c0_i32_0 : i32, i32
  }
  func.func @transform_10(%arg0: i32) -> (i32, i32) {
    %c0_i32 = arith.constant 0 : i32
    %c0_i32_0 = arith.constant 0 : i32
    %c0_i32_1 = arith.constant 0 : i32
    return %c0_i32, %c0_i32_0 : i32, i32
  }
  func.func @transform_11(%arg0: i32) -> (i32, i32, i32) {
    %c0_i32 = arith.constant 0 : i32
    %c0_i32_0 = arith.constant 0 : i32
    %c0_i32_1 = arith.constant 0 : i32
    return %arg0, %c0_i32, %c0_i32_0 : i32, i32, i32
  }
}

</mosaic_0001>

<bundles_post_ra>
// kernel: net_forward.1
= control target key start
LH: loop header
LB: loop body
LE: loop exit
PB: predicated region body
PF: predicated region fallthrough
CT: control target
= control target key end

     0   :  { %s6989_s0 = inlined_call_operand.vmem [shape: f32[64,32,1], index: 0, kind: input, shape index: {}]   ;;  %s6990_s1 = inlined_call_operand.vmem [shape: f32[25,6], index: 1, kind: input, shape index: {}]   ;;  %s6991_s2 = inlined_call_operand.vmem [shape: f32[1,6], index: 2, kind: input, shape index: {}]   ;;  %s6992_s3 = inlined_call_operand.vmem [shape: f32[150,16], index: 3, kind: input, shape index: {}]   ;;  %s6993_s4 = inlined_call_operand.vmem [shape: f32[1,16], index: 4, kind: input, shape index: {}]   ;;  %s6994_s5 = inlined_call_operand.vmem [shape: f32[400,120], index: 5, kind: input, shape index: {}]   ;;  %s6995_s6 = inlined_call_operand.vmem [shape: f32[1,120], index: 6, kind: input, shape index: {}]   ;;  %s6996_s7 = inlined_call_operand.vmem [shape: f32[120,84], index: 7, kind: input, shape index: {}]   ;;  %s6997_s8 = inlined_call_operand.vmem [shape: f32[1,84], index: 8, kind: input, shape index: {}]   ;;  %s6998_s9 = inlined_call_operand.vmem [shape: f32[84,10], index: 9, kind: input, shape index: {}]   ;;  %s6999_s10 = inlined_call_operand.vmem [shape: f32[1,10], index: 10, kind: input, shape index: {}]   ;;  %s7000_s11 = inlined_call_operand.hbm [shape: f32[2,1,10], index: 11, kind: output, shape index: {}]  }
   0x1   :  { %7172 = sst [smem:[#allocation19_spill]] %s6989_s0 }
   0x2   :  { %7173 = sst [smem:[#allocation20_spill]] %s6990_s1 }
   0x3   :  { %16 = vsyncpa [#allocation8], 0 }
   0x4   :  { %18 = vsyncpa [#allocation8 + $0x1], 0  ;;  %s5182_s17 = smov 0   ;;  %s5184_s18 = smov 0  }
   0x5   :  { %s5186_s19 = smov 0   ;;  %s5188_s20 = smov 0  }
   0x6 LB: > { %s5203_s21 = sadd.s32 4294967295, %s5047_s20   ;;  %s4066_s22 = sadd.s32 4294967294, %s5047_s20   ;;  %s5047_s20 = sphi %s5188_s20, %s7350_s20   ;;  %s5043_s19 = sphi %s5186_s19, %s7349_s19   ;;  %s5039_s18 = sphi %s5184_s18, %s7348_s18   ;;  %s5035_s17 = sphi %s5182_s17, %s7347_s17  }
   0x7   : > { %s5207_s23 = sadd.s32 1, %s5047_s20   ;;  %s267_s24 = sadd.s32 1, %s5043_s19 }
   0x8   : > { %s264_s25 = ssub.s32 %s5047_s20, %s5207_s23  ;;  %p277_p0 = scmp.ne.s32.totalorder %s5043_s19, %s5039_s18 }
   0x9   : > { %p265_p1 = scmp.eq.s32.totalorder %s264_s25, 0  ;;  %p278_p2 = scmp.eq.s32.totalorder %s5203_s21, 1 }
   0xa   : > { %p283_p3 = scmp.ne.s32.totalorder %s5039_s18, %s5035_s17  ;;  %p284_p4 = scmp.eq.s32.totalorder %s4066_s22, 1 }
   0xb   : > { %s5218_s26 = scalar_select %p265_p1, %s5043_s19, %s267_s24  }
   0xc   : > { %p5220_p5 = por %p278_p2, %p277_p0  ;;  %p5224_p6 = por %p284_p4, %p283_p3 }
   0xd   : > { %p4069_p7 = scmp.ge.s32.totalorder %s5047_s20, 1  ;;  %p342_p8 = scmp.lt.s32.totalorder %s5047_s20, 3 }
   0xf   : > { %p343_p9 = pnand %p4069_p7, %p342_p8 }
  0x11   : > { %346 = sbr.rel (%p343_p9) target bundleno = 2583 (0xa17), region = 64 }
  0x18   : > { %s4070_s30 = sshll.u32 %s5203_s21, 5  ;;  %v7035_v0 = vlaneseq  ;;  %s7176_s1 = sld [smem:[#allocation20_spill]]  ;;  %v5255_v5 = vld [vmem:[%s6991_s2] ss:$0 sm:$0xff]  ;;  %v7033_v12 = vmov 0.0  }
  0x19   : > { %p383_p10 = scmp.lt.s32.totalorder %s4070_s30, 63  ;;  %7181 = vst [vmem:[#allocation14_spill] sm:$0xff] %v5255_v5  ;;  %s7183_s0 = sld [smem:[#allocation19_spill]] }
  0x1a   : > { %v5258_v6 = vshrl.u32 %v7035_v0, 7  ;;  %v393_v7 = vand.u32 127, %v7035_v0  ;;  %s7187_s29 = sand.u32 1, %s5039_s18   ;;  %s5284_s22 = smov 0  }
  0x1b   : > { %s7352_s30 = smov (!%p383_p10, %s4070_s30), 63 }
  0x1c   : > { %7182 = vst [vmem:[#allocation15_spill] sm:$0xff] %v5258_v6  ;;  %v391_v8 = vadd.s32 8, %v5258_v6  ;;  %v394_v9 = vmul.u32 2, %v5258_v6  ;;  %s4429_s13 = sshll.u32 %s7352_s30, 5  ;;  %s5282_s30 = scalar_lea.vmem [#allocation7], %s7187_s29 }
  0x1e   : > { %v5235_v1 = vld [vmem:[%s7176_s1] sm:$0xff]  ;;  %v5240_v2 = vld [vmem:[%s7176_s1 + $0x8] sm:$0xff]  ;;  %v5245_v3 = vld [vmem:[%s7176_s1 + $0x10] sm:$0xff]  ;;  %v395_v10 = vmul.u32 2, %v391_v8  ;;  %vm396_vm0 = vcmp.eq.s32.totalorder %v393_v7, %v394_v9  ;;  %v402_v11 = vadd.s32 1, %v394_v9 }
  0x1f   : > { %7177 = vst [vmem:[#allocation10_spill] sm:$0xff] %v5235_v1  ;;  %7178 = vst [vmem:[#allocation11_spill] sm:$0xff] %v5240_v2  ;;  %v5250_v4 = vld [vmem:[%s7176_s1 + $0x18] sm:$0x1]  ;;  %s5266_s16 = scalar_lea.vmem %s7183_s0, %s4429_s13  ;;  %v5269_v13 = vsel %vm396_vm0, 1.0, %v7033_v12 }
  0x20   : > { %7179 = vst [vmem:[#allocation12_spill] sm:$0xff] %v5245_v3  ;;  %7180 = vst [vmem:[#allocation13_spill] sm:$0xff] %v5250_v4  ;;  %vm397_vm1 = vcmp.eq.s32.totalorder %v393_v7, %v395_v10  ;;  %v403_v14 = vadd.s32 1, %v395_v10  ;;  %vm404_vm2 = vcmp.eq.s32.totalorder %v393_v7, %v402_v11 }
  0x21   : > { %v5272_v15 = vsel %vm397_vm1, 1.0, %v7033_v12  ;;  %v5275_v16 = vsel %vm404_vm2, 1.0, %v7033_v12 }
  0x22   : > { %7184 = vst [vmem:[#allocation16_spill] sm:$0xff] %v5272_v15  ;;  %7185 = vst [vmem:[#allocation17_spill] sm:$0xff] %v5275_v16  ;;  %vm405_vm3 = vcmp.eq.s32.totalorder %v393_v7, %v403_v14 }
  0x23   : > { %v5278_v17 = vsel %vm405_vm3, 1.0, %v7033_v12 }
  0x24   : > { %7186 = vst [vmem:[#allocation18_spill] sm:$0xff] %v5278_v17 }
  0x25 LB: >> { %s4430_s24 = sshll.u32 %s5051_s22, 6  ;;  %s7001_s12 = smov 1   ;;  %vm428_vm4 = vcmask 7168   ;;  %vm432_vm5 = vcmask 3072   ;;  %vm454_vm6 = vcmask 15368   ;;  %vm480_vm7 = vcmask 23568   ;;  %s5051_s22 = sphi %s5284_s22, %s420_s22  }
  0x26   : >> { %s5291_s25 = scalar_lea.vmem %s5266_s16, %s4430_s24  ;;  %s7003_s13 = smov 2   ;;  %vm506_vm8 = vcmask 31768   ;;  %vm532_vm9 = vcmask 39968   ;;  %vm561_vm10 = vcmask 48168   ;;  %vm7046_vm11 = vcmask 11272   ;;  %v7188_v1 = vld [vmem:[#allocation10_spill] sm:$0xff] }
  0x27   : >> { %v434_v18 = vld [vmem:[%s5291_s25 + $0x1] sm:$0xff]  ;;  %v435_v20 = vld [vmem:[%s5291_s25 + $0x9] sm:$0xff]  ;;  %s7005_s14 = smov 3   ;;  %v436_v25 = vld [vmem:[%s5291_s25 + $0x11] sm:$0xff]  ;;  %s7007_s15 = smov 4   ;;  %vm587_vm12 = vcmask 56368  }
  0x28   : >> { %v460_v19 = vld [vmem:[%s5291_s25 + $0x2] sm:$0xff]  ;;  %442 = vrot.lane.b32.xlu0 %v434_v18, %s7001_s12  ;;  %v461_v21 = vld [vmem:[%s5291_s25 + $0xa] sm:$0xff]  ;;  %s7009_s29 = smov 5   ;;  %v437_v28 = vld [vmem:[%s5291_s25 + $0x19] sm:$0xf]  ;;  %s7011_s24 = smov 6  }
  0x29   : >> { %468 = vrot.lane.b32.xlu1 %v460_v19, %s7003_s13  ;;  %v486_v22 = vld [vmem:[%s5291_s25 + $0x3] sm:$0xff]  ;;  %v487_v23 = vld [vmem:[%s5291_s25 + $0xb] sm:$0xff]  ;;  %v463_v35 = vld [vmem:[%s5291_s25 + $0x1a] sm:$0xf]  ;;  %vm7043_vm13 = vcmask 19472   ;;  %vm613_vm14 = vcmask 64568  }
  0x2a   : >> { %v512_v24 = vld [vmem:[%s5291_s25 + $0x4] sm:$0xff]  ;;  %v513_v26 = vld [vmem:[%s5291_s25 + $0xc] sm:$0xff]  ;;  %v427_v37 = vld [vmem:[%s5291_s25 + $0x18] sm:$0xf]  ;;  %vm7042_vm15 = vcmask 27672   ;;  %vm7088_vm0 = vcmask 72768  }
  0x2b   : >> { %v4081_v27 = vld [vmem:[%s5291_s25 + $0x20] sm:$0xff]  ;;  %v462_v29 = vld [vmem:[%s5291_s25 + $0x12] sm:$0xff]  ;;  %v4082_v31 = vld [vmem:[%s5291_s25 + $0x28] sm:$0xff]  ;;  %433 = vst.msk [vmem:[#allocation4 + $0x18] sm:$0xf] %vm432_vm5, %v427_v37  ;;  %vm7041_vm1 = vcmask 35872  }
  0x2c   : >> { %444 = vrot.lane.b32.xlu0 %v435_v20, %s7001_s12  ;;  %v424_v30 = vld [vmem:[%s5291_s25] sm:$0xff]  ;;  %v425_v33 = vld [vmem:[%s5291_s25 + $0x8] sm:$0xff]  ;;  %v426_v34 = vld [vmem:[%s5291_s25 + $0x10] sm:$0xff]  ;;  %vm7059_vm2 = vcmask 80968   ;;  %vm7053_vm3 = vcmask 44072  }
  0x2d   : >> { %470 = vrot.lane.b32.xlu1 %v461_v21, %s7003_s13  ;;  %v5320_v32 = vld [vmem:[%s5291_s25 + $0x21] sm:$0xff]  ;;  %429 = vst.msk [vmem:[#allocation4] sm:$0xff] %vm428_vm4, %v424_v30  ;;  %430 = vst.msk [vmem:[#allocation4 + $0x8] sm:$0xff] %vm428_vm4, %v425_v33  ;;  %v488_v36 = vld [vmem:[%s5291_s25 + $0x13] sm:$0xff] }
  0x2e   : >> { %431 = vst.msk [vmem:[#allocation4 + $0x10] sm:$0xff] %vm428_vm4, %v426_v34  ;;  %v5337_v38 = vld [vmem:[%s5291_s25 + $0x29] sm:$0xff]  ;;  %v489_v40 = vld [vmem:[%s5291_s25 + $0x1b] sm:$0xf]  ;;  %v5376_v49 = vld [vmem:[%s5291_s25 + $0x31] sm:$0xff] }
  0x2f   : >> { %v5340_v39 = vld [vmem:[%s5291_s25 + $0x22] sm:$0xff]  ;;  %v514_v41 = vld [vmem:[%s5291_s25 + $0x14] sm:$0xff]  ;;  %v5351_v42 = vld [vmem:[%s5291_s25 + $0x2a] sm:$0xff] }
  0x30   : >> { %494 = vrot.lane.b32.xlu0 %v486_v22, %s7005_s14  ;;  %v5354_v43 = vld [vmem:[%s5291_s25 + $0x23] sm:$0xff]  ;;  %v515_v44 = vld [vmem:[%s5291_s25 + $0x1c] sm:$0xf]  ;;  %v4083_v45 = vld [vmem:[%s5291_s25 + $0x30] sm:$0xff] }
  0x31   : >> { %496 = vrot.lane.b32.xlu1 %v487_v23, %s7005_s14  ;;  %v5365_v46 = vld [vmem:[%s5291_s25 + $0x2b] sm:$0xff]  ;;  %v4084_v48 = vld [vmem:[%s5291_s25 + $0x38] sm:$0xf]  ;;  %v5385_v51 = vld [vmem:[%s5291_s25 + $0x40] sm:$0xff] }
  0x32   : >> { %v5368_v47 = vld [vmem:[%s5291_s25 + $0x24] sm:$0xff]  ;;  %v5382_v50 = vld [vmem:[%s5291_s25 + $0x2c] sm:$0xff]  ;;  %v4088_v52 = vld [vmem:[%s5291_s25 + $0x39] sm:$0xf] }
  0x33   : >> { %v5393_v53 = vld [vmem:[%s5291_s25 + $0x32] sm:$0xff]  ;;  %v5399_v54 = vld [vmem:[%s5291_s25 + $0x48] sm:$0xff]  ;;  %v4092_v56 = vld [vmem:[%s5291_s25 + $0x3a] sm:$0xf] }
  0x34   : >> { %520 = vrot.lane.b32.xlu0 %v512_v24, %s7007_s15  ;;  %v5402_v55 = vld [vmem:[%s5291_s25 + $0x41] sm:$0xff]  ;;  %v5410_v57 = vld [vmem:[%s5291_s25 + $0x33] sm:$0xff]  ;;  %v5416_v58 = vld [vmem:[%s5291_s25 + $0x49] sm:$0xff] }
  0x35   : >> { %446 = vrot.lane.b32.xlu1 %v436_v25, %s7001_s12  ;;  %v5419_v59 = vld [vmem:[%s5291_s25 + $0x42] sm:$0xff]  ;;  %v4096_v60 = vld [vmem:[%s5291_s25 + $0x3b] sm:$0xf]  ;;  %v5433_v62 = vld [vmem:[%s5291_s25 + $0x4a] sm:$0xff] }
  0x36   : >> { %v5427_v61 = vld [vmem:[%s5291_s25 + $0x34] sm:$0xff]  ;;  %v5436_v63 = vld [vmem:[%s5291_s25 + $0x43] sm:$0xff]  ;;  %v4100_v7 = vld [vmem:[%s5291_s25 + $0x3c] sm:$0xf] }
  0x37   : >> { %v5444_v8 = vld [vmem:[%s5291_s25 + $0x50] sm:$0xff]  ;;  %v5453_v10 = vld [vmem:[%s5291_s25 + $0x44] sm:$0xff]  ;;  %v4106_v11 = vld [vmem:[%s5291_s25 + $0x58] sm:$0xf] }
  0x38   : >> { %522 = vrot.lane.b32.xlu0 %v513_v26, %s7007_s15  ;;  %v5450_v9 = vld [vmem:[%s5291_s25 + $0x4b] sm:$0xff]  ;;  %v5470_v19 = vld [vmem:[%s5291_s25 + $0x60] sm:$0xff]  ;;  %v4110_v20 = vld [vmem:[%s5291_s25 + $0x59] sm:$0xf] }
  0x39   : >> { %549 = vrot.lane.b32.xlu1 %v4081_v27, %s7009_s29  ;;  %v5461_v14 = vld [vmem:[%s5291_s25 + $0x51] sm:$0xff]  ;;  %v5484_v22 = vld [vmem:[%s5291_s25 + $0x68] sm:$0xff]  ;;  %v4114_v24 = vld [vmem:[%s5291_s25 + $0x5a] sm:$0xf] }
  0x3a   : >> { %v5467_v18 = vld [vmem:[%s5291_s25 + $0x4c] sm:$0xff]  ;;  %v5487_v23 = vld [vmem:[%s5291_s25 + $0x61] sm:$0xff]  ;;  %v4122_v37 = vld [vmem:[%s5291_s25 + $0x5c] sm:$0xf] }
  0x3b   : >> { %v5478_v21 = vld [vmem:[%s5291_s25 + $0x52] sm:$0xff]  ;;  %v5501_v26 = vld [vmem:[%s5291_s25 + $0x69] sm:$0xff]  ;;  %v7190_v3 = vld [vmem:[#allocation12_spill] sm:$0xff] }
  0x3c   : >> { %448 = vrot.lane.b32.xlu0 %v437_v28, %s7001_s12  ;;  %s7013_s12 = smov 7   ;;  %v5495_v25 = vld [vmem:[%s5291_s25 + $0x53] sm:$0xff]  ;;  %v5504_v27 = vld [vmem:[%s5291_s25 + $0x62] sm:$0xff]  ;;  %v4118_v28 = vld [vmem:[%s5291_s25 + $0x5b] sm:$0xf] }
  0x3d   : >> { %472 = vrot.lane.b32.xlu1 %v462_v29, %s7003_s13  ;;  %v5512_v29 = vld [vmem:[%s5291_s25 + $0x54] sm:$0xff]  ;;  %v5520_v33 = vld [vmem:[%s5291_s25 + $0x6a] sm:$0xff] }
  0x3e   : >> { %v5523_v34 = vld [vmem:[%s5291_s25 + $0x63] sm:$0xff]  ;;  %v7189_v2 = vld [vmem:[#allocation11_spill] sm:$0xff] }
  0x3f   : >> { %v5651_v17 = vld [vmem:[%s5291_s25 + $0x84] sm:$0xff] }
  0x40   : >> { %551 = vrot.lane.b32.xlu0 %v4082_v31, %s7009_s29  ;;  %v7191_v4 = vld [vmem:[#allocation13_spill] sm:$0xff] }
  0x41   : >> { %575 = vrot.lane.b32.xlu1 %v5320_v32, %s7011_s24 }
  0x44   : >> { %474 = vrot.lane.b32.xlu0 %v463_v35, %s7003_s13  ;;  %s7015_s13 = smov 8  }
  0x45   : >> { %498 = vrot.lane.b32.xlu1 %v488_v36, %s7005_s14 }
  0x48   : >> { %577 = vrot.lane.b32.xlu0 %v5337_v38, %s7011_s24 }
  0x49   : >> { %601 = vrot.lane.b32.xlu1 %v5340_v39, %s7013_s12 }
  0x4c   : >> { %500 = vrot.lane.b32.xlu0 %v489_v40, %s7005_s14  ;;  %s7017_s14 = smov 9   ;;  %v5533_v40 = vld [vmem:[%s5291_s25 + $0x70] sm:$0xff] }
  0x4d   : >> { %524 = vrot.lane.b32.xlu1 %v514_v41, %s7007_s15 }
  0x50   : >> { %603 = vrot.lane.b32.xlu0 %v5351_v42, %s7013_s12 }
  0x51   : >> { %627 = vrot.lane.b32.xlu1 %v5354_v43, %s7015_s13 }
  0x54   : >> { %526 = vrot.lane.b32.xlu0 %v515_v44, %s7007_s15  ;;  %s7019_s15 = smov 10  }
  0x55   : >> { %553 = vrot.lane.b32.xlu1 %v4083_v45, %s7009_s29  ;;  %v5541_v45 = vld [vmem:[%s5291_s25 + $0x6b] sm:$0xff] }
  0x58   : >> { %629 = vrot.lane.b32.xlu0 %v5365_v46, %s7015_s13 }
  0x59   : >> { %653 = vrot.lane.b32.xlu1 %v5368_v47, %s7017_s14 }
  0x5c   : >> { %555 = vrot.lane.b32.xlu0 %v4084_v48, %s7009_s29  ;;  %s7021_s29 = smov 11   ;;  %v5544_v48 = vld [vmem:[%s5291_s25 + $0x64] sm:$0xff] }
  0x5d   : >> { %579 = vrot.lane.b32.xlu1 %v5376_v49, %s7011_s24 }
  0x60   : >> { %655 = vrot.lane.b32.xlu0 %v5382_v50, %s7017_s14 }
  0x61   : >> { %682 = vrot.lane.b32.xlu1 %v5385_v51, %s7019_s15 }
  0x64   : >> { %581 = vrot.lane.b32.xlu0 %v4088_v52, %s7011_s24  ;;  %s7023_s24 = smov 12  }
  0x65   : >> { %605 = vrot.lane.b32.xlu1 %v5393_v53, %s7013_s12 }
  0x68   : >> { %684 = vrot.lane.b32.xlu0 %v5399_v54, %s7019_s15 }
  0x69   : >> { %708 = vrot.lane.b32.xlu1 %v5402_v55, %s7021_s29 }
  0x6c   : >> { %607 = vrot.lane.b32.xlu0 %v4092_v56, %s7013_s12  ;;  %s7037_s12 = smov 13  }
  0x6d   : >> { %631 = vrot.lane.b32.xlu1 %v5410_v57, %s7015_s13 }
  0x70   : >> { %710 = vrot.lane.b32.xlu0 %v5416_v58, %s7021_s29 }
  0x71   : >> { %734 = vrot.lane.b32.xlu1 %v5419_v59, %s7023_s24 }
  0x74   : >> { %633 = vrot.lane.b32.xlu0 %v4096_v60, %s7015_s13  ;;  %s7025_s13 = smov 14   ;;  %v4128_v60 = vld [vmem:[%s5291_s25 + $0x78] sm:$0xf] }
  0x75   : >> { %657 = vrot.lane.b32.xlu1 %v5427_v61, %s7017_s14 }
  0x78   : >> { %736 = vrot.lane.b32.xlu0 %v5433_v62, %s7023_s24 }
  0x79   : >> { %760 = vrot.lane.b32.xlu1 %v5436_v63, %s7037_s12 }
  0x7c   : >> { %659 = vrot.lane.b32.xlu0 %v4100_v7, %s7017_s14  ;;  %s7027_s14 = smov 15   ;;  %v5554_v7 = vld [vmem:[%s5291_s25 + $0x71] sm:$0xff] }
  0x7d   : >> { %686 = vrot.lane.b32.xlu1 %v5444_v8, %s7019_s15 }
  0x80   : >> { %762 = vrot.lane.b32.xlu0 %v5450_v9, %s7037_s12 }
  0x81   : >> { %786 = vrot.lane.b32.xlu1 %v5453_v10, %s7025_s13 }
  0x84   : >> { %688 = vrot.lane.b32.xlu0 %v4106_v11, %s7019_s15  ;;  %s7029_s15 = smov 16  }
  0x85   : >> { %712 = vrot.lane.b32.xlu1 %v5461_v14, %s7021_s29 }
  0x88   : >> { %788 = vrot.lane.b32.xlu0 %v5467_v18, %s7025_s13 }
  0x89   : >> { %815 = vrot.lane.b32.xlu1 %v5470_v19, %s7027_s14 }
  0x8c   : >> { %714 = vrot.lane.b32.xlu0 %v4110_v20, %s7021_s29  ;;  %s7031_s29 = smov 17  }
  0x8d   : >> { %738 = vrot.lane.b32.xlu1 %v5478_v21, %s7023_s24 }
  0x90   : >> { %817 = vrot.lane.b32.xlu0 %v5484_v22, %s7027_s14 }
  0x91   : >> { %841 = vrot.lane.b32.xlu1 %v5487_v23, %s7029_s15 }
  0x94   : >> { %740 = vrot.lane.b32.xlu0 %v4114_v24, %s7023_s24  ;;  %s7067_s24 = smov 18   ;;  %v5562_v24 = vld [vmem:[%s5291_s25 + $0x6c] sm:$0xff] }
  0x95   : >> { %764 = vrot.lane.b32.xlu1 %v5495_v25, %s7037_s12 }
  0x98   : >> { %843 = vrot.lane.b32.xlu0 %v5501_v26, %s7029_s15 }
  0x99   : >> { %867 = vrot.lane.b32.xlu1 %v5504_v27, %s7031_s29 }
  0x9a   : >> { %v443_v30 = vpop.permute.xlu0 %442 }
  0x9b   : >> { %v469_v31 = vpop.permute.xlu1 %468  ;;  %455 = vst.msk [vmem:[#allocation4] sm:$0xff] %vm454_vm6, %v443_v30 }
  0x9c   : >> { %481 = vst.msk [vmem:[#allocation4] sm:$0xff] %vm480_vm7, %v469_v31  ;;  %766 = vrot.lane.b32.xlu0 %v4118_v28, %s7037_s12  ;;  %v5565_v28 = vld [vmem:[%s5291_s25 + $0x80] sm:$0xff]  ;;  %s7051_s12 = smov 23  }
  0x9d   : >> { %790 = vrot.lane.b32.xlu1 %v5512_v29, %s7025_s13 }
  0x9e   : >> { %v445_v35 = vpop.permute.xlu0 %444 }
  0x9f   : >> { %v471_v36 = vpop.permute.xlu1 %470  ;;  %456 = vst.msk [vmem:[#allocation4 + $0x8] sm:$0xff] %vm454_vm6, %v445_v35  ;;  %v4132_v35 = vld [vmem:[%s5291_s25 + $0x79] sm:$0xf] }
  0xa0   : >> { %482 = vst.msk [vmem:[#allocation4 + $0x8] sm:$0xff] %vm480_vm7, %v471_v36  ;;  %869 = vrot.lane.b32.xlu0 %v5520_v33, %s7031_s29  ;;  %v5575_v36 = vld [vmem:[%s5291_s25 + $0x72] sm:$0xff] }
  0xa1   : >> { %893 = vrot.lane.b32.xlu1 %v5523_v34, %s7067_s24 }
  0xa2   : >> { %v495_v41 = vpop.permute.xlu0 %494 }
  0xa3   : >> { %v497_v44 = vpop.permute.xlu1 %496  ;;  %507 = vst.msk [vmem:[#allocation4] sm:$0xff] %vm506_vm8, %v495_v41 }
  0xa4   : >> { %508 = vst.msk [vmem:[#allocation4 + $0x8] sm:$0xff] %vm506_vm8, %v497_v44  ;;  %792 = vrot.lane.b32.xlu0 %v4122_v37, %s7025_s13  ;;  %s7044_s13 = smov 19   ;;  %v5583_v44 = vld [vmem:[%s5291_s25 + $0x88] sm:$0xff] }
  0xa5   : >> { %819 = vrot.lane.b32.xlu1 %v5533_v40, %s7027_s14 }
  0xa6   : >> { %v521_v52 = vpop.permute.xlu0 %520 }
  0xa7   : >> { %v447_v56 = vpop.permute.xlu1 %446  ;;  %533 = vst.msk [vmem:[#allocation4] sm:$0xff] %vm532_vm9, %v521_v52  ;;  %v5586_v52 = vld [vmem:[%s5291_s25 + $0x81] sm:$0xff] }
  0xa8   : >> { %457 = vst.msk [vmem:[#allocation4 + $0x10] sm:$0xff] %vm454_vm6, %v447_v56  ;;  %895 = vrot.lane.b32.xlu0 %v5541_v45, %s7067_s24 }
  0xa9   : >> { %919 = vrot.lane.b32.xlu1 %v5544_v48, %s7044_s13 }
  0xaa   : >> { %v523_v11 = vpop.permute.xlu0 %522 }
  0xab   : >> { %v550_v20 = vpop.permute.xlu1 %549  ;;  %534 = vst.msk [vmem:[#allocation4 + $0x8] sm:$0xff] %vm532_vm9, %v523_v11  ;;  %v4136_v11 = vld [vmem:[%s5291_s25 + $0x7a] sm:$0xf] }
  0xac   : >> { %562 = vst.msk [vmem:[#allocation4] sm:$0xff] %vm561_vm10, %v550_v20  ;;  %821 = vrot.lane.b32.xlu0 %v4128_v60, %s7027_s14  ;;  %s7063_s14 = smov 20   ;;  %v5596_v20 = vld [vmem:[%s5291_s25 + $0x73] sm:$0xff] }
  0xad   : >> { %845 = vrot.lane.b32.xlu1 %v5554_v7, %s7029_s15 }
  0xae   : >> { %v449_v30 = vpop.permute.xlu0 %448 }
  0xaf   : >> { %v473_v31 = vpop.permute.xlu1 %472  ;;  %459 = vst.msk [vmem:[#allocation4 + $0x18] sm:$0xf] %vm7046_vm11, %v449_v30  ;;  %vm7065_vm11 = vcmask 89168  }
  0xb0   : >> { %483 = vst.msk [vmem:[#allocation4 + $0x10] sm:$0xff] %vm480_vm7, %v473_v31  ;;  %921 = vrot.lane.b32.xlu0 %v5562_v24, %s7044_s13 }
  0xb1   : >> { %948 = vrot.lane.b32.xlu1 %v5565_v28, %s7063_s14 }
  0xb2   : >> { %v552_v37 = vpop.permute.xlu0 %551 }
  0xb3   : >> { %v576_v41 = vpop.permute.xlu1 %575  ;;  %563 = vst.msk [vmem:[#allocation4 + $0x8] sm:$0xff] %vm561_vm10, %v552_v37  ;;  %v5607_v37 = vld [vmem:[%s5291_s25 + $0x82] sm:$0xff] }
  0xb4   : >> { %588 = vst.msk [vmem:[#allocation4] sm:$0xff] %vm587_vm12, %v576_v41  ;;  %847 = vrot.lane.b32.xlu0 %v4132_v35, %s7029_s15  ;;  %s7060_s15 = smov 21   ;;  %v5604_v35 = vld [vmem:[%s5291_s25 + $0x89] sm:$0xff] }
  0xb5   : >> { %871 = vrot.lane.b32.xlu1 %v5575_v36, %s7031_s29 }
  0xb6   : >> { %v475_v56 = vpop.permute.xlu0 %474 }
  0xb7   : >> { %v499_v60 = vpop.permute.xlu1 %498  ;;  %485 = vst.msk [vmem:[#allocation4 + $0x18] sm:$0xf] %vm7043_vm13, %v475_v56 }
  0xb8   : >> { %509 = vst.msk [vmem:[#allocation4 + $0x10] sm:$0xff] %vm506_vm8, %v499_v60  ;;  %950 = vrot.lane.b32.xlu0 %v5583_v44, %s7063_s14  ;;  %v4140_v60 = vld [vmem:[%s5291_s25 + $0x7b] sm:$0xf] }
  0xb9   : >> { %974 = vrot.lane.b32.xlu1 %v5586_v52, %s7060_s15 }
  0xba   : >> { %v578_v30 = vpop.permute.xlu0 %577 }
  0xbb   : >> { %v602_v31 = vpop.permute.xlu1 %601  ;;  %589 = vst.msk [vmem:[#allocation4 + $0x8] sm:$0xff] %vm587_vm12, %v578_v30 }
  0xbc   : >> { %614 = vst.msk [vmem:[#allocation4] sm:$0xff] %vm613_vm14, %v602_v31  ;;  %873 = vrot.lane.b32.xlu0 %v4136_v11, %s7031_s29  ;;  %s7057_s29 = smov 22   ;;  %v5617_v11 = vld [vmem:[%s5291_s25 + $0x74] sm:$0xff] }
  0xbd   : >> { %897 = vrot.lane.b32.xlu1 %v5596_v20, %s7067_s24 }
  0xbe   : >> { %v501_v41 = vpop.permute.xlu0 %500 }
  0xbf   : >> { %v525_v56 = vpop.permute.xlu1 %524  ;;  %511 = vst.msk [vmem:[#allocation4 + $0x18] sm:$0xf] %vm7042_vm15, %v501_v41  ;;  %v5625_v41 = vld [vmem:[%s5291_s25 + $0x8a] sm:$0xff]  ;;  %vm7047_vm15 = vmmov 1  }
  0xc0   : >> { %535 = vst.msk [vmem:[#allocation4 + $0x10] sm:$0xff] %vm532_vm9, %v525_v56  ;;  %976 = vrot.lane.b32.xlu0 %v5604_v35, %s7060_s15  ;;  %v5628_v56 = vld [vmem:[%s5291_s25 + $0x83] sm:$0xff] }
  0xc1   : >> { %1000 = vrot.lane.b32.xlu1 %v5607_v37, %s7057_s29 }
  0xc2   : >> { %v604_v30 = vpop.permute.xlu0 %603 }
  0xc3   : >> { %v628_v31 = vpop.permute.xlu1 %627  ;;  %615 = vst.msk [vmem:[#allocation4 + $0x8] sm:$0xff] %vm613_vm14, %v604_v30  ;;  %v5638_v30 = vld [vmem:[%s5291_s25 + $0x90] sm:$0xff] }
  0xc4   : >> { %640 = vst.msk [vmem:[#allocation4] sm:$0xff] %vm7088_vm0, %v628_v31  ;;  %899 = vrot.lane.b32.xlu0 %v4140_v60, %s7067_s24  ;;  %v4144_v60 = vld [vmem:[%s5291_s25 + $0x7c] sm:$0xf]  ;;  %v4661_v31 = vpack.c.bf16 %v7189_v2, %v7188_v1  ;;  %v5672_v2 = vld [vmem:[%s5291_s25 + $0x8c] sm:$0xff]  ;;  %s7197_s24 = smov 6  }
  0xc5   : >> { %923 = vrot.lane.b32.xlu1 %v5617_v11, %s7044_s13 }
  0xc6   : >> { %v527_v12 = vpop.permute.xlu0 %526  ;;  %4662 = vmatprep.subr.bf16.mxu0 %v4661_v31  ;;  %4672 = vmatprep.subr.bf16.mxu1 %v4661_v31 }
  0xc7   : >> { %v554_v0 = vpop.permute.xlu1 %553  ;;  %537 = vst.msk [vmem:[#allocation4 + $0x18] sm:$0xf] %vm7041_vm1, %v527_v12  ;;  %4664 = vmatpush3.bf16.msra.mxu0 %v4661_v31  ;;  %vm1093_vm1 = vcmask 1040384   ;;  %4674 = vmatpush3.bf16.msra.mxu1 %v4661_v31  ;;  %v5664_v31 = vld [vmem:[%s5291_s25 + $0x91] sm:$0xff] }
  0xc8   : >> { %564 = vst.msk [vmem:[#allocation4 + $0x10] sm:$0xff] %vm561_vm10, %v554_v0  ;;  %1002 = vrot.lane.b32.xlu0 %v5625_v41, %s7057_s29  ;;  %v5648_v0 = vld [vmem:[%s5291_s25 + $0x8b] sm:$0xff]  ;;  %vm4666_vm13 = vmpackc.low %vm1093_vm1, %vm7047_vm15  ;;  %vm7049_vm1 = vcmask 52272   ;;  %vm7050_vm15 = vcmask 60472  }
  0xc9   : >> { %1026 = vrot.lane.b32.xlu1 %v5628_v56, %s7051_s12 }
  0xca   : >> { %v630_v6 = vpop.permute.xlu0 %629 }
  0xcb   : >> { %v654_v12 = vpop.permute.xlu1 %653  ;;  %641 = vst.msk [vmem:[#allocation4 + $0x8] sm:$0xff] %vm7088_vm0, %v630_v6  ;;  %v4665_v6 = vpack.c.bf16 %v7191_v4, %v7190_v3  ;;  %v4154_v3 = vld [vmem:[%s5291_s25 + $0x99] sm:$0xf] }
  0xcc   : >> { %666 = vst.msk [vmem:[#allocation4] sm:$0xff] %vm7059_vm2, %v654_v12  ;;  %925 = vrot.lane.b32.xlu0 %v4144_v60, %s7044_s13  ;;  %s7054_s13 = smov 24   ;;  %v4150_v60 = vld [vmem:[%s5291_s25 + $0x98] sm:$0xf] }
  0xcd   : >> { %952 = vrot.lane.b32.xlu1 %v5638_v30, %s7063_s14  ;;  %4667 = vmatprep.subr.msk.bf16.mxu0 %vm4666_vm13, %v4665_v6 }
  0xce   : >> { %v556_v12 = vpop.permute.xlu0 %555  ;;  %4677 = vmatprep.subr.msk.bf16.mxu1 %vm4666_vm13, %v4665_v6  ;;  %4670 = vmatpush3.bf16.msk.msra.mxu0 %vm4666_vm13, %v4665_v6 }
  0xcf   : >> { %v580_v1 = vpop.permute.xlu1 %579  ;;  %566 = vst.msk [vmem:[#allocation4 + $0x18] sm:$0xf] %vm7053_vm3, %v556_v12  ;;  %4680 = vmatpush3.bf16.msk.msra.mxu1 %vm4666_vm13, %v4665_v6  ;;  %vm7069_vm13 = vcmask 97368   ;;  %vm7073_vm3 = vcmask 113768  }
  0xd0   : >> { %590 = vst.msk [vmem:[#allocation4 + $0x10] sm:$0xff] %vm587_vm12, %v580_v1  ;;  %1028 = vrot.lane.b32.xlu0 %v5648_v0, %s7051_s12 }
  0xd1   : >> { %1052 = vrot.lane.b32.xlu1 %v5651_v17, %s7054_s13 }
  0xd2   : >> { %v656_v12 = vpop.permute.xlu0 %655 }
  0xd3   : >> { %v683_v1 = vpop.permute.xlu1 %682  ;;  %667 = vst.msk [vmem:[#allocation4 + $0x8] sm:$0xff] %vm7059_vm2, %v656_v12  ;;  %v4158_v12 = vld [vmem:[%s5291_s25 + $0x9a] sm:$0xf] }
  0xd4   : >> { %695 = vst.msk [vmem:[#allocation4] sm:$0xff] %vm7065_vm11, %v683_v1  ;;  %954 = vrot.lane.b32.xlu0 %v4150_v60, %s7063_s14  ;;  %v5681_v60 = vld [vmem:[%s5291_s25 + $0x92] sm:$0xff]  ;;  %s7196_s14 = smov 5  }
  0xd5   : >> { %978 = vrot.lane.b32.xlu1 %v5664_v31, %s7060_s15 }
  0xd6   : >> { %v582_v4 = vpop.permute.xlu0 %581 }
  0xd7   : >> { %v606_v6 = vpop.permute.xlu1 %605  ;;  %592 = vst.msk [vmem:[#allocation4 + $0x18] sm:$0xf] %vm7049_vm1, %v582_v4  ;;  %v5690_v4 = vld [vmem:[%s5291_s25 + $0x93] sm:$0xff]  ;;  %vm7071_vm1 = vcmask 105568  }
  0xd8   : >> { %616 = vst.msk [vmem:[#allocation4 + $0x10] sm:$0xff] %vm613_vm14, %v606_v6  ;;  %1054 = vrot.lane.b32.xlu0 %v5672_v2, %s7054_s13 }
  0xd9   : >> { %980 = vrot.lane.b32.xlu1 %v4154_v3, %s7060_s15  ;;  %v4162_v3 = vld [vmem:[%s5291_s25 + $0x9b] sm:$0xf]  ;;  %s7195_s15 = smov 4  }
  0xda   : >> { %v685_v1 = vpop.permute.xlu0 %684 }
  0xdb   : >> { %v709_v15 = vpop.permute.xlu1 %708  ;;  %696 = vst.msk [vmem:[#allocation4 + $0x8] sm:$0xff] %vm7065_vm11, %v685_v1  ;;  %v4166_v1 = vld [vmem:[%s5291_s25 + $0x9c] sm:$0xf] }
  0xdc   : >> { %721 = vst.msk [vmem:[#allocation4] sm:$0xff] %vm7069_vm13, %v709_v15  ;;  %1004 = vrot.lane.b32.xlu0 %v5681_v60, %s7057_s29  ;;  %v5699_v15 = vld [vmem:[%s5291_s25 + $0x94] sm:$0xff] }
  0xdd   : >> { %1006 = vrot.lane.b32.xlu1 %v4158_v12, %s7057_s29  ;;  %s7194_s29 = smov 3  }
  0xde   : >> { %v608_v6 = vpop.permute.xlu0 %607 }
  0xdf   : >> { %v632_v5 = vpop.permute.xlu1 %631  ;;  %618 = vst.msk [vmem:[#allocation4 + $0x18] sm:$0xf] %vm7050_vm15, %v608_v6  ;;  %vm7056_vm15 = vcmask 68672  }
  0xe0   : >> { %642 = vst.msk [vmem:[#allocation4 + $0x10] sm:$0xff] %vm7088_vm0, %v632_v5  ;;  %1030 = vrot.lane.b32.xlu0 %v5690_v4, %s7051_s12  ;;  %vm1080_vm0 = vcmask 203776  }
  0xe1   : >> { %1032 = vrot.lane.b32.xlu1 %v4162_v3, %s7051_s12  ;;  %s7192_s12 = smov 1  }
  0xe2   : >> { %v711_v12 = vpop.permute.xlu0 %710 }
  0xe3   : >> { %v735_v16 = vpop.permute.xlu1 %734  ;;  %722 = vst.msk [vmem:[#allocation4 + $0x8] sm:$0xff] %vm7069_vm13, %v711_v12 }
  0xe4   : >> { %747 = vst.msk [vmem:[#allocation4] sm:$0xff] %vm7071_vm1, %v735_v16  ;;  %1056 = vrot.lane.b32.xlu0 %v5699_v15, %s7054_s13 }
  0xe5   : >> { %1058 = vrot.lane.b32.xlu1 %v4166_v1, %s7054_s13  ;;  %s7193_s13 = smov 2  }
  0xe6   : >> { %v634_v5 = vpop.permute.xlu0 %633 }
  0xe7   : >> { %v658_v6 = vpop.permute.xlu1 %657  ;;  %644 = vst.msk [vmem:[#allocation4 + $0x18] sm:$0xf] %vm7056_vm15, %v634_v5  ;;  %vm7062_vm15 = vcmask 76872  }
  0xe8   : >> { %668 = vst.msk [vmem:[#allocation4 + $0x10] sm:$0xff] %vm7059_vm2, %v658_v6  ;;  %1202 = vrot.lane.b32.xlu0 %v5320_v32, %s7192_s12  ;;  %vm7075_vm2 = vcmask 121968  }
  0xe9   : >> { %1204 = vrot.lane.b32.xlu1 %v5337_v38, %s7192_s12 }
  0xea   : >> { %v737_v16 = vpop.permute.xlu0 %736 }
  0xeb   : >> { %v761_v3 = vpop.permute.xlu1 %760  ;;  %748 = vst.msk [vmem:[#allocation4 + $0x8] sm:$0xff] %vm7071_vm1, %v737_v16 }
  0xec   : >> { %773 = vst.msk [vmem:[#allocation4] sm:$0xff] %vm7073_vm3, %v761_v3  ;;  %1226 = vrot.lane.b32.xlu0 %v5340_v39, %s7193_s13 }
  0xed   : >> { %1228 = vrot.lane.b32.xlu1 %v5351_v42, %s7193_s13 }
  0xee   : >> { %v660_v1 = vpop.permute.xlu0 %659 }
  0xef   : >> { %v687_v12 = vpop.permute.xlu1 %686  ;;  %670 = vst.msk [vmem:[#allocation4 + $0x18] sm:$0xf] %vm7062_vm15, %v660_v1  ;;  %vm7066_vm15 = vcmask 85072  }
  0xf0   : >> { %697 = vst.msk [vmem:[#allocation4 + $0x10] sm:$0xff] %vm7065_vm11, %v687_v12  ;;  %1250 = vrot.lane.b32.xlu0 %v5354_v43, %s7194_s29  ;;  %vm7077_vm11 = vcmask 130168   ;;  %v4180_v43 = vld [vmem:[%s5291_s25 + $0x39] sm:$0xf] }
  0xf1   : >> { %1252 = vrot.lane.b32.xlu1 %v5365_v46, %s7194_s29 }
  0xf2   : >> { %v763_v32 = vpop.permute.xlu0 %762 }
  0xf3   : >> { %v787_v38 = vpop.permute.xlu1 %786  ;;  %774 = vst.msk [vmem:[#allocation4 + $0x8] sm:$0xff] %vm7073_vm3, %v763_v32 }
  0xf4   : >> { %799 = vst.msk [vmem:[#allocation4] sm:$0xff] %vm7075_vm2, %v787_v38  ;;  %1274 = vrot.lane.b32.xlu0 %v5368_v47, %s7195_s15 }
  0xf5   : >> { %1206 = vrot.lane.b32.xlu1 %v5376_v49, %s7192_s12 }
  0xf6   : >> { %v689_v39 = vpop.permute.xlu0 %688 }
  0xf7   : >> { %v713_v42 = vpop.permute.xlu1 %712  ;;  %699 = vst.msk [vmem:[#allocation4 + $0x18] sm:$0xf] %vm7066_vm15, %v689_v39  ;;  %vm7070_vm15 = vcmask 93272  }
  0xf8   : >> { %723 = vst.msk [vmem:[#allocation4 + $0x10] sm:$0xff] %vm7069_vm13, %v713_v42  ;;  %1276 = vrot.lane.b32.xlu0 %v5382_v50, %s7195_s15  ;;  %vm7079_vm13 = vcmask 138368  }
  0xf9   : >> { %1298 = vrot.lane.b32.xlu1 %v5385_v51, %s7196_s14  ;;  %v4184_v51 = vld [vmem:[%s5291_s25 + $0x3a] sm:$0xf] }
  0xfa   : >> { %v789_v46 = vpop.permute.xlu0 %788 }
  0xfb   : >> { %v816_v47 = vpop.permute.xlu1 %815  ;;  %800 = vst.msk [vmem:[#allocation4 + $0x8] sm:$0xff] %vm7075_vm2, %v789_v46 }
  0xfc   : >> { %828 = vst.msk [vmem:[#allocation4] sm:$0xff] %vm7077_vm11, %v816_v47  ;;  %1208 = vrot.lane.b32.xlu0 %v4180_v43, %s7192_s12  ;;  %s7198_s12 = smov 7  }
  0xfd   : >> { %1230 = vrot.lane.b32.xlu1 %v5393_v53, %s7193_s13 }
  0xfe   : >> { %v715_v49 = vpop.permute.xlu0 %714 }
  0xff   : >> { %v739_v50 = vpop.permute.xlu1 %738  ;;  %725 = vst.msk [vmem:[#allocation4 + $0x18] sm:$0xf] %vm7070_vm15, %v715_v49  ;;  %vm7072_vm15 = vcmask 101472  }
 0x100   : >> { %749 = vst.msk [vmem:[#allocation4 + $0x10] sm:$0xff] %vm7071_vm1, %v739_v50  ;;  %1300 = vrot.lane.b32.xlu0 %v5399_v54, %s7196_s14  ;;  %vm7081_vm1 = vcmask 146568  }
 0x101   : >> { %1322 = vrot.lane.b32.xlu1 %v5402_v55, %s7197_s24  ;;  %v4188_v55 = vld [vmem:[%s5291_s25 + $0x3b] sm:$0xf] }
 0x102   : >> { %v818_v5 = vpop.permute.xlu0 %817 }
 0x103   : >> { %v842_v6 = vpop.permute.xlu1 %841  ;;  %829 = vst.msk [vmem:[#allocation4 + $0x8] sm:$0xff] %vm7077_vm11, %v818_v5 }
 0x104   : >> { %854 = vst.msk [vmem:[#allocation4] sm:$0xff] %vm7079_vm13, %v842_v6  ;;  %1232 = vrot.lane.b32.xlu0 %v4184_v51, %s7193_s13  ;;  %s7199_s13 = smov 8  }
 0x105   : >> { %1254 = vrot.lane.b32.xlu1 %v5410_v57, %s7194_s29 }
 0x106   : >> { %v741_v53 = vpop.permute.xlu0 %740 }
 0x107   : >> { %v765_v54 = vpop.permute.xlu1 %764  ;;  %751 = vst.msk [vmem:[#allocation4 + $0x18] sm:$0xf] %vm7072_vm15, %v741_v53  ;;  %vm7074_vm15 = vcmask 109672   ;;  %v4220_v53 = vld [vmem:[%s5291_s25 + $0x79] sm:$0xf] }
 0x108   : >> { %775 = vst.msk [vmem:[#allocation4 + $0x10] sm:$0xff] %vm7073_vm3, %v765_v54  ;;  %1324 = vrot.lane.b32.xlu0 %v5416_v58, %s7197_s24  ;;  %vm7083_vm3 = vcmask 154768  }
 0x109   : >> { %1346 = vrot.lane.b32.xlu1 %v5419_v59, %s7198_s12  ;;  %v4192_v59 = vld [vmem:[%s5291_s25 + $0x3c] sm:$0xf] }
 0x10a   : >> { %v844_v16 = vpop.permute.xlu0 %843 }
 0x10b   : >> { %v868_v3 = vpop.permute.xlu1 %867  ;;  %855 = vst.msk [vmem:[#allocation4 + $0x8] sm:$0xff] %vm7079_vm13, %v844_v16  ;;  %v4174_v16 = vld [vmem:[%s5291_s25 + $0x28] sm:$0xff] }
 0x10c   : >> { %880 = vst.msk [vmem:[#allocation4] sm:$0xff] %vm7081_vm1, %v868_v3  ;;  %1256 = vrot.lane.b32.xlu0 %v4188_v55, %s7194_s29  ;;  %s7200_s29 = smov 9   ;;  %v4224_v3 = vld [vmem:[%s5291_s25 + $0x7a] sm:$0xf] }
 0x10d   : >> { %1278 = vrot.lane.b32.xlu1 %v5427_v61, %s7195_s15 }
 0x10e   : >> { %v767_v57 = vpop.permute.xlu0 %766 }
 0x10f   : >> { %v791_v58 = vpop.permute.xlu1 %790  ;;  %777 = vst.msk [vmem:[#allocation4 + $0x18] sm:$0xf] %vm7074_vm15, %v767_v57  ;;  %vm7076_vm15 = vcmask 117872  }
 0x110   : >> { %801 = vst.msk [vmem:[#allocation4 + $0x10] sm:$0xff] %vm7075_vm2, %v791_v58  ;;  %1348 = vrot.lane.b32.xlu0 %v5433_v62, %s7198_s12  ;;  %vm7085_vm2 = vcmask 162968  }
 0x111   : >> { %1370 = vrot.lane.b32.xlu1 %v5436_v63, %s7199_s13  ;;  %v4196_v63 = vld [vmem:[%s5291_s25 + $0x58] sm:$0xf] }
 0x112   : >> { %v870_v1 = vpop.permute.xlu0 %869 }
 0x113   : >> { %v894_v12 = vpop.permute.xlu1 %893  ;;  %881 = vst.msk [vmem:[#allocation4 + $0x8] sm:$0xff] %vm7081_vm1, %v870_v1 }
 0x114   : >> { %906 = vst.msk [vmem:[#allocation4] sm:$0xff] %vm7083_vm3, %v894_v12  ;;  %1280 = vrot.lane.b32.xlu0 %v4192_v59, %s7195_s15  ;;  %s7201_s15 = smov 10   ;;  %v4228_v59 = vld [vmem:[%s5291_s25 + $0x7b] sm:$0xf] }
 0x115   : >> { %1302 = vrot.lane.b32.xlu1 %v5444_v8, %s7196_s14 }
 0x116   : >> { %v793_v61 = vpop.permute.xlu0 %792 }
 0x117   : >> { %v820_v62 = vpop.permute.xlu1 %819  ;;  %803 = vst.msk [vmem:[#allocation4 + $0x18] sm:$0xf] %vm7076_vm15, %v793_v61  ;;  %vm7078_vm15 = vcmask 126072   ;;  %v4175_v61 = vld [vmem:[%s5291_s25 + $0x30] sm:$0xff] }
 0x118   : >> { %830 = vst.msk [vmem:[#allocation4 + $0x10] sm:$0xff] %vm7077_vm11, %v820_v62  ;;  %1372 = vrot.lane.b32.xlu0 %v5450_v9, %s7199_s13  ;;  %vm7087_vm11 = vcmask 171168  }
 0x119   : >> { %1394 = vrot.lane.b32.xlu1 %v5453_v10, %s7200_s29  ;;  %v4200_v10 = vld [vmem:[%s5291_s25 + $0x59] sm:$0xf] }
 0x11a   : >> { %v896_v32 = vpop.permute.xlu0 %895 }
 0x11b   : >> { %v920_v38 = vpop.permute.xlu1 %919  ;;  %907 = vst.msk [vmem:[#allocation4 + $0x8] sm:$0xff] %vm7083_vm3, %v896_v32 }
 0x11c   : >> { %932 = vst.msk [vmem:[#allocation4] sm:$0xff] %vm7085_vm2, %v920_v38  ;;  %1304 = vrot.lane.b32.xlu0 %v4196_v63, %s7196_s14  ;;  %s7202_s14 = smov 11  }
 0x11d   : >> { %1326 = vrot.lane.b32.xlu1 %v5461_v14, %s7197_s24 }
 0x11e   : >> { %v822_v8 = vpop.permute.xlu0 %821 }
 0x11f   : >> { %v846_v9 = vpop.permute.xlu1 %845  ;;  %832 = vst.msk [vmem:[#allocation4 + $0x18] sm:$0xf] %vm7078_vm15, %v822_v8  ;;  %vm7080_vm15 = vcmask 134272  }
 0x120   : >> { %856 = vst.msk [vmem:[#allocation4 + $0x10] sm:$0xff] %vm7079_vm13, %v846_v9  ;;  %1396 = vrot.lane.b32.xlu0 %v5467_v18, %s7200_s29  ;;  %vm986_vm13 = vcmask 179368  }
 0x121   : >> { %1418 = vrot.lane.b32.xlu1 %v5470_v19, %s7201_s15  ;;  %v4204_v19 = vld [vmem:[%s5291_s25 + $0x5a] sm:$0xf] }
 0x122   : >> { %v922_v39 = vpop.permute.xlu0 %921 }
 0x123   : >> { %v949_v42 = vpop.permute.xlu1 %948  ;;  %933 = vst.msk [vmem:[#allocation4 + $0x8] sm:$0xff] %vm7085_vm2, %v922_v39 }
 0x124   : >> { %961 = vst.msk [vmem:[#allocation4] sm:$0xff] %vm7087_vm11, %v949_v42  ;;  %1328 = vrot.lane.b32.xlu0 %v4200_v10, %s7197_s24  ;;  %s7203_s24 = smov 12  }
 0x125   : >> { %1350 = vrot.lane.b32.xlu1 %v5478_v21, %s7198_s12 }
 0x126   : >> { %v848_v14 = vpop.permute.xlu0 %847 }
 0x127   : >> { %v872_v18 = vpop.permute.xlu1 %871  ;;  %858 = vst.msk [vmem:[#allocation4 + $0x18] sm:$0xf] %vm7080_vm15, %v848_v14  ;;  %vm7082_vm15 = vcmask 142472  }
 0x128   : >> { %882 = vst.msk [vmem:[#allocation4 + $0x10] sm:$0xff] %vm7081_vm1, %v872_v18  ;;  %1420 = vrot.lane.b32.xlu0 %v5484_v22, %s7201_s15  ;;  %vm1012_vm1 = vcmask 187568  }
 0x129   : >> { %1442 = vrot.lane.b32.xlu1 %v5487_v23, %s7202_s14  ;;  %v4208_v23 = vld [vmem:[%s5291_s25 + $0x5b] sm:$0xf] }
 0x12a   : >> { %v951_v43 = vpop.permute.xlu0 %950 }
 0x12b   : >> { %v975_v46 = vpop.permute.xlu1 %974  ;;  %962 = vst.msk [vmem:[#allocation4 + $0x8] sm:$0xff] %vm7087_vm11, %v951_v43  ;;  %v4244_v43 = vld [vmem:[%s5291_s25 + $0x9a] sm:$0xf] }
 0x12c   : >> { %987 = vst.msk [vmem:[#allocation4] sm:$0xff] %vm986_vm13, %v975_v46  ;;  %1352 = vrot.lane.b32.xlu0 %v4204_v19, %s7198_s12  ;;  %s7204_s12 = smov 13  }
 0x12d   : >> { %1374 = vrot.lane.b32.xlu1 %v5495_v25, %s7199_s13 }
 0x12e   : >> { %v874_v21 = vpop.permute.xlu0 %873 }
 0x12f   : >> { %v898_v22 = vpop.permute.xlu1 %897  ;;  %884 = vst.msk [vmem:[#allocation4 + $0x18] sm:$0xf] %vm7082_vm15, %v874_v21  ;;  %vm7084_vm15 = vcmask 150672  }
 0x130   : >> { %908 = vst.msk [vmem:[#allocation4 + $0x10] sm:$0xff] %vm7083_vm3, %v898_v22  ;;  %1444 = vrot.lane.b32.xlu0 %v5501_v26, %s7202_s14  ;;  %vm1038_vm3 = vcmask 195768  }
 0x131   : >> { %1466 = vrot.lane.b32.xlu1 %v5504_v27, %s7203_s24  ;;  %v4212_v27 = vld [vmem:[%s5291_s25 + $0x5c] sm:$0xf] }
 0x132   : >> { %v977_v47 = vpop.permute.xlu0 %976 }
 0x133   : >> { %v1001_v49 = vpop.permute.xlu1 %1000  ;;  %988 = vst.msk [vmem:[#allocation4 + $0x8] sm:$0xff] %vm986_vm13, %v977_v47  ;;  %v4263_v47 = vld [vmem:[%s5291_s25 + $0xa2] sm:$0xff] }
 0x134   : >> { %1013 = vst.msk [vmem:[#allocation4] sm:$0xff] %vm1012_vm1, %v1001_v49  ;;  %1376 = vrot.lane.b32.xlu0 %v4208_v23, %s7199_s13  ;;  %s7205_s13 = smov 14   ;;  %v4248_v49 = vld [vmem:[%s5291_s25 + $0x9b] sm:$0xf] }
 0x135   : >> { %1398 = vrot.lane.b32.xlu1 %v5512_v29, %s7200_s29 }
 0x136   : >> { %v900_v25 = vpop.permute.xlu0 %899 }
 0x137   : >> { %v924_v26 = vpop.permute.xlu1 %923  ;;  %910 = vst.msk [vmem:[#allocation4 + $0x18] sm:$0xf] %vm7084_vm15, %v900_v25  ;;  %vm7086_vm15 = vcmask 158872  }
 0x138   : >> { %934 = vst.msk [vmem:[#allocation4 + $0x10] sm:$0xff] %vm7085_vm2, %v924_v26  ;;  %1468 = vrot.lane.b32.xlu0 %v5520_v33, %s7203_s24  ;;  %vm1064_vm2 = vcmask 203968  }
 0x139   : >> { %1490 = vrot.lane.b32.xlu1 %v5523_v34, %s7204_s12  ;;  %v4216_v34 = vld [vmem:[%s5291_s25 + $0x78] sm:$0xf] }
 0x13a   : >> { %v1003_v50 = vpop.permute.xlu0 %1002 }
 0x13b   : >> { %v1027_v51 = vpop.permute.xlu1 %1026  ;;  %1014 = vst.msk [vmem:[#allocation4 + $0x8] sm:$0xff] %vm1012_vm1, %v1003_v50 }
 0x13c   : >> { %1039 = vst.msk [vmem:[#allocation4] sm:$0xff] %vm1038_vm3, %v1027_v51  ;;  %1400 = vrot.lane.b32.xlu0 %v4212_v27, %s7200_s29  ;;  %s7206_s29 = smov 15   ;;  %v4267_v51 = vld [vmem:[%s5291_s25 + $0xa3] sm:$0xff] }
 0x13d   : >> { %1422 = vrot.lane.b32.xlu1 %v5533_v40, %s7201_s15 }
 0x13e   : >> { %v926_v29 = vpop.permute.xlu0 %925 }
 0x13f   : >> { %v953_v33 = vpop.permute.xlu1 %952  ;;  %936 = vst.msk [vmem:[#allocation4 + $0x18] sm:$0xf] %vm7086_vm15, %v926_v29  ;;  %vm7089_vm15 = vcmask 167072   ;;  %v4252_v29 = vld [vmem:[%s5291_s25 + $0x9c] sm:$0xf] }
 0x140   : >> { %963 = vst.msk [vmem:[#allocation4 + $0x10] sm:$0xff] %vm7087_vm11, %v953_v33  ;;  %1492 = vrot.lane.b32.xlu0 %v5541_v45, %s7204_s12  ;;  %vm7090_vm11 = vcmask 175272  }
 0x141   : >> { %1514 = vrot.lane.b32.xlu1 %v5544_v48, %s7205_s13  ;;  %v4173_v48 = vld [vmem:[%s5291_s25 + $0x20] sm:$0xff] }
 0x142   : >> { %v1029_v5 = vpop.permute.xlu0 %1028 }
 0x143   : >> { %v1053_v6 = vpop.permute.xlu1 %1052  ;;  %1040 = vst.msk [vmem:[#allocation4 + $0x8] sm:$0xff] %vm1038_vm3, %v1029_v5  ;;  %v4257_v5 = vld [vmem:[%s5291_s25 + $0xb0] sm:$0xff] }
 0x144   : >> { %1065 = vst.msk [vmem:[#allocation4] sm:$0xff] %vm1064_vm2, %v1053_v6  ;;  %1424 = vrot.lane.b32.xlu0 %v4216_v34, %s7201_s15  ;;  %s7207_s15 = smov 16  }
 0x145   : >> { %1446 = vrot.lane.b32.xlu1 %v5554_v7, %s7202_s14 }
 0x146   : >> { %v955_v40 = vpop.permute.xlu0 %954 }
 0x147   : >> { %v979_v45 = vpop.permute.xlu1 %978  ;;  %965 = vst.msk [vmem:[#allocation4 + $0x18] sm:$0xf] %vm7089_vm15, %v955_v40  ;;  %vm7091_vm15 = vcmask 183472  }
 0x148   : >> { %989 = vst.msk [vmem:[#allocation4 + $0x10] sm:$0xff] %vm986_vm13, %v979_v45  ;;  %1516 = vrot.lane.b32.xlu0 %v5562_v24, %s7205_s13  ;;  %v4271_v45 = vld [vmem:[%s5291_s25 + $0xa4] sm:$0xff] }
 0x149   : >> { %1538 = vrot.lane.b32.xlu1 %v5565_v28, %s7206_s29 }
 0x14a   : >> { %v1055_v54 = vpop.permute.xlu0 %1054 }
 0x14b   : >> { %v981_v55 = vpop.permute.xlu1 %980  ;;  %v1070_v7 = vld [vmem:[#allocation4] sm:$0xff]  ;;  %1066 = vst.msk [vmem:[#allocation4 + $0x8] sm:$0xff] %vm1064_vm2, %v1055_v54 }
 0x14c   : >> { %991 = vst.msk [vmem:[#allocation4 + $0x18] sm:$0xf] %vm7090_vm11, %v981_v55  ;;  %4547 = vmatprep.mubr.msk.f32.mxu0 %vm1080_vm0, %v1070_v7  ;;  %1448 = vrot.lane.b32.xlu0 %v4220_v53, %s7202_s14  ;;  %vm1042_vm11 = vcmask 191672   ;;  %s7208_s14 = smov 17   ;;  %v4261_v55 = vld [vmem:[%s5291_s25 + $0xb1] sm:$0xff] }
 0x14d   : >> { %1190 = vst.msk [vmem:[#allocation4] sm:$0xff] %vm428_vm4, %v4173_v48  ;;  %1470 = vrot.lane.b32.xlu1 %v5575_v36, %s7203_s24  ;;  %v4258_v48 = vld [vmem:[%s5291_s25 + $0xb8] sm:$0xf]  ;;  %v4272_v7 = vld [vmem:[%s5291_s25 + $0xac] sm:$0xff] }
 0x14e   : >> { %v1005_v24 = vpop.permute.xlu0 %1004 }
 0x14f   : >> { %v1007_v28 = vpop.permute.xlu1 %1006  ;;  %1015 = vst.msk [vmem:[#allocation4 + $0x10] sm:$0xff] %vm1012_vm1, %v1005_v24 }
 0x150   : >> { %1017 = vst.msk [vmem:[#allocation4 + $0x18] sm:$0xf] %vm7091_vm15, %v1007_v28  ;;  %1540 = vrot.lane.b32.xlu0 %v5583_v44, %s7206_s29  ;;  %vm1068_vm15 = vcmask 199872  }
 0x151   : >> { %1562 = vrot.lane.b32.xlu1 %v5586_v52, %s7207_s15 }
 0x152   : >> { %v1031_v57 = vpop.permute.xlu0 %1030  ;;  %v1071_v36 = vld [vmem:[#allocation4 + $0x8] sm:$0xff] }
 0x153   : >> { %v1033_v58 = vpop.permute.xlu1 %1032  ;;  %1041 = vst.msk [vmem:[#allocation4 + $0x10] sm:$0xff] %vm1038_vm3, %v1031_v57  ;;  %4548 = vmatmul.mubr.msk.f32.vlgmr.msra.gmra.mrb[0].mxu0 %vm1080_vm0, %v1071_v36  ;;  %v4266_v36 = vld [vmem:[%s5291_s25 + $0xba] sm:$0xf] }
 0x154   : >> { %1043 = vst.msk [vmem:[#allocation4 + $0x18] sm:$0xf] %vm1042_vm11, %v1033_v58  ;;  %1472 = vrot.lane.b32.xlu0 %v4224_v3, %s7203_s24  ;;  %s7209_s24 = smov 18   ;;  %v4265_v3 = vld [vmem:[%s5291_s25 + $0xb2] sm:$0xff] }
 0x155   : >> { %1191 = vst.msk [vmem:[#allocation4 + $0x8] sm:$0xff] %vm428_vm4, %v4174_v16  ;;  %1494 = vrot.lane.b32.xlu1 %v5596_v20, %s7204_s12  ;;  %v4176_v20 = vld [vmem:[%s5291_s25 + $0x38] sm:$0xf] }
 0x156   : >> { %v1057_v44 = vpop.permute.xlu0 %1056  ;;  %v4262_v16 = vld [vmem:[%s5291_s25 + $0xb9] sm:$0xf] }
 0x157   : >> { %v1059_v52 = vpop.permute.xlu1 %1058  ;;  %1067 = vst.msk [vmem:[#allocation4 + $0x10] sm:$0xff] %vm1064_vm2, %v1057_v44  ;;  %v4269_v44 = vld [vmem:[%s5291_s25 + $0xb3] sm:$0xff] }
 0x158   : >> { %1069 = vst.msk [vmem:[#allocation4 + $0x18] sm:$0xf] %vm1068_vm15, %v1059_v52  ;;  %1564 = vrot.lane.b32.xlu0 %v5604_v35, %s7207_s15 }
 0x159   : >> { %1586 = vrot.lane.b32.xlu1 %v5607_v37, %s7208_s14  ;;  %v4232_v37 = vld [vmem:[%s5291_s25 + $0x7c] sm:$0xf] }
 0x15a   : >> { %v1203_v1 = vpop.permute.xlu0 %1202 }
 0x15b   : >> { %v1205_v12 = vpop.permute.xlu1 %1204  ;;  %1214 = vst.msk [vmem:[#allocation4] sm:$0xff] %vm454_vm6, %v1203_v1  ;;  %v4270_v1 = vld [vmem:[%s5291_s25 + $0xbb] sm:$0xf] }
 0x15c   : >> { %1215 = vst.msk [vmem:[#allocation4 + $0x8] sm:$0xff] %vm454_vm6, %v1205_v12  ;;  %1496 = vrot.lane.b32.xlu0 %v4228_v59, %s7204_s12  ;;  %s7210_s12 = smov 19   ;;  %v4273_v12 = vld [vmem:[%s5291_s25 + $0xb4] sm:$0xff] }
 0x15d   : >> { %1518 = vrot.lane.b32.xlu1 %v5617_v11, %s7205_s13 }
 0x15e   : >> { %v1227_v35 = vpop.permute.xlu0 %1226  ;;  %v1072_v32 = vld [vmem:[#allocation4 + $0x10] sm:$0xff] }
 0x15f   : >> { %v1073_v62 = vld [vmem:[#allocation4 + $0x18] sm:$0xf]  ;;  %v1229_v63 = vpop.permute.xlu1 %1228  ;;  %1238 = vst.msk [vmem:[#allocation4] sm:$0xff] %vm480_vm7, %v1227_v35  ;;  %4550 = vmatprep.mubr.msk.f32.mxu0 %vm1080_vm0, %v1072_v32 }
 0x160   : >> { %1193 = vst.msk [vmem:[#allocation4 + $0x18] sm:$0xf] %vm432_vm5, %v4176_v20  ;;  %1588 = vrot.lane.b32.xlu0 %v5625_v41, %s7208_s14  ;;  %4551 = vmatmul.mubr.msk.f32.gmra.mrb[2].mxu0 %vm1080_vm0, %v1073_v62  ;;  %vm7213_vm5 = vcmask 19472   ;;  %v4274_v62 = vld [vmem:[%s5291_s25 + $0xbc] sm:$0xf] }
 0x161   : >> { %1239 = vst.msk [vmem:[#allocation4 + $0x8] sm:$0xff] %vm480_vm7, %v1229_v63  ;;  %1610 = vrot.lane.b32.xlu1 %v5628_v56, %s7209_s24  ;;  %v4236_v56 = vld [vmem:[%s5291_s25 + $0x98] sm:$0xf] }
 0x162   : >> { %1192 = vst.msk [vmem:[#allocation4 + $0x10] sm:$0xff] %vm428_vm4, %v4175_v61  ;;  %v1251_v11 = vpop.permute.xlu0 %1250  ;;  %vm7211_vm4 = vcmask 11272  }
 0x163   : >> { %v1253_v38 = vpop.permute.xlu1 %1252  ;;  %1262 = vst.msk [vmem:[#allocation4] sm:$0xff] %vm506_vm8, %v1251_v11 }
 0x164   : >> { %1263 = vst.msk [vmem:[#allocation4 + $0x8] sm:$0xff] %vm506_vm8, %v1253_v38  ;;  %1520 = vrot.lane.b32.xlu0 %v4232_v37, %s7205_s13  ;;  %s7212_s13 = smov 20  }
 0x165   : >> { %1542 = vrot.lane.b32.xlu1 %v5638_v30, %s7206_s29 }
 0x166   : >> { %v1275_v41 = vpop.permute.xlu0 %1274 }
 0x167   : >> { %v1207_v8 = vpop.permute.xlu1 %1206  ;;  %1286 = vst.msk [vmem:[#allocation4] sm:$0xff] %vm532_vm9, %v1275_v41 }
 0x168   : >> { %1216 = vst.msk [vmem:[#allocation4 + $0x10] sm:$0xff] %vm454_vm6, %v1207_v8  ;;  %1612 = vrot.lane.b32.xlu0 %v5648_v0, %s7209_s24  ;;  %v4255_v0 = vld [vmem:[%s5291_s25 + $0xa0] sm:$0xff]  ;;  %vm7215_vm6 = vcmask 27672  }
 0x169   : >> { %1634 = vrot.lane.b32.xlu1 %v5651_v17, %s7210_s12  ;;  %v4240_v17 = vld [vmem:[%s5291_s25 + $0x99] sm:$0xf] }
 0x16a   : >> { %v1277_v9 = vpop.permute.xlu0 %1276 }
 0x16b   : >> { %v1299_v10 = vpop.permute.xlu1 %1298  ;;  %1287 = vst.msk [vmem:[#allocation4 + $0x8] sm:$0xff] %vm532_vm9, %v1277_v9 }
 0x16c   : >> { %1310 = vst.msk [vmem:[#allocation4] sm:$0xff] %vm561_vm10, %v1299_v10  ;;  %1544 = vrot.lane.b32.xlu0 %v4236_v56, %s7206_s29  ;;  %s7214_s29 = smov 21  }
 0x16d   : >> { %1566 = vrot.lane.b32.xlu1 %v5664_v31, %s7207_s15  ;;  %v4256_v31 = vld [vmem:[%s5291_s25 + $0xa8] sm:$0xff] }
 0x16e   : >> { %v1209_v30 = vpop.permute.xlu0 %1208 }
 0x16f   : >> { %v1231_v39 = vpop.permute.xlu1 %1230  ;;  %1217 = vst.msk [vmem:[#allocation4 + $0x18] sm:$0xf] %vm7211_vm4, %v1209_v30  ;;  %vm7221_vm4 = vcmask 80968  }
 0x170   : >> { %1240 = vst.msk [vmem:[#allocation4 + $0x10] sm:$0xff] %vm480_vm7, %v1231_v39  ;;  %1636 = vrot.lane.b32.xlu0 %v5672_v2, %s7210_s12  ;;  %v4259_v2 = vld [vmem:[%s5291_s25 + $0xa1] sm:$0xff]  ;;  %vm7217_vm7 = vcmask 72768  }
 0x171   : >> { %1661 = vrot.lane.b32.xlu1 %v4255_v0, %s7212_s13 }
 0x172   : >> { %v1301_v42 = vpop.permute.xlu0 %1300 }
 0x173   : >> { %v1323_v14 = vpop.permute.xlu1 %1322  ;;  %1311 = vst.msk [vmem:[#allocation4 + $0x8] sm:$0xff] %vm561_vm10, %v1301_v42 }
 0x174   : >> { %1334 = vst.msk [vmem:[#allocation4] sm:$0xff] %vm587_vm12, %v1323_v14  ;;  %1568 = vrot.lane.b32.xlu0 %v4240_v17, %s7207_s15  ;;  %s7216_s15 = smov 22  }
 0x175   : >> { %1590 = vrot.lane.b32.xlu1 %v5681_v60, %s7208_s14  ;;  %v4260_v60 = vld [vmem:[%s5291_s25 + $0xa9] sm:$0xff] }
 0x176   : >> { %v1233_v18 = vpop.permute.xlu0 %1232 }
 0x177   : >> { %v1255_v19 = vpop.permute.xlu1 %1254  ;;  %1241 = vst.msk [vmem:[#allocation4 + $0x18] sm:$0xf] %vm7213_vm5, %v1233_v18  ;;  %vm7224_vm5 = vmmov %vm7221_vm4 }
 0x178   : >> { %1264 = vst.msk [vmem:[#allocation4 + $0x10] sm:$0xff] %vm506_vm8, %v1255_v19  ;;  %1663 = vrot.lane.b32.xlu0 %v4256_v31, %s7212_s13  ;;  %vm7218_vm8 = vcmask 35872  }
 0x179   : >> { %1685 = vrot.lane.b32.xlu1 %v4259_v2, %s7214_s29 }
 0x17a   : >> { %v1325_v46 = vpop.permute.xlu0 %1324 }
 0x17b   : >> { %v1347_v21 = vpop.permute.xlu1 %1346  ;;  %1335 = vst.msk [vmem:[#allocation4 + $0x8] sm:$0xff] %vm587_vm12, %v1325_v46 }
 0x17c   : >> { %1358 = vst.msk [vmem:[#allocation4] sm:$0xff] %vm613_vm14, %v1347_v21  ;;  %1592 = vrot.lane.b32.xlu0 %v4244_v43, %s7208_s14  ;;  %s7219_s14 = smov 23  }
 0x17d   : >> { %1614 = vrot.lane.b32.xlu1 %v5690_v4, %s7209_s24  ;;  %v4264_v4 = vld [vmem:[%s5291_s25 + $0xaa] sm:$0xff] }
 0x17e   : >> { %v1257_v22 = vpop.permute.xlu0 %1256 }
 0x17f   : >> { %v1279_v23 = vpop.permute.xlu1 %1278  ;;  %1265 = vst.msk [vmem:[#allocation4 + $0x18] sm:$0xf] %vm7215_vm6, %v1257_v22  ;;  %vm7225_vm6 = vcmask 89168  }
 0x180   : >> { %1288 = vst.msk [vmem:[#allocation4 + $0x10] sm:$0xff] %vm532_vm9, %v1279_v23  ;;  %1687 = vrot.lane.b32.xlu0 %v4260_v60, %s7214_s29  ;;  %vm7220_vm9 = vmmov %vm7217_vm7 }
 0x181   : >> { %1709 = vrot.lane.b32.xlu1 %v4263_v47, %s7216_s15 }
 0x182   : >> { %v1349_v25 = vpop.permute.xlu0 %1348 }
 0x183   : >> { %v1371_v26 = vpop.permute.xlu1 %1370  ;;  %1359 = vst.msk [vmem:[#allocation4 + $0x8] sm:$0xff] %vm613_vm14, %v1349_v25 }
 0x184   : >> { %1382 = vst.msk [vmem:[#allocation4] sm:$0xff] %vm7217_vm7, %v1371_v26  ;;  %1616 = vrot.lane.b32.xlu0 %v4248_v49, %s7209_s24  ;;  %s7223_s24 = smov 24   ;;  %vm7227_vm7 = vmmov %vm7225_vm6 }
 0x185   : >> { %1638 = vrot.lane.b32.xlu1 %v5699_v15, %s7210_s12  ;;  %v4268_v15 = vld [vmem:[%s5291_s25 + $0xab] sm:$0xff]  ;;  %s4286_s25 = sshll.u32 %s5051_s22, 4  ;;  %s420_s22 = sadd.s32 1, %s5051_s22  }
 0x186   : >> { %v1281_v27 = vpop.permute.xlu0 %1280  ;;  %p417_p11 = scmp.ge.s32.totalorder %s420_s22, 14  }
 0x187   : >> { %v1303_v50 = vpop.permute.xlu1 %1302  ;;  %1289 = vst.msk [vmem:[#allocation4 + $0x18] sm:$0xf] %vm7218_vm8, %v1281_v27  ;;  %vm7228_vm8 = vcmask 97368  }
 0x188   : >> { %1312 = vst.msk [vmem:[#allocation4 + $0x10] sm:$0xff] %vm561_vm10, %v1303_v50  ;;  %1711 = vrot.lane.b32.xlu0 %v4264_v4, %s7216_s15  ;;  %vm7222_vm10 = vcmask 44072  }
 0x189   : >> { %1733 = vrot.lane.b32.xlu1 %v4267_v51, %s7219_s14 }
 0x18a   : >> { %v1373_v33 = vpop.permute.xlu0 %1372 }
 0x18b   : >> { %v1395_v34 = vpop.permute.xlu1 %1394  ;;  %1383 = vst.msk [vmem:[#allocation4 + $0x8] sm:$0xff] %vm7220_vm9, %v1373_v33 }
 0x18c   : >> { %1406 = vst.msk [vmem:[#allocation4] sm:$0xff] %vm7221_vm4, %v1395_v34  ;;  %1640 = vrot.lane.b32.xlu0 %v4252_v29, %s7210_s12  ;;  %vm7230_vm4 = vmmov %vm7228_vm8  ;;  %s2052_s12 = scalar_lea.vmem [#allocation2], %s4286_s25 }
 0x18d   : >> { %1665 = vrot.lane.b32.xlu1 %v4257_v5, %s7212_s13 }
 0x18e   : >> { %v1305_v6 = vpop.permute.xlu0 %1304 }
 0x18f   : >> { %v1327_v40 = vpop.permute.xlu1 %1326  ;;  %1313 = vst.msk [vmem:[#allocation4 + $0x18] sm:$0xf] %vm7222_vm10, %v1305_v6  ;;  %vm7231_vm10 = vcmask 105568  }
 0x190   : >> { %1336 = vst.msk [vmem:[#allocation4 + $0x10] sm:$0xff] %vm587_vm12, %v1327_v40  ;;  %1735 = vrot.lane.b32.xlu0 %v4268_v15, %s7219_s14  ;;  %vm7226_vm12 = vcmask 52272  }
 0x191   : >> { %1757 = vrot.lane.b32.xlu1 %v4271_v45, %s7223_s24 }
 0x192   : >> { %v1397_v53 = vpop.permute.xlu0 %1396 }
 0x193   : >> { %v1419_v54 = vpop.permute.xlu1 %1418  ;;  %1407 = vst.msk [vmem:[#allocation4 + $0x8] sm:$0xff] %vm7224_vm5, %v1397_v53  ;;  %vm7232_vm5 = vcmask 68672  }
 0x194   : >> { %1430 = vst.msk [vmem:[#allocation4] sm:$0xff] %vm7225_vm6, %v1419_v54  ;;  %1667 = vrot.lane.b32.xlu0 %v4258_v48, %s7212_s13  ;;  %vm7233_vm6 = vcmask 80968   ;;  %s6192_s13 = smov (%p417_p11), 0  }
 0x195   : >> { %1689 = vrot.lane.b32.xlu1 %v4261_v55, %s7214_s29 }
 0x196   : >> { %v1329_v24 = vpop.permute.xlu0 %1328 }
 0x197   : >> { %v1351_v28 = vpop.permute.xlu1 %1350  ;;  %1337 = vst.msk [vmem:[#allocation4 + $0x18] sm:$0xf] %vm7226_vm12, %v1329_v24  ;;  %vm7234_vm12 = vmmov %vm7231_vm10 }
 0x198   : >> { %1360 = vst.msk [vmem:[#allocation4 + $0x10] sm:$0xff] %vm613_vm14, %v1351_v28  ;;  %1759 = vrot.lane.b32.xlu0 %v4272_v7, %s7223_s24  ;;  %vm7229_vm14 = vcmask 60472  }
 0x199   : >> { %1691 = vrot.lane.b32.xlu1 %v4262_v16, %s7214_s29 }
 0x19a   : >> { %v1421_v57 = vpop.permute.xlu0 %1420 }
 0x19b   : >> { %v1443_v58 = vpop.permute.xlu1 %1442  ;;  %1431 = vst.msk [vmem:[#allocation4 + $0x8] sm:$0xff] %vm7227_vm7, %v1421_v57  ;;  %vm7235_vm7 = vcmask 113768  }
 0x19c   : >> { %1454 = vst.msk [vmem:[#allocation4] sm:$0xff] %vm7228_vm8, %v1443_v58  ;;  %1713 = vrot.lane.b32.xlu0 %v4265_v3, %s7216_s15  ;;  %vm7236_vm8 = vcmask 76872  }
 0x19d   : >> { %1715 = vrot.lane.b32.xlu1 %v4266_v36, %s7216_s15 }
 0x19e   : >> { %v1353_v52 = vpop.permute.xlu0 %1352 }
 0x19f   : >> { %v1375_v59 = vpop.permute.xlu1 %1374  ;;  %1361 = vst.msk [vmem:[#allocation4 + $0x18] sm:$0xf] %vm7229_vm14, %v1353_v52  ;;  %vm7237_vm14 = vcmask 89168  }
 0x1a0   : >> { %1384 = vst.msk [vmem:[#allocation4 + $0x10] sm:$0xff] %vm7220_vm9, %v1375_v59  ;;  %1737 = vrot.lane.b32.xlu0 %v4269_v44, %s7219_s14  ;;  %vm7238_vm9 = vmmov %vm7235_vm7 }
 0x1a1   : >> { %1739 = vrot.lane.b32.xlu1 %v4270_v1, %s7219_s14 }
 0x1a2   : >> { %v1445_v20 = vpop.permute.xlu0 %1444 }
 0x1a3   : >> { %v1467_v61 = vpop.permute.xlu1 %1466  ;;  %1455 = vst.msk [vmem:[#allocation4 + $0x8] sm:$0xff] %vm7230_vm4, %v1445_v20  ;;  %vm7239_vm4 = vcmask 121968  }
 0x1a4   : >> { %1478 = vst.msk [vmem:[#allocation4] sm:$0xff] %vm7231_vm10, %v1467_v61  ;;  %1761 = vrot.lane.b32.xlu0 %v4273_v12, %s7223_s24  ;;  %vm7240_vm10 = vcmask 85072  }
 0x1a5   : >> { %1763 = vrot.lane.b32.xlu1 %v4274_v62, %s7223_s24 }
 0x1a6   : >> { %v1377_v35 = vpop.permute.xlu0 %1376 }
 0x1a7   : >> { %v1399_v63 = vpop.permute.xlu1 %1398  ;;  %1385 = vst.msk [vmem:[#allocation4 + $0x18] sm:$0xf] %vm7232_vm5, %v1377_v35  ;;  %vm7241_vm5 = vcmask 97368  }
 0x1a8   : >> { %1408 = vst.msk [vmem:[#allocation4 + $0x10] sm:$0xff] %vm7233_vm6, %v1399_v63  ;;  %vm7242_vm6 = vmmov %vm7239_vm4 }
 0x1aa   : >> { %v1469_v32 = vpop.permute.xlu0 %1468 }
 0x1ab   : >> { %v1491_v37 = vpop.permute.xlu1 %1490  ;;  %1479 = vst.msk [vmem:[#allocation4 + $0x8] sm:$0xff] %vm7234_vm12, %v1469_v32  ;;  %vm7243_vm12 = vcmask 130168  }
 0x1ac   : >> { %1502 = vst.msk [vmem:[#allocation4] sm:$0xff] %vm7235_vm7, %v1491_v37  ;;  %vm7244_vm7 = vcmask 93272   ;;  %v7276_v37 = vld [vmem:[#allocation17_spill] sm:$0xff] }
 0x1ae   : >> { %v1401_v11 = vpop.permute.xlu0 %1400 }
 0x1af   : >> { %v1423_v38 = vpop.permute.xlu1 %1422  ;;  %1409 = vst.msk [vmem:[#allocation4 + $0x18] sm:$0xf] %vm7236_vm8, %v1401_v11  ;;  %vm7245_vm8 = vcmask 105568   ;;  %v7277_v11 = vld [vmem:[#allocation14_spill] sm:$0xff] }
 0x1b0   : >> { %1432 = vst.msk [vmem:[#allocation4 + $0x10] sm:$0xff] %vm7237_vm14, %v1423_v38  ;;  %vm7246_vm14 = vmmov %vm7243_vm12 }
 0x1b2   : >> { %v1493_v41 = vpop.permute.xlu0 %1492 }
 0x1b3   : >> { %v1515_v8 = vpop.permute.xlu1 %1514  ;;  %1503 = vst.msk [vmem:[#allocation4 + $0x8] sm:$0xff] %vm7238_vm9, %v1493_v41  ;;  %vm7247_vm9 = vcmask 138368  }
 0x1b4   : >> { %1526 = vst.msk [vmem:[#allocation4] sm:$0xff] %vm7239_vm4, %v1515_v8  ;;  %vm7248_vm4 = vcmask 101472  }
 0x1b6   : >> { %v1425_v56 = vpop.permute.xlu0 %1424 }
 0x1b7   : >> { %v1447_v9 = vpop.permute.xlu1 %1446  ;;  %1433 = vst.msk [vmem:[#allocation4 + $0x18] sm:$0xf] %vm7240_vm10, %v1425_v56  ;;  %vm7249_vm10 = vcmask 113768  }
 0x1b8   : >> { %1456 = vst.msk [vmem:[#allocation4 + $0x10] sm:$0xff] %vm7241_vm5, %v1447_v9  ;;  %vm7250_vm5 = vmmov %vm7247_vm9 }
 0x1ba   : >> { %v1517_v10 = vpop.permute.xlu0 %1516 }
 0x1bb   : >> { %v1539_v30 = vpop.permute.xlu1 %1538  ;;  %1527 = vst.msk [vmem:[#allocation4 + $0x8] sm:$0xff] %vm7242_vm6, %v1517_v10  ;;  %vm7251_vm6 = vcmask 146568  }
 0x1bc   : >> { %1550 = vst.msk [vmem:[#allocation4] sm:$0xff] %vm7243_vm12, %v1539_v30  ;;  %vm7252_vm12 = vcmask 109672  }
 0x1be   : >> { %v1449_v39 = vpop.permute.xlu0 %1448 }
 0x1bf   : >> { %v1471_v0 = vpop.permute.xlu1 %1470  ;;  %1457 = vst.msk [vmem:[#allocation4 + $0x18] sm:$0xf] %vm7244_vm7, %v1449_v39  ;;  %vm7253_vm7 = vcmask 121968  }
 0x1c0   : >> { %1480 = vst.msk [vmem:[#allocation4 + $0x10] sm:$0xff] %vm7245_vm8, %v1471_v0  ;;  %vm7254_vm8 = vmmov %vm7251_vm6 }
 0x1c2   : >> { %v1541_v17 = vpop.permute.xlu0 %1540 }
 0x1c3   : >> { %v1563_v42 = vpop.permute.xlu1 %1562  ;;  %1551 = vst.msk [vmem:[#allocation4 + $0x8] sm:$0xff] %vm7246_vm14, %v1541_v17  ;;  %vm7255_vm14 = vcmask 154768  }
 0x1c4   : >> { %1574 = vst.msk [vmem:[#allocation4] sm:$0xff] %vm7247_vm9, %v1563_v42  ;;  %vm7256_vm9 = vcmask 117872  }
 0x1c6   : >> { %v1473_v14 = vpop.permute.xlu0 %1472 }
 0x1c7   : >> { %v1495_v31 = vpop.permute.xlu1 %1494  ;;  %1481 = vst.msk [vmem:[#allocation4 + $0x18] sm:$0xf] %vm7248_vm4, %v1473_v14  ;;  %vm7257_vm4 = vcmask 130168  }
 0x1c8   : >> { %1504 = vst.msk [vmem:[#allocation4 + $0x10] sm:$0xff] %vm7249_vm10, %v1495_v31  ;;  %vm7258_vm10 = vmmov %vm7255_vm14 }
 0x1ca   : >> { %v1565_v18 = vpop.permute.xlu0 %1564 }
 0x1cb   : >> { %v1587_v19 = vpop.permute.xlu1 %1586  ;;  %1575 = vst.msk [vmem:[#allocation4 + $0x8] sm:$0xff] %vm7250_vm5, %v1565_v18  ;;  %vm7259_vm5 = vcmask 162968  }
 0x1cc   : >> { %1598 = vst.msk [vmem:[#allocation4] sm:$0xff] %vm7251_vm6, %v1587_v19  ;;  %vm7260_vm6 = vcmask 126072  }
 0x1ce   : >> { %v1497_v2 = vpop.permute.xlu0 %1496 }
 0x1cf   : >> { %v1519_v43 = vpop.permute.xlu1 %1518  ;;  %1505 = vst.msk [vmem:[#allocation4 + $0x18] sm:$0xf] %vm7252_vm12, %v1497_v2  ;;  %vm7261_vm12 = vcmask 138368  }
 0x1d0   : >> { %1528 = vst.msk [vmem:[#allocation4 + $0x10] sm:$0xff] %vm7253_vm7, %v1519_v43  ;;  %vm7262_vm7 = vmmov %vm7259_vm5 }
 0x1d2   : >> { %v1589_v46 = vpop.permute.xlu0 %1588 }
 0x1d3   : >> { %1599 = vst.msk [vmem:[#allocation4 + $0x8] sm:$0xff] %vm7254_vm8, %v1589_v46  ;;  %v1611_v21 = vpop.permute.xlu1 %1610  ;;  %vm7263_vm8 = vcmask 171168  }
 0x1d4   : >> { %1622 = vst.msk [vmem:[#allocation4] sm:$0xff] %vm7255_vm14, %v1611_v21  ;;  %vm7264_vm14 = vcmask 134272  }
 0x1d6   : >> { %v1521_v60 = vpop.permute.xlu0 %1520 }
 0x1d7   : >> { %1529 = vst.msk [vmem:[#allocation4 + $0x18] sm:$0xf] %vm7256_vm9, %v1521_v60  ;;  %v1543_v22 = vpop.permute.xlu1 %1542  ;;  %vm7265_vm9 = vcmask 146568  }
 0x1d8   : >> { %1552 = vst.msk [vmem:[#allocation4 + $0x10] sm:$0xff] %vm7257_vm4, %v1543_v22  ;;  %vm7266_vm4 = vmmov %vm7263_vm8 }
 0x1da   : >> { %v1613_v23 = vpop.permute.xlu0 %1612 }
 0x1db   : >> { %1623 = vst.msk [vmem:[#allocation4 + $0x8] sm:$0xff] %vm7258_vm10, %v1613_v23  ;;  %v1635_v47 = vpop.permute.xlu1 %1634  ;;  %vm7267_vm10 = vcmask 142472  }
 0x1dc   : >> { %1646 = vst.msk [vmem:[#allocation4] sm:$0xff] %vm7259_vm5, %v1635_v47  ;;  %vm7268_vm5 = vcmask 154768  }
 0x1de   : >> { %v1545_v49 = vpop.permute.xlu0 %1544 }
 0x1df   : >> { %1553 = vst.msk [vmem:[#allocation4 + $0x18] sm:$0xf] %vm7260_vm6, %v1545_v49  ;;  %v1567_v25 = vpop.permute.xlu1 %1566  ;;  %vm7269_vm6 = vcmask 150672  }
 0x1e0   : >> { %1576 = vst.msk [vmem:[#allocation4 + $0x10] sm:$0xff] %vm7261_vm12, %v1567_v25  ;;  %vm7270_vm12 = vmmov %vm7262_vm7 }
 0x1e2   : >> { %v1637_v26 = vpop.permute.xlu0 %1636 }
 0x1e3   : >> { %1647 = vst.msk [vmem:[#allocation4 + $0x8] sm:$0xff] %vm7262_vm7, %v1637_v26  ;;  %v1662_v4 = vpop.permute.xlu1 %1661  ;;  %vm7271_vm7 = vcmask 158872  }
 0x1e4   : >> { %1673 = vst.msk [vmem:[#allocation4] sm:$0xff] %vm7263_vm8, %v1662_v4  ;;  %vm7272_vm8 = vmmov %vm7266_vm4  ;;  %v7279_v4 = vld [vmem:[#allocation16_spill] sm:$0xff] }
 0x1e6   : >> { %v1569_v27 = vpop.permute.xlu0 %1568 }
 0x1e7   : >> { %1577 = vst.msk [vmem:[#allocation4 + $0x18] sm:$0xf] %vm7264_vm14, %v1569_v27  ;;  %v1591_v50 = vpop.permute.xlu1 %1590  ;;  %vm7273_vm14 = vcmask 167072   ;;  %v7280_v27 = vld [vmem:[#allocation18_spill] sm:$0xff] }
 0x1e8   : >> { %1600 = vst.msk [vmem:[#allocation4 + $0x10] sm:$0xff] %vm7265_vm9, %v1591_v50  ;;  %vm7274_vm9 = vcmask 175272  }
 0x1ea   : >> { %v1664_v51 = vpop.permute.xlu0 %1663 }
 0x1eb   : >> { %1674 = vst.msk [vmem:[#allocation4 + $0x8] sm:$0xff] %vm7266_vm4, %v1664_v51  ;;  %v1686_v29 = vpop.permute.xlu1 %1685  ;;  %vm7275_vm4 = vcmask 183472  }
 0x1ec   : >> { %1697 = vst.msk [vmem:[#allocation4] sm:$0xff] %vm986_vm13, %v1686_v29 }
 0x1ee   : >> { %v1593_v33 = vpop.permute.xlu0 %1592 }
 0x1ef   : >> { %1601 = vst.msk [vmem:[#allocation4 + $0x18] sm:$0xf] %vm7267_vm10, %v1593_v33  ;;  %v1615_v34 = vpop.permute.xlu1 %1614 }
 0x1f0   : >> { %1624 = vst.msk [vmem:[#allocation4 + $0x10] sm:$0xff] %vm7268_vm5, %v1615_v34 }
 0x1f2   : >> { %v1688_v5 = vpop.permute.xlu0 %1687 }
 0x1f3   : >> { %1698 = vst.msk [vmem:[#allocation4 + $0x8] sm:$0xff] %vm986_vm13, %v1688_v5  ;;  %v1710_v15 = vpop.permute.xlu1 %1709 }
 0x1f4   : >> { %1721 = vst.msk [vmem:[#allocation4] sm:$0xff] %vm1012_vm1, %v1710_v15  ;;  %v6095_v15 = vld [vmem:[%s6992_s3] sm:$0xff] (%p417_p11) }
 0x1f6   : >> { %v1617_v6 = vpop.permute.xlu0 %1616 }
 0x1f7   : >> { %1625 = vst.msk [vmem:[#allocation4 + $0x18] sm:$0xf] %vm7269_vm6, %v1617_v6  ;;  %v1639_v40 = vpop.permute.xlu1 %1638  ;;  %v6100_v6 = vld [vmem:[%s6992_s3 + $0x8] sm:$0xff] (%p417_p11) }
 0x1f8   : >> { %1648 = vst.msk [vmem:[#allocation4 + $0x10] sm:$0xff] %vm7270_vm12, %v1639_v40  ;;  %v6105_v40 = vld [vmem:[%s6992_s3 + $0x10] sm:$0xff] (%p417_p11) }
 0x1fa   : >> { %v1712_v45 = vpop.permute.xlu0 %1711 }
 0x1fb   : >> { %1722 = vst.msk [vmem:[#allocation4 + $0x8] sm:$0xff] %vm1012_vm1, %v1712_v45  ;;  %v1734_v48 = vpop.permute.xlu1 %1733  ;;  %v6110_v45 = vld [vmem:[%s6992_s3 + $0x18] sm:$0xff] (%p417_p11) }
 0x1fc   : >> { %1745 = vst.msk [vmem:[#allocation4] sm:$0xff] %vm1038_vm3, %v1734_v48  ;;  %v6115_v48 = vld [vmem:[%s6992_s3 + $0x20] sm:$0xff] (%p417_p11) }
 0x1fe   : >> { %v1641_v53 = vpop.permute.xlu0 %1640 }
 0x1ff   : >> { %1649 = vst.msk [vmem:[#allocation4 + $0x18] sm:$0xf] %vm7271_vm7, %v1641_v53  ;;  %v1666_v54 = vpop.permute.xlu1 %1665  ;;  %v6120_v53 = vld [vmem:[%s6992_s3 + $0x28] sm:$0xff] (%p417_p11) }
 0x200   : >> { %1675 = vst.msk [vmem:[#allocation4 + $0x10] sm:$0xff] %vm7272_vm8, %v1666_v54  ;;  %v6125_v54 = vld [vmem:[%s6992_s3 + $0x30] sm:$0xff] (%p417_p11) }
 0x202   : >> { %v1736_v55 = vpop.permute.xlu0 %1735 }
 0x203   : >> { %1746 = vst.msk [vmem:[#allocation4 + $0x8] sm:$0xff] %vm1038_vm3, %v1736_v55  ;;  %v1758_v7 = vpop.permute.xlu1 %1757  ;;  %v6130_v55 = vld [vmem:[%s6992_s3 + $0x38] sm:$0xff] (%p417_p11) }
 0x204   : >> { %1769 = vst.msk [vmem:[#allocation4] sm:$0xff] %vm1064_vm2, %v1758_v7  ;;  %v6135_v7 = vld [vmem:[%s6992_s3 + $0x40] sm:$0xff] (%p417_p11) }
 0x206   : >> { %v1668_v24 = vpop.permute.xlu0 %1667 }
 0x207   : >> { %1676 = vst.msk [vmem:[#allocation4 + $0x18] sm:$0xf] %vm7273_vm14, %v1668_v24  ;;  %v1690_v28 = vpop.permute.xlu1 %1689  ;;  %v6140_v24 = vld [vmem:[%s6992_s3 + $0x48] sm:$0xff] (%p417_p11) }
 0x208   : >> { %1699 = vst.msk [vmem:[#allocation4 + $0x10] sm:$0xff] %vm986_vm13, %v1690_v28  ;;  %v6145_v28 = vld [vmem:[%s6992_s3 + $0x50] sm:$0xff] (%p417_p11) }
 0x20a   : >> { %v1760_v16 = vpop.permute.xlu0 %1759 }
 0x20b   : >> { %1770 = vst.msk [vmem:[#allocation4 + $0x8] sm:$0xff] %vm1064_vm2, %v1760_v16  ;;  %v1692_v3 = vpop.permute.xlu1 %1691  ;;  %v1773_v57 = vld [vmem:[#allocation4] sm:$0xff]  ;;  %v6150_v16 = vld [vmem:[%s6992_s3 + $0x58] sm:$0xff] (%p417_p11) }
 0x20c   : >> { %1700 = vst.msk [vmem:[#allocation4 + $0x18] sm:$0xf] %vm7274_vm9, %v1692_v3  ;;  %4561 = vmatprep.mubr.msk.f32.mxu1 %vm1080_vm0, %v1773_v57  ;;  %v6155_v3 = vld [vmem:[%s6992_s3 + $0x60] sm:$0xff] (%p417_p11)  ;;  %v6160_v57 = vld [vmem:[%s6992_s3 + $0x68] sm:$0xff] (%p417_p11) }
 0x20e   : >> { %v1714_v58 = vpop.permute.xlu0 %1713 }
 0x20f   : >> { %1723 = vst.msk [vmem:[#allocation4 + $0x10] sm:$0xff] %vm1012_vm1, %v1714_v58  ;;  %v1716_v36 = vpop.permute.xlu1 %1715  ;;  %vm7166_vm1 = vcmask 48128   ;;  %v6165_v58 = vld [vmem:[%s6992_s3 + $0x70] sm:$0xff] (%p417_p11) }
 0x210   : >> { %1724 = vst.msk [vmem:[#allocation4 + $0x18] sm:$0xf] %vm7275_vm4, %v1716_v36  ;;  %v6170_v36 = vld [vmem:[%s6992_s3 + $0x78] sm:$0xff] (%p417_p11) }
 0x212   : >> { %v1738_v44 = vpop.permute.xlu0 %1737  ;;  %v1774_v52 = vld [vmem:[#allocation4 + $0x8] sm:$0xff] }
 0x213   : >> { %1747 = vst.msk [vmem:[#allocation4 + $0x10] sm:$0xff] %vm1038_vm3, %v1738_v44  ;;  %v1740_v59 = vpop.permute.xlu1 %1739  ;;  %4562 = vmatmul.mubr.msk.f32.vlgmr.msra.gmra.mrb[0].mxu1 %vm1080_vm0, %v1774_v52  ;;  %vm1882_vm3 = vcmask 228352   ;;  %v6175_v44 = vld [vmem:[%s6992_s3 + $0x80] sm:$0xff] (%p417_p11)  ;;  %v6180_v52 = vld [vmem:[%s6992_s3 + $0x88] sm:$0xff] (%p417_p11) }
 0x214   : >> { %1748 = vst.msk [vmem:[#allocation4 + $0x18] sm:$0xf] %vm1042_vm11, %v1740_v59  ;;  %4575 = vmatprep.mubr.msk.f32.mxu0 %vm1882_vm3, %v5269_v13  ;;  %vm7132_vm11 = vcmask 1043456   ;;  %v6185_v59 = vld [vmem:[%s6992_s3 + $0x90] sm:$0x3f] (%p417_p11) }
 0x216   : >> { %v1762_v1 = vpop.permute.xlu0 %1761 }
 0x217   : >> { %1771 = vst.msk [vmem:[#allocation4 + $0x10] sm:$0xff] %vm1064_vm2, %v1762_v1  ;;  %v1764_v12 = vpop.permute.xlu1 %1763  ;;  %vm2055_vm2 = vcmask 46080   ;;  %v6190_v1 = vld [vmem:[%s6993_s4] ss:$0 sm:$0xff] (%p417_p11) }
 0x218   : >> { %1772 = vst.msk [vmem:[#allocation4 + $0x18] sm:$0xf] %vm1068_vm15, %v1764_v12  ;;  %vm7278_vm15 = vmmov 1  }
 0x21e   : >> { %v1775_v20 = vld [vmem:[#allocation4 + $0x10] sm:$0xff] }
 0x21f   : >> { %4564 = vmatprep.mubr.msk.f32.mxu1 %vm1080_vm0, %v1775_v20  ;;  %v1776_v61 = vld [vmem:[#allocation4 + $0x18] sm:$0xf] }
 0x220   : >> { %4565 = vmatmul.mubr.msk.f32.gmra.mrb[2].mxu1 %vm1080_vm0, %v1776_v61  ;;  %vm4686_vm0 = vmpackc.low %vm7132_vm11, %vm7278_vm15 }
 0x221   : >> { %4586 = vmatprep.mubr.msk.f32.mxu1 %vm1882_vm3, %v7276_v37 }
 0x226   : >> { %v4549_v62 = vpop.f32.mrb[0].mxu0 }
 0x227   : >> { %v1163_v35 = vpop.f32.mrb[1].mxu0  ;;  %v1169_v38 = vadd.f32 %v4549_v62, %v7277_v11 }
 0x228   : >> { %v1164_v41 = vadd.f32 %v7277_v11, %v1163_v35 }
 0x229   : >> { %v1183_v30 = vmax.f32 %v1169_v38, 0.0 }
 0x22a   : >> { %v1182_v0 = vmax.f32 %v1164_v41, 0.0 }
 0x233   : >> { %v4552_v63 = vpop.f32.mrb[2].mxu0 }
 0x234   : >> { %v1173_v32 = vpop.f32.mrb[3].mxu0  ;;  %v1179_v18 = vadd.f32 %v4552_v63, %v7277_v11 }
 0x235   : >> { %v1174_v19 = vadd.f32 %v7277_v11, %v1173_v32 }
 0x236   : >> { %v1185_v60 = vmax.f32 %v1179_v18, 0.0 }
 0x237   : >> { %v1184_v23 = vmax.f32 %v1174_v19, 0.0 }
 0x2e6   : >> { %v4563_v8 = vpop.f32.mrb[0].mxu1 }
 0x2e7   : >> { %v1861_v56 = vadd.f32 %v4563_v8, %v7277_v11  ;;  %v1855_v9 = vpop.f32.mrb[1].mxu1 }
 0x2e8   : >> { %v1856_v10 = vadd.f32 %v7277_v11, %v1855_v9 }
 0x2e9   : >> { %v1875_v39 = vmax.f32 %v1861_v56, 0.0 }
 0x2ea   : >> { %v1874_v17 = vmax.f32 %v1856_v10, 0.0 }
 0x2eb   : >> { %v1879_v42 = vmax.f32 %v1183_v30, %v1875_v39 }
 0x2ec   : >> { %v1878_v14 = vmax.f32 %v1182_v0, %v1874_v17 }
 0x2ee   : >> { %v4681_v31 = vpack.c.bf16 %v1879_v42, %v1878_v14 }
 0x2f0   : >> { %4682 = vmatprep.subr.bf16.mxu0 %v4681_v31  ;;  %4692 = vmatprep.subr.bf16.mxu1 %v4681_v31 }
 0x2f1   : >> { %4684 = vmatpush3.bf16.msra.mxu0 %v4681_v31  ;;  %4694 = vmatpush3.bf16.msra.mxu1 %v4681_v31 }
 0x2f3   : >> { %v4566_v2 = vpop.f32.mrb[2].mxu1 }
 0x2f4   : >> { %v1871_v43 = vadd.f32 %v4566_v2, %v7277_v11  ;;  %v1865_v46 = vpop.f32.mrb[3].mxu1 }
 0x2f5   : >> { %v1866_v21 = vadd.f32 %v7277_v11, %v1865_v46 }
 0x2f6   : >> { %v1877_v22 = vmax.f32 %v1871_v43, 0.0 }
 0x2f7   : >> { %v1876_v47 = vmax.f32 %v1866_v21, 0.0 }
 0x2f8   : >> { %v1881_v49 = vmax.f32 %v1185_v60, %v1877_v22 }
 0x2f9   : >> { %v1880_v25 = vmax.f32 %v1184_v23, %v1876_v47 }
 0x2fb   : >> { %v4685_v26 = vpack.c.bf16 %v1881_v49, %v1880_v25 }
 0x2fd   : >> { %4687 = vmatprep.subr.msk.bf16.mxu0 %vm4686_vm0, %v4685_v26  ;;  %4697 = vmatprep.subr.msk.bf16.mxu1 %vm4686_vm0, %v4685_v26 }
 0x2fe   : >> { %4690 = vmatpush3.bf16.msk.msra.mxu0 %vm4686_vm0, %v4685_v26  ;;  %4700 = vmatpush3.bf16.msk.msra.mxu1 %vm4686_vm0, %v4685_v26 }
 0x301   : >> { %4576 = vmatmul.mubr.msk.f32.vlgmr.msra.gmra.mrb[4].mxu0 %vm1882_vm3, %v7279_v4  ;;  %4587 = vmatmul.mubr.msk.f32.vlgmr.msra.gmra.mrb[4].mxu1 %vm1882_vm3, %v7280_v27 }
 0x3d2   : > { %419 = sbr.rel (!%p417_p11) target bundleno = 37 (0x25), region = 131 }
 0x3d4   : >> { %v4577_v50 = vpop.f32.mrb[4].mxu0  ;;  %v4588_v51 = vpop.f32.mrb[4].mxu1 }
 0x3d5   : >> { %v2050_v29 = vmax.f32 %v4577_v50, %v4588_v51  ;;  %v1959_v33 = vpop.f32.mrb[5].mxu0  ;;  %v2040_v34 = vpop.f32.mrb[5].mxu1 }
 0x3d6   : >> { %v2049_v5 = vmax.f32 %v1959_v33, %v2040_v34 }
 0x3d7   : >> { %2056 = vst.msk [vmem:[%s2052_s12 + $0x8] sm:$0x3f] %vm2055_vm2, %v2050_v29 }
 0x3d8   : >> { %2054 = vst.msk [vmem:[%s2052_s12] sm:$0xff] %vm7166_vm1, %v2049_v5 }
 0x3d9 LB: >> { %s4436_s29 = sshll.u32 %s5055_s13, 5  ;;  %s7092_s14 = smov 18   ;;  %vm2090_vm13 = vcmask 41984   ;;  %vm7281_vm1 = vcmask 48128   ;;  %v4702_v33 = vpack.c.bf16 %v6100_v6, %v6095_v15  ;;  %v5103_v34 = vmov 0.0|0.0   ;;  %s5055_s13 = sphi %s6192_s13, %s2082_s13  }
 0x3da   : >> { %s6198_s15 = scalar_lea.vmem [#allocation2], %s4436_s29  ;;  %s7094_s24 = smov 6   ;;  %4701 = vmatprep.subr.bf16.mxu0 %v5103_v34  ;;  %4728 = vmatprep.subr.bf16.mxu1 %v5103_v34  ;;  %vm2461_vm10 = vcmask 1045504   ;;  %vm2102_vm5 = vcmask 97328   ;;  %vm2116_vm6 = vcmask 146528   ;;  %vm2130_vm12 = vcmask 195728  }
 0x3db   : >> { %s7096_s25 = smov 24   ;;  %s5086_s0 = smov 12   ;;  %4703 = vmatpush1.bf16.msra.mxu0 %v4702_v33  ;;  %4730 = vmatpush1.bf16.msra.mxu1 %v4702_v33  ;;  %vm2144_vm7 = vcmask 244928   ;;  %vm2161_vm8 = vcmask 294128   ;;  %vm2104_vm14 = vcmask 91184   ;;  %vm2175_vm9 = vcmask 343328  }
 0x3dc   : >> { %s7098_s12 = smov 30   ;;  %s7100_s16 = smov 36   ;;  %4704 = vmatprep.subr.bf16.mxu0 %v5103_v34  ;;  %4731 = vmatprep.subr.bf16.mxu1 %v5103_v34  ;;  %vm7164_vm4 = vcmask 140384   ;;  %vm7160_vm3 = vcmask 392528   ;;  %vm7163_vm15 = vcmask 189584   ;;  %vm7136_vm0 = vcmask 441728  }
 0x3dd   : >> { %s7102_s22 = smov 42   ;;  %s7104_s29 = smov 48   ;;  %vm7135_vm2 = vcmask 238784   ;;  %vm7138_vm11 = vcmask 287984  }
 0x3df   : >> { %v2120_v12 = vld [vmem:[%s6198_s15 + $0x3] sm:$0xff]  ;;  %v6209_v35 = vld [vmem:[%s6198_s15 + $0x10] sm:$0xff]  ;;  %v2121_v38 = vld [vmem:[%s6198_s15 + $0xb] sm:$0x3] }
 0x3e0   : >> { %v2092_v20 = vld [vmem:[%s6198_s15 + $0x1] sm:$0xff]  ;;  %2124 = vrot.lane.b32.xlu1 %v2120_v12, %s7092_s14  ;;  %v2093_v63 = vld [vmem:[%s6198_s15 + $0x9] sm:$0x3]  ;;  %v6216_v32 = vld [vmem:[%s6198_s15 + $0x11] sm:$0xff] }
 0x3e1   : >> { %2096 = vrot.lane.b32.xlu0 %v2092_v20, %s7094_s24  ;;  %v2134_v61 = vld [vmem:[%s6198_s15 + $0x4] sm:$0xff]  ;;  %v6223_v11 = vld [vmem:[%s6198_s15 + $0x12] sm:$0xff]  ;;  %v2135_v8 = vld [vmem:[%s6198_s15 + $0xc] sm:$0x3]  ;;  %v4705_v20 = vpack.c.bf16 %v6110_v45, %v6105_v40 }
 0x3e2   : >> { %v2106_v62 = vld [vmem:[%s6198_s15 + $0x2] sm:$0xff]  ;;  %v2107_v37 = vld [vmem:[%s6198_s15 + $0xa] sm:$0x3]  ;;  %v6230_v41 = vld [vmem:[%s6198_s15 + $0x13] sm:$0xff] }
 0x3e3   : >> { %v2086_v56 = vld [vmem:[%s6198_s15] sm:$0xff]  ;;  %v2087_v9 = vld [vmem:[%s6198_s15 + $0x8] sm:$0x3]  ;;  %v6241_v10 = vld [vmem:[%s6198_s15 + $0x14] sm:$0xff]  ;;  %4706 = vmatpush1.bf16.msra.mxu0 %v4705_v20  ;;  %4733 = vmatpush1.bf16.msra.mxu1 %v4705_v20 }
 0x3e4   : >> { %2138 = vrot.lane.b32.xlu1 %v2134_v61, %s7096_s25  ;;  %2089 = vst.msk [vmem:[#allocation5] sm:$0xff] %vm7281_vm1, %v2086_v56  ;;  %v4292_v30 = vld [vmem:[%s6198_s15 + $0x18] sm:$0x3]  ;;  %v6248_v39 = vld [vmem:[%s6198_s15 + $0x20] sm:$0xff]  ;;  %v4296_v42 = vld [vmem:[%s6198_s15 + $0x1a] sm:$0x3]  ;;  %4707 = vmatprep.subr.bf16.mxu0 %v5103_v34 }
 0x3e5   : >> { %2110 = vrot.lane.b32.xlu0 %v2106_v62, %s5086_s0  ;;  %2091 = vst.msk [vmem:[#allocation5 + $0x10] sm:$0x3] %vm2090_vm13, %v2087_v9  ;;  %v4294_v0 = vld [vmem:[%s6198_s15 + $0x19] sm:$0x3]  ;;  %v6255_v17 = vld [vmem:[%s6198_s15 + $0x21] sm:$0xff]  ;;  %v6283_v46 = vld [vmem:[%s6198_s15 + $0x30] sm:$0xff]  ;;  %4734 = vmatprep.subr.bf16.mxu1 %v5103_v34 }
 0x3e6   : >> { %v6262_v14 = vld [vmem:[%s6198_s15 + $0x22] sm:$0xff]  ;;  %v4298_v31 = vld [vmem:[%s6198_s15 + $0x1b] sm:$0x3]  ;;  %v6290_v60 = vld [vmem:[%s6198_s15 + $0x31] sm:$0xff] }
 0x3e7   : >> { %v6269_v18 = vld [vmem:[%s6198_s15 + $0x23] sm:$0xff]  ;;  %v4300_v19 = vld [vmem:[%s6198_s15 + $0x1c] sm:$0x3]  ;;  %v6297_v23 = vld [vmem:[%s6198_s15 + $0x32] sm:$0xff] }
 0x3e8   : >> { %2155 = vrot.lane.b32.xlu1 %v6209_v35, %s7098_s12  ;;  %v6276_v2 = vld [vmem:[%s6198_s15 + $0x24] sm:$0xff]  ;;  %v6304_v49 = vld [vmem:[%s6198_s15 + $0x33] sm:$0xff]  ;;  %v4312_v25 = vld [vmem:[%s6198_s15 + $0x2c] sm:$0x3] }
 0x3e9   : >> { %2098 = vrot.lane.b32.xlu0 %v2093_v63, %s7094_s24  ;;  %s7108_s24 = smov 60   ;;  %v4304_v43 = vld [vmem:[%s6198_s15 + $0x28] sm:$0x3]  ;;  %v4308_v22 = vld [vmem:[%s6198_s15 + $0x2a] sm:$0x3]  ;;  %v6311_v26 = vld [vmem:[%s6198_s15 + $0x34] sm:$0xff]  ;;  %v4708_v63 = vpack.c.bf16 %v6120_v53, %v6115_v48 }
 0x3ea   : >> { %v4306_v21 = vld [vmem:[%s6198_s15 + $0x29] sm:$0x3]  ;;  %v4310_v47 = vld [vmem:[%s6198_s15 + $0x2b] sm:$0x3]  ;;  %v4316_v4 = vld [vmem:[%s6198_s15 + $0x38] sm:$0x3] }
 0x3eb   : >> { %v6318_v27 = vld [vmem:[%s6198_s15 + $0x40] sm:$0xff]  ;;  %v4318_v50 = vld [vmem:[%s6198_s15 + $0x39] sm:$0x3]  ;;  %v4324_v5 = vld [vmem:[%s6198_s15 + $0x3c] sm:$0x3]  ;;  %4709 = vmatpush1.bf16.msra.mxu0 %v4708_v63  ;;  %4736 = vmatpush1.bf16.msra.mxu1 %v4708_v63 }
 0x3ec   : >> { %2169 = vrot.lane.b32.xlu1 %v6216_v32, %s7100_s16  ;;  %v6325_v51 = vld [vmem:[%s6198_s15 + $0x41] sm:$0xff]  ;;  %v4320_v29 = vld [vmem:[%s6198_s15 + $0x3a] sm:$0x3]  ;;  %v4330_v61 = vld [vmem:[%s6198_s15 + $0x49] sm:$0x3]  ;;  %4710 = vmatprep.subr.bf16.mxu0 %v5103_v34 }
 0x3ed   : >> { %2112 = vrot.lane.b32.xlu0 %v2107_v37, %s5086_s0  ;;  %v4322_v12 = vld [vmem:[%s6198_s15 + $0x3b] sm:$0x3]  ;;  %v4328_v62 = vld [vmem:[%s6198_s15 + $0x48] sm:$0x3]  ;;  %v4711_v37 = vpack.c.bf16 %v6130_v55, %v6125_v54  ;;  %4737 = vmatprep.subr.bf16.mxu1 %v5103_v34 }
 0x3ee   : >> { %v4348_v56 = vld [vmem:[%s6198_s15 + $0x1b] sm:$0x3]  ;;  %v6385_v9 = vld [vmem:[%s6198_s15 + $0x42] sm:$0xff] }
 0x3ef   : >> { %4712 = vmatpush1.bf16.msra.mxu0 %v4711_v37  ;;  %4739 = vmatpush1.bf16.msra.mxu1 %v4711_v37 }
 0x3f0   : >> { %2183 = vrot.lane.b32.xlu1 %v6223_v11, %s7102_s22  ;;  %4713 = vmatprep.subr.bf16.mxu0 %v5103_v34 }
 0x3f1   : >> { %2126 = vrot.lane.b32.xlu0 %v2121_v38, %s7092_s14  ;;  %s7106_s14 = smov 54   ;;  %v4714_v38 = vpack.c.bf16 %v6140_v24, %v6135_v7  ;;  %4740 = vmatprep.subr.bf16.mxu1 %v5103_v34 }
 0x3f3   : >> { %4715 = vmatpush1.bf16.msra.mxu0 %v4714_v38  ;;  %4742 = vmatpush1.bf16.msra.mxu1 %v4714_v38 }
 0x3f4   : >> { %2197 = vrot.lane.b32.xlu1 %v6230_v41, %s7104_s29  ;;  %4716 = vmatprep.subr.bf16.mxu0 %v5103_v34 }
 0x3f5   : >> { %2140 = vrot.lane.b32.xlu0 %v2135_v8, %s7096_s25  ;;  %s7110_s25 = smov 66   ;;  %4743 = vmatprep.subr.bf16.mxu1 %v5103_v34  ;;  %v4346_v8 = vld [vmem:[%s6198_s15 + $0x1a] sm:$0x3] }
 0x3f8   : >> { %2211 = vrot.lane.b32.xlu1 %v6241_v10, %s7106_s14 }
 0x3f9   : >> { %2157 = vrot.lane.b32.xlu0 %v4292_v30, %s7098_s12  ;;  %s7112_s12 = smov 72   ;;  %v6395_v30 = vld [vmem:[%s6198_s15 + $0x43] sm:$0xff] }
 0x3fc   : >> { %2228 = vrot.lane.b32.xlu1 %v6248_v39, %s7108_s24 }
 0x3fd   : >> { %2171 = vrot.lane.b32.xlu0 %v4294_v0, %s7100_s16  ;;  %s7114_s16 = smov 78   ;;  %v4350_v0 = vld [vmem:[%s6198_s15 + $0x1c] sm:$0x3] }
 0x400   : >> { %2242 = vrot.lane.b32.xlu1 %v6255_v17, %s7110_s25 }
 0x401   : >> { %2185 = vrot.lane.b32.xlu0 %v4296_v42, %s7102_s22  ;;  %s7130_s22 = smov 84   ;;  %v4352_v42 = vld [vmem:[%s6198_s15 + $0x28] sm:$0x3] }
 0x404   : >> { %2256 = vrot.lane.b32.xlu1 %v6262_v14, %s7112_s12 }
 0x405   : >> { %2199 = vrot.lane.b32.xlu0 %v4298_v31, %s7104_s29  ;;  %s7116_s29 = smov 90   ;;  %v4354_v31 = vld [vmem:[%s6198_s15 + $0x29] sm:$0x3] }
 0x408   : >> { %2270 = vrot.lane.b32.xlu1 %v6269_v18, %s7114_s16 }
 0x409   : >> { %2213 = vrot.lane.b32.xlu0 %v4300_v19, %s7106_s14  ;;  %s7128_s14 = smov 96  }
 0x40c   : >> { %2284 = vrot.lane.b32.xlu1 %v6276_v2, %s7130_s22 }
 0x40d   : >> { %2230 = vrot.lane.b32.xlu0 %v4304_v43, %s7108_s24  ;;  %s7126_s24 = smov 102   ;;  %v4332_v43 = vld [vmem:[%s6198_s15 + $0x4a] sm:$0x3] }
 0x410   : >> { %2301 = vrot.lane.b32.xlu1 %v6283_v46, %s7116_s29 }
 0x411   : >> { %2244 = vrot.lane.b32.xlu0 %v4306_v21, %s7110_s25  ;;  %s7122_s25 = smov 108  }
 0x414   : >> { %2315 = vrot.lane.b32.xlu1 %v6290_v60, %s7128_s14 }
 0x415   : >> { %2258 = vrot.lane.b32.xlu0 %v4308_v22, %s7112_s12  ;;  %s7118_s12 = smov 114  }
 0x418   : >> { %2329 = vrot.lane.b32.xlu1 %v6297_v23, %s7126_s24 }
 0x419   : >> { %2272 = vrot.lane.b32.xlu0 %v4310_v47, %s7114_s16  ;;  %s7120_s16 = smov 120  }
 0x41c   : >> { %2343 = vrot.lane.b32.xlu1 %v6304_v49, %s7122_s25 }
 0x41d   : >> { %2286 = vrot.lane.b32.xlu0 %v4312_v25, %s7130_s22  ;;  %s7133_s22 = smov 16  }
 0x420   : >> { %2357 = vrot.lane.b32.xlu1 %v6311_v26, %s7118_s12 }
 0x421   : >> { %2303 = vrot.lane.b32.xlu0 %v4316_v4, %s7116_s29  ;;  %s7124_s29 = smov 126   ;;  %v4334_v4 = vld [vmem:[%s6198_s15 + $0x4b] sm:$0x3] }
 0x424   : >> { %2374 = vrot.lane.b32.xlu1 %v6318_v27, %s7120_s16 }
 0x425   : >> { %2317 = vrot.lane.b32.xlu0 %v4318_v50, %s7128_s14  ;;  %s7288_s14 = smov 48  }
 0x428   : >> { %2388 = vrot.lane.b32.xlu1 %v6325_v51, %s7124_s29 }
 0x429   : >> { %2331 = vrot.lane.b32.xlu0 %v4320_v29, %s7126_s24  ;;  %s7286_s24 = smov 36  }
 0x42c   : >> { %2359 = vrot.lane.b32.xlu1 %v4324_v5, %s7118_s12  ;;  %s7282_s12 = smov 6   ;;  %v4360_v5 = vld [vmem:[%s6198_s15 + $0x2c] sm:$0x3] }
 0x42d   : >> { %2345 = vrot.lane.b32.xlu0 %v4322_v12, %s7122_s25  ;;  %s7284_s25 = smov 18  }
 0x430   : >> { %2390 = vrot.lane.b32.xlu1 %v4330_v61, %s7124_s29  ;;  %s7285_s29 = smov 30   ;;  %v4362_v61 = vld [vmem:[%s6198_s15 + $0x38] sm:$0x3] }
 0x431   : >> { %2376 = vrot.lane.b32.xlu0 %v4328_v62, %s7120_s16  ;;  %s7283_s16 = smov 24  }
 0x434   : >> { %2562 = vrot.lane.b32.xlu1 %v6223_v11, %s5086_s0  ;;  %v4344_v11 = vld [vmem:[%s6198_s15 + $0x19] sm:$0x3] }
 0x435   : >> { %2550 = vrot.lane.b32.xlu0 %v6216_v32, %s7282_s12  ;;  %v4717_v32 = vpack.c.bf16 %v6150_v16, %v6145_v28 }
 0x437   : >> { %4718 = vmatpush1.bf16.msra.mxu0 %v4717_v32  ;;  %4745 = vmatpush1.bf16.msra.mxu1 %v4717_v32 }
 0x438   : >> { %2586 = vrot.lane.b32.xlu1 %v6241_v10, %s7283_s16  ;;  %4719 = vmatprep.subr.bf16.mxu0 %v5103_v34  ;;  %v4723_v10 = vpack.c.bf16 %v6170_v36, %v6165_v58 }
 0x439   : >> { %2574 = vrot.lane.b32.xlu0 %v6230_v41, %s7284_s25  ;;  %v4720_v41 = vpack.c.bf16 %v6160_v57, %v6155_v3  ;;  %4746 = vmatprep.subr.bf16.mxu1 %v5103_v34 }
 0x43b   : >> { %4721 = vmatpush1.bf16.msra.mxu0 %v4720_v41  ;;  %4748 = vmatpush1.bf16.msra.mxu1 %v4720_v41  ;;  %v4385_v41 = vld [vmem:[%s6198_s15 + $0x51] sm:$0xff] }
 0x43c   : >> { %2598 = vrot.lane.b32.xlu1 %v6248_v39, %s7285_s29  ;;  %4722 = vmatprep.subr.bf16.mxu0 %v5103_v34  ;;  %v4726_v39 = vpack.c.bf16 %v6180_v52, %v6175_v44 }
 0x43d   : >> { %2552 = vrot.lane.b32.xlu0 %v4344_v11, %s7282_s12  ;;  %4749 = vmatprep.subr.bf16.mxu1 %v5103_v34  ;;  %s7151_s12 = smov 4  }
 0x43f   : >> { %4724 = vmatpush1.bf16.msra.mxu0 %v4723_v10  ;;  %4751 = vmatpush1.bf16.msra.mxu1 %v4723_v10 }
 0x440   : >> { %2610 = vrot.lane.b32.xlu1 %v6255_v17, %s7286_s24  ;;  %4725 = vmatprep.subr.bf16.mxu0 %v5103_v34  ;;  %v5107_v17 = vmov 0.0  }
 0x441   : >> { %2564 = vrot.lane.b32.xlu0 %v4346_v8, %s5086_s0  ;;  %4752 = vmatprep.subr.bf16.mxu1 %v5103_v34  ;;  %s5106_s0 = smov 10  }
 0x443   : >> { %4727 = vmatpush1.bf16.msra.mxu0 %v4726_v39  ;;  %4754 = vmatpush1.bf16.msra.mxu1 %v4726_v39 }
 0x444   : >> { %2576 = vrot.lane.b32.xlu1 %v4348_v56, %s7284_s25  ;;  %s7287_s25 = smov 42   ;;  %2501 = vmatprep.subr.mxu0 %v5107_v17 }
 0x445   : >> { %2406 = vrot.lane.b32.xlu0 %v6385_v9, %s7151_s12  ;;  %2885 = vmatprep.subr.mxu1 %v5107_v17 }
 0x447   : >> { %4338 = vmatpush1.msk.msra.mxu0 %vm2461_vm10, %v6185_v59  ;;  %4393 = vmatpush1.msk.msra.mxu1 %vm2461_vm10, %v6185_v59  ;;  %vm7137_vm10 = vcmask 490928  }
 0x448   : >> { %2420 = vrot.lane.b32.xlu1 %v6395_v30, %s5106_s0  ;;  %4755 = vmatprep.subr.bf16.mxu0 %v5103_v34 }
 0x449   : >> { %2622 = vrot.lane.b32.xlu0 %v6262_v14, %s7287_s25  ;;  %v6415_v14 = vld [vmem:[%s6198_s15 + $0x44] sm:$0xff]  ;;  %4759 = vmatprep.subr.bf16.mxu1 %v5103_v34 }
 0x44c   : >> { %2634 = vrot.lane.b32.xlu1 %v6269_v18, %s7288_s14 }
 0x44d   : >> { %2588 = vrot.lane.b32.xlu0 %v4350_v0, %s7283_s16  ;;  %s7289_s16 = smov 54  }
 0x450   : >> { %2600 = vrot.lane.b32.xlu1 %v4352_v42, %s7285_s29  ;;  %s7290_s29 = smov 60   ;;  %v4372_v42 = vld [vmem:[%s6198_s15 + $0x48] sm:$0x3] }
 0x451   : >> { %2434 = vrot.lane.b32.xlu0 %v6415_v14, %s7133_s22 }
 0x452   : >> { %v2125_v19 = vpop.permute.xlu1 %2124 }
 0x453   : >> { %v2097_v18 = vpop.permute.xlu0 %2096 }
 0x454   : >> { %2103 = vst.msk [vmem:[#allocation5] sm:$0xff] %vm2102_vm5, %v2097_v18  ;;  %2612 = vrot.lane.b32.xlu1 %v4354_v31, %s7286_s24  ;;  %s7291_s24 = smov 66   ;;  %v4374_v18 = vld [vmem:[%s6198_s15 + $0x49] sm:$0x3] }
 0x455   : >> { %2646 = vrot.lane.b32.xlu0 %v6276_v2, %s7289_s16  ;;  %v4356_v2 = vld [vmem:[%s6198_s15 + $0x2a] sm:$0x3] }
 0x456   : >> { %v2139_v21 = vpop.permute.xlu1 %2138 }
 0x457   : >> { %v2111_v22 = vpop.permute.xlu0 %2110 }
 0x458   : >> { %2117 = vst.msk [vmem:[#allocation5] sm:$0xff] %vm2116_vm6, %v2111_v22  ;;  %2408 = vrot.lane.b32.xlu1 %v4332_v43, %s7151_s12  ;;  %v4383_v22 = vld [vmem:[%s6198_s15 + $0x50] sm:$0xff] }
 0x459   : >> { %2131 = vst.msk [vmem:[#allocation5] sm:$0xff] %vm2130_vm12, %v2125_v19  ;;  %2658 = vrot.lane.b32.xlu0 %v6283_v46, %s7290_s29  ;;  %v4358_v46 = vld [vmem:[%s6198_s15 + $0x2b] sm:$0x3] }
 0x45a   : >> { %2145 = vst.msk [vmem:[#allocation5] sm:$0xff] %vm2144_vm7, %v2139_v21  ;;  %v2156_v47 = vpop.permute.xlu1 %2155 }
 0x45b   : >> { %v2099_v25 = vpop.permute.xlu0 %2098  ;;  %2162 = vst.msk [vmem:[#allocation5] sm:$0xff] %vm2161_vm8, %v2156_v47 }
 0x45c   : >> { %2105 = vst.msk [vmem:[#allocation5 + $0x10] sm:$0x3] %vm2104_vm14, %v2099_v25  ;;  %2670 = vrot.lane.b32.xlu1 %v6290_v60, %s7291_s24  ;;  %v4336_v60 = vld [vmem:[%s6198_s15 + $0x4c] sm:$0x3]  ;;  %v4386_v25 = vld [vmem:[%s6198_s15 + $0x59] sm:$0x3] }
 0x45d   : >> { %2624 = vrot.lane.b32.xlu0 %v4356_v2, %s7287_s25  ;;  %s7292_s25 = smov 72  }
 0x45e   : >> { %v2170_v50 = vpop.permute.xlu1 %2169 }
 0x45f   : >> { %v2113_v29 = vpop.permute.xlu0 %2112  ;;  %2176 = vst.msk [vmem:[#allocation5] sm:$0xff] %vm2175_vm9, %v2170_v50 }
 0x460   : >> { %2119 = vst.msk [vmem:[#allocation5 + $0x10] sm:$0x3] %vm7164_vm4, %v2113_v29  ;;  %2636 = vrot.lane.b32.xlu1 %v4358_v46, %s7288_s14  ;;  %s7293_s14 = smov 78   ;;  %v4376_v46 = vld [vmem:[%s6198_s15 + $0x4a] sm:$0x3]  ;;  %vm7168_vm4 = vcmask 1025984  }
 0x461   : >> { %2422 = vrot.lane.b32.xlu0 %v4334_v4, %s5106_s0  ;;  %v4388_v29 = vld [vmem:[%s6198_s15 + $0x5a] sm:$0x3] }
 0x462   : >> { %v2184_v33 = vpop.permute.xlu1 %2183 }
 0x463   : >> { %v2127_v34 = vpop.permute.xlu0 %2126  ;;  %2190 = vst.msk [vmem:[#allocation5] sm:$0xff] %vm7160_vm3, %v2184_v33  ;;  %vm2337_vm3 = vcmask 878384  }
 0x464   : >> { %2133 = vst.msk [vmem:[#allocation5 + $0x10] sm:$0x3] %vm7163_vm15, %v2127_v34  ;;  %2436 = vrot.lane.b32.xlu1 %v4336_v60, %s7133_s22  ;;  %s7294_s22 = smov 84   ;;  %v4378_v60 = vld [vmem:[%s6198_s15 + $0x4b] sm:$0x3]  ;;  %vm2400_vm15 = vcmask 25600  }
 0x465   : >> { %2682 = vrot.lane.b32.xlu0 %v6297_v23, %s7292_s25 }
 0x466   : >> { %v2198_v12 = vpop.permute.xlu1 %2197 }
 0x467   : >> { %v2141_v20 = vpop.permute.xlu0 %2140  ;;  %2204 = vst.msk [vmem:[#allocation5] sm:$0xff] %vm7136_vm0, %v2198_v12  ;;  %vm7140_vm0 = vcmask 337184   ;;  %v4380_v12 = vld [vmem:[%s6198_s15 + $0x4c] sm:$0x3] }
 0x468   : >> { %2147 = vst.msk [vmem:[#allocation5 + $0x10] sm:$0x3] %vm7135_vm2, %v2141_v20  ;;  %2694 = vrot.lane.b32.xlu1 %v6304_v49, %s7293_s14  ;;  %vm7139_vm2 = vcmask 540128   ;;  %v4364_v49 = vld [vmem:[%s6198_s15 + $0x39] sm:$0x3] }
 0x469   : >> { %2648 = vrot.lane.b32.xlu0 %v4360_v5, %s7289_s16  ;;  %s7295_s16 = smov 90   ;;  %v4390_v5 = vld [vmem:[%s6198_s15 + $0x5b] sm:$0x3] }
 0x46a   : >> { %v2212_v62 = vpop.permute.xlu1 %2211 }
 0x46b   : >> { %v2158_v23 = vpop.permute.xlu0 %2157  ;;  %2218 = vst.msk [vmem:[#allocation5] sm:$0xff] %vm7137_vm10, %v2212_v62  ;;  %vm7142_vm10 = vcmask 589328   ;;  %v4392_v62 = vld [vmem:[%s6198_s15 + $0x5c] sm:$0x3] }
 0x46c   : >> { %2164 = vst.msk [vmem:[#allocation5 + $0x10] sm:$0x3] %vm7138_vm11, %v2158_v23  ;;  %2706 = vrot.lane.b32.xlu1 %v6311_v26, %s7294_s22  ;;  %vm7141_vm11 = vcmask 386384   ;;  %v4366_v26 = vld [vmem:[%s6198_s15 + $0x3a] sm:$0x3] }
 0x46d   : >> { %2660 = vrot.lane.b32.xlu0 %v4362_v61, %s7290_s29  ;;  %s7296_s29 = smov 96   ;;  %v4384_v23 = vld [vmem:[%s6198_s15 + $0x58] sm:$0x3] }
 0x46e   : >> { %v2229_v63 = vpop.permute.xlu1 %2228 }
 0x46f   : >> { %v2172_v37 = vpop.permute.xlu0 %2171  ;;  %2235 = vst.msk [vmem:[#allocation5] sm:$0xff] %vm7139_vm2, %v2229_v63  ;;  %vm7143_vm2 = vcmask 638528  }
 0x470   : >> { %2178 = vst.msk [vmem:[#allocation5 + $0x10] sm:$0x3] %vm7140_vm0, %v2172_v37  ;;  %2718 = vrot.lane.b32.xlu1 %v6318_v27, %s7295_s16  ;;  %vm7144_vm0 = vcmask 435584   ;;  %v4368_v27 = vld [vmem:[%s6198_s15 + $0x3b] sm:$0x3] }
 0x471   : >> { %2672 = vrot.lane.b32.xlu0 %v4364_v49, %s7291_s24  ;;  %s7297_s24 = smov 102  }
 0x472   : >> { %v2243_v38 = vpop.permute.xlu1 %2242 }
 0x473   : >> { %v2186_v11 = vpop.permute.xlu0 %2185  ;;  %2249 = vst.msk [vmem:[#allocation5] sm:$0xff] %vm7142_vm10, %v2243_v38  ;;  %vm7145_vm10 = vcmask 484784  }
 0x474   : >> { %2192 = vst.msk [vmem:[#allocation5 + $0x10] sm:$0x3] %vm7141_vm11, %v2186_v11  ;;  %2730 = vrot.lane.b32.xlu1 %v6325_v51, %s7296_s29  ;;  %vm7146_vm11 = vcmask 687728   ;;  %v4370_v51 = vld [vmem:[%s6198_s15 + $0x3c] sm:$0x3] }
 0x475   : >> { %2684 = vrot.lane.b32.xlu0 %v4366_v26, %s7292_s25  ;;  %s7298_s25 = smov 126  }
 0x476   : >> { %v2257_v32 = vpop.permute.xlu1 %2256 }
 0x477   : >> { %v2200_v8 = vpop.permute.xlu0 %2199  ;;  %2263 = vst.msk [vmem:[#allocation5] sm:$0xff] %vm7143_vm2, %v2257_v32  ;;  %vm7148_vm2 = vcmask 736928  }
 0x478   : >> { %2206 = vst.msk [vmem:[#allocation5 + $0x10] sm:$0x3] %vm7144_vm0, %v2200_v8  ;;  %2742 = vrot.lane.b32.xlu1 %v6385_v9, %s7297_s24  ;;  %vm7147_vm0 = vcmask 533984   ;;  %v4387_v9 = vld [vmem:[%s6198_s15 + $0x52] sm:$0xff] }
 0x479   : >> { %2696 = vrot.lane.b32.xlu0 %v4368_v27, %s7293_s14  ;;  %s7299_s14 = smov 108  }
 0x47a   : >> { %v2271_v56 = vpop.permute.xlu1 %2270 }
 0x47b   : >> { %v2214_v10 = vpop.permute.xlu0 %2213  ;;  %2277 = vst.msk [vmem:[#allocation5] sm:$0xff] %vm7146_vm11, %v2271_v56  ;;  %vm7149_vm11 = vcmask 583184  }
 0x47c   : >> { %2220 = vst.msk [vmem:[#allocation5 + $0x10] sm:$0x3] %vm7145_vm10, %v2214_v10  ;;  %2708 = vrot.lane.b32.xlu1 %v4370_v51, %s7294_s22  ;;  %vm7150_vm10 = vcmask 786128   ;;  %s7300_s22 = smov 114   ;;  %v4342_v51 = vld [vmem:[%s6198_s15 + $0x18] sm:$0x3] }
 0x47d   : >> { %2793 = vrot.lane.b32.xlu0 %v4385_v41, %s7298_s25 }
 0x47e   : >> { %v2285_v39 = vpop.permute.xlu1 %2284 }
 0x47f   : >> { %v2231_v0 = vpop.permute.xlu0 %2230  ;;  %2291 = vst.msk [vmem:[#allocation5] sm:$0xff] %vm7148_vm2, %v2285_v39  ;;  %vm7152_vm2 = vcmask 632384  }
 0x480   : >> { %2237 = vst.msk [vmem:[#allocation5 + $0x10] sm:$0x3] %vm7147_vm0, %v2231_v0  ;;  %2807 = vrot.lane.b32.xlu1 %v4387_v9, %s7151_s12  ;;  %vm7153_vm0 = vcmask 835328   ;;  %s7302_s12 = smov 120  }
 0x481   : >> { %2754 = vrot.lane.b32.xlu0 %v6395_v30, %s7299_s14  ;;  %v4389_v30 = vld [vmem:[%s6198_s15 + $0x53] sm:$0xff] }
 0x482   : >> { %v2302_v31 = vpop.permute.xlu1 %2301 }
 0x483   : >> { %v2245_v19 = vpop.permute.xlu0 %2244  ;;  %2308 = vst.msk [vmem:[#allocation5] sm:$0xff] %vm7150_vm10, %v2302_v31  ;;  %vm7154_vm10 = vcmask 681584  }
 0x484   : >> { %2251 = vst.msk [vmem:[#allocation5 + $0x10] sm:$0x3] %vm7149_vm11, %v2245_v19  ;;  %2766 = vrot.lane.b32.xlu1 %v6415_v14, %s7300_s22  ;;  %vm7155_vm11 = vcmask 884528   ;;  %v4391_v14 = vld [vmem:[%s6198_s15 + $0x54] sm:$0xff]  ;;  %s4400_s15 = sshll.u32 %s5055_s13, 3  ;;  %s2082_s13 = sadd.s32 1, %s5055_s13  }
 0x485   : >> { %2720 = vrot.lane.b32.xlu0 %v4372_v42, %s7295_s16  ;;  %s7301_s16 = smov 16   ;;  %p2079_p12 = scmp.ge.s32.totalorder %s2082_s13, 5  }
 0x486   : >> { %v2316_v43 = vpop.permute.xlu1 %2315  ;;  %s5112_s13 = smov (%p2079_p12), 16   ;;  %v3574_v54 = vld [vmem:[%s6994_s5 + $0x100] sm:$0xff] (%p2079_p12)  ;;  %v3575_v28 = vld [vmem:[%s6994_s5 + $0x108] sm:$0xff] (%p2079_p12)  ;;  %v5114_v57 = vmov (%p2079_p12), 0.0|0.0  }
 0x487   : >> { %v2259_v21 = vpop.permute.xlu0 %2258  ;;  %2322 = vst.msk [vmem:[#allocation5] sm:$0xff] %vm7153_vm0, %v2316_v43  ;;  %vm7157_vm0 = vcmask 730784   ;;  %v3558_v16 = vld [vmem:[%s6994_s5 + $0x80] sm:$0xff] (%p2079_p12)  ;;  %v4796_v58 = vpack.c.bf16 (%p2079_p12), %v3575_v28, %v3574_v54  ;;  %v3559_v36 = vld [vmem:[%s6994_s5 + $0x88] sm:$0xff] (%p2079_p12)  ;;  %v3584_v28 = vld [vmem:[%s6994_s5 + $0x150] sm:$0xff] (%p2079_p12) }
 0x488   : >> { %2265 = vst.msk [vmem:[#allocation5 + $0x10] sm:$0x3] %vm7152_vm2, %v2259_v21  ;;  %2732 = vrot.lane.b32.xlu1 %v4374_v18, %s7296_s29  ;;  %vm7156_vm2 = vcmask 933728   ;;  %s7303_s29 = smov 4   ;;  %v4763_v44 = vpack.c.bf16 (%p2079_p12), %v3559_v36, %v3558_v16  ;;  %v3542_v52 = vld [vmem:[%s6994_s5] sm:$0xff] (%p2079_p12)  ;;  %v3543_v59 = vld [vmem:[%s6994_s5 + $0x8] sm:$0xff] (%p2079_p12) }
 0x489   : >> { %2819 = vrot.lane.b32.xlu0 %v4389_v30, %s5106_s0  ;;  %v3585_v16 = vld [vmem:[%s6994_s5 + $0x158] sm:$0xff] (%p2079_p12)  ;;  %v3568_v36 = vld [vmem:[%s6994_s5 + $0xd0] sm:$0xff] (%p2079_p12) }
 0x48a   : >> { %v2330_v2 = vpop.permute.xlu1 %2329 }
 0x48b   : >> { %v2273_v47 = vpop.permute.xlu0 %2272  ;;  %2336 = vst.msk [vmem:[#allocation5] sm:$0xff] %vm7155_vm11, %v2330_v2  ;;  %vm7158_vm11 = vcmask 779984  }
 0x48c   : >> { %2279 = vst.msk [vmem:[#allocation5 + $0x10] sm:$0x3] %vm7154_vm10, %v2273_v47  ;;  %2831 = vrot.lane.b32.xlu1 %v4391_v14, %s7301_s16  ;;  %vm7159_vm10 = vcmask 982928  }
 0x48d   : >> { %2781 = vrot.lane.b32.xlu0 %v4383_v22, %s7302_s12 }
 0x48e   : >> { %v2344_v4 = vpop.permute.xlu1 %2343 }
 0x48f   : >> { %v2287_v50 = vpop.permute.xlu0 %2286  ;;  %2350 = vst.msk [vmem:[#allocation5] sm:$0xff] %vm7156_vm2, %v2344_v4  ;;  %vm7161_vm2 = vcmask 1032128  }
 0x490   : >> { %2293 = vst.msk [vmem:[#allocation5 + $0x10] sm:$0x3] %vm7157_vm0, %v2287_v50  ;;  %2795 = vrot.lane.b32.xlu1 %v4386_v25, %s7298_s25  ;;  %vm7162_vm0 = vcmask 829184   ;;  %s5113_s25 = smov (%p2079_p12), 32  }
 0x491   : >> { %2744 = vrot.lane.b32.xlu0 %v4376_v46, %s7297_s24 }
 0x492   : >> { %v2358_v33 = vpop.permute.xlu1 %2357 }
 0x493   : >> { %v2304_v34 = vpop.permute.xlu0 %2303  ;;  %2364 = vst.msk [vmem:[#allocation5] sm:$0xff] %vm7159_vm10, %v2358_v33  ;;  %vm2396_vm10 = vcmask 31744  }
 0x494   : >> { %2310 = vst.msk [vmem:[#allocation5 + $0x10] sm:$0x3] %vm7158_vm11, %v2304_v34  ;;  %2809 = vrot.lane.b32.xlu1 %v4388_v29, %s7303_s29  ;;  %vm7165_vm11 = vcmask 1048560   ;;  %s5115_s29 = smov (%p2079_p12), 48  }
 0x495   : >> { %2756 = vrot.lane.b32.xlu0 %v4378_v60, %s7299_s14 }
 0x496   : >> { %v2375_v20 = vpop.permute.xlu1 %2374 }
 0x497   : >> { %v2318_v61 = vpop.permute.xlu0 %2317  ;;  %2381 = vst.msk [vmem:[#allocation5] sm:$0xff] %vm7161_vm2, %v2375_v20  ;;  %vm2351_vm2 = vcmask 927584  }
 0x498   : >> { %2324 = vst.msk [vmem:[#allocation5 + $0x10] sm:$0x3] %vm7162_vm0, %v2318_v61  ;;  %2821 = vrot.lane.b32.xlu1 %v4390_v5, %s5106_s0  ;;  %vm7169_vm0 = vcmask 976784   ;;  %s5117_s0 = smov (%p2079_p12), 80  }
 0x499   : >> { %2768 = vrot.lane.b32.xlu0 %v4380_v12, %s7300_s22 }
 0x49a   : >> { %v2389_v49 = vpop.permute.xlu1 %2388 }
 0x49b   : >> { %v2332_v63 = vpop.permute.xlu0 %2331  ;;  %2395 = vst.msk [vmem:[#allocation5] sm:$0xff] %vm7165_vm11, %v2389_v49  ;;  %vm7167_vm11 = vcmask 1042416  }
 0x49c   : >> { %2397 = vst.msk [vmem:[#allocation5 + $0x8] sm:$0xff] %vm2396_vm10, %v2389_v49  ;;  %2833 = vrot.lane.b32.xlu1 %v4392_v62, %s7301_s16  ;;  %s4426_s16 = sshll.u32 (%p2079_p12), %s5203_s21, 4  ;;  %s5121_s21 = smov (%p2079_p12), [#allocation7]  }
 0x49d   : >> { %2338 = vst.msk [vmem:[#allocation5 + $0x10] sm:$0x3] %vm2337_vm3, %v2332_v63  ;;  %2783 = vrot.lane.b32.xlu0 %v4384_v23, %s7302_s12  ;;  %s3081_s12 = scalar_lea.vmem [#allocation3], %s4400_s15  ;;  %s5116_s15 = smov (%p2079_p12), 64  }
 0x49e   : >> { %v2360_v37 = vpop.permute.xlu1 %2359  ;;  %s4981_s14 = sshll.u32 (%p2079_p12), %s5121_s21, 4  ;;  %s4982_s14 = int_to_ptr.vmem [resolvable:$false] %s4981_s14 }
 0x49f   : >> { %v2346_v26 = vpop.permute.xlu0 %2345  ;;  %s4983_s1 = scalar_lea.vmem (%p2079_p12), %s4982_s14, 32 }
 0x4a0   : >> { %2352 = vst.msk [vmem:[#allocation5 + $0x10] sm:$0x3] %vm2351_vm2, %v2346_v26 }
 0x4a1   : >> { %2366 = vst.msk [vmem:[#allocation5 + $0x10] sm:$0x3] %vm7169_vm0, %v2360_v37  ;;  %vm7317_vm0 = vcmask 687728  }
 0x4a2   : >> { %v2391_v38 = vpop.permute.xlu1 %2390  ;;  %v2444_v27 = vld [vmem:[#allocation5] sm:$0xff] }
 0x4a3   : >> { %v2377_v11 = vpop.permute.xlu0 %2376  ;;  %2401 = vst.msk [vmem:[#allocation5 + $0x18] sm:$0x3] %vm2400_vm15, %v2391_v38 }
 0x4a4   : >> { %2383 = vst.msk [vmem:[#allocation5 + $0x10] sm:$0x3] %vm7168_vm4, %v2377_v11  ;;  %vm7170_vm4 = vcmask 173184  }
 0x4a5   : >> { %2544 = vst.msk [vmem:[#allocation5] sm:$0xff] %vm7281_vm1, %v6209_v35  ;;  %vm7311_vm1 = vcmask 490928  }
 0x4a6   : >> { %2399 = vst.msk [vmem:[#allocation5 + $0x10] sm:$0x3] %vm7167_vm11, %v2391_v38  ;;  %v2563_v32 = vpop.permute.xlu1 %2562  ;;  %vm2454_vm11 = vcmask 179200  }
 0x4a7   : >> { %v2551_v8 = vpop.permute.xlu0 %2550 }
 0x4a8   : >> { %2556 = vst.msk [vmem:[#allocation5] sm:$0xff] %vm2102_vm5, %v2551_v8  ;;  %vm7304_vm5 = vcmask 140384  }
 0x4a9   : >> { %2568 = vst.msk [vmem:[#allocation5] sm:$0xff] %vm2116_vm6, %v2563_v32  ;;  %vm2412_vm6 = vcmask 80928  }
 0x4aa   : >> { %v2587_v41 = vpop.permute.xlu1 %2586 }
 0x4ab   : >> { %v2575_v56 = vpop.permute.xlu0 %2574 }
 0x4ac   : >> { %2580 = vst.msk [vmem:[#allocation5] sm:$0xff] %vm2130_vm12, %v2575_v56  ;;  %vm7305_vm12 = vcmask 189584  }
 0x4ad   : >> { %v6547_v10 = vld [vmem:[#allocation5 + $0x10] sm:$0x3]  ;;  %2592 = vst.msk [vmem:[#allocation5] sm:$0xff] %vm2144_vm7, %v2587_v41  ;;  %vm7306_vm7 = vcmask 392528  }
 0x4ae   : >> { %2545 = vst.msk [vmem:[#allocation5 + $0x10] sm:$0x3] %vm2090_vm13, %v4342_v51  ;;  %v2599_v35 = vpop.permute.xlu1 %2598  ;;  %vm2426_vm13 = vcmask 130128  }
 0x4af   : >> { %v2553_v9 = vpop.permute.xlu0 %2552  ;;  %2604 = vst.msk [vmem:[#allocation5] sm:$0xff] %vm2161_vm8, %v2599_v35  ;;  %vm7307_vm8 = vcmask 441728  }
 0x4b0   : >> { %2557 = vst.msk [vmem:[#allocation5 + $0x10] sm:$0x3] %vm2104_vm14, %v2553_v9  ;;  %vm7308_vm14 = vcmask 238784  }
 0x4b2   : >> { %v2611_v39 = vpop.permute.xlu1 %2610 }
 0x4b3   : >> { %v2565_v0 = vpop.permute.xlu0 %2564  ;;  %2616 = vst.msk [vmem:[#allocation5] sm:$0xff] %vm2175_vm9, %v2611_v39  ;;  %vm2440_vm9 = vcmask 179328  }
 0x4b4   : >> { %2569 = vst.msk [vmem:[#allocation5 + $0x10] sm:$0x3] %vm7304_vm5, %v2565_v0  ;;  %vm7309_vm5 = vcmask 287984  }
 0x4b6   : >> { %v2577_v42 = vpop.permute.xlu1 %2576 }
 0x4b7   : >> { %v2407_v31 = vpop.permute.xlu0 %2406  ;;  %2581 = vst.msk [vmem:[#allocation5 + $0x10] sm:$0x3] %vm7305_vm12, %v2577_v42  ;;  %vm7310_vm12 = vcmask 337184  }
 0x4b8   : >> { %2413 = vst.msk [vmem:[#allocation5 + $0x8] sm:$0xff] %vm2412_vm6, %v2407_v31 }
 0x4ba   : >> { %v2421_v19 = vpop.permute.xlu1 %2420 }
 0x4bb   : >> { %v2623_v18 = vpop.permute.xlu0 %2622  ;;  %2427 = vst.msk [vmem:[#allocation5 + $0x8] sm:$0xff] %vm2426_vm13, %v2421_v19 }
 0x4bc   : >> { %2628 = vst.msk [vmem:[#allocation5] sm:$0xff] %vm7306_vm7, %v2623_v18  ;;  %vm2414_vm7 = vcmask 74784  }
 0x4be   : >> { %v2635_v30 = vpop.permute.xlu1 %2634 }
 0x4bf   : >> { %v2589_v43 = vpop.permute.xlu0 %2588  ;;  %2640 = vst.msk [vmem:[#allocation5] sm:$0xff] %vm7307_vm8, %v2635_v30  ;;  %vm7312_vm8 = vcmask 540128  }
 0x4c0   : >> { %2593 = vst.msk [vmem:[#allocation5 + $0x10] sm:$0x3] %vm7308_vm14, %v2589_v43  ;;  %vm7313_vm14 = vcmask 589328  }
 0x4c2   : >> { %v2601_v21 = vpop.permute.xlu1 %2600 }
 0x4c3   : >> { %v2435_v14 = vpop.permute.xlu0 %2434  ;;  %2605 = vst.msk [vmem:[#allocation5 + $0x10] sm:$0x3] %vm7309_vm5, %v2601_v21  ;;  %vm7314_vm5 = vcmask 386384  }
 0x4c4   : >> { %2441 = vst.msk [vmem:[#allocation5 + $0x8] sm:$0xff] %vm2440_vm9, %v2435_v14 }
 0x4c6   : >> { %v2613_v22 = vpop.permute.xlu1 %2612 }
 0x4c7   : >> { %v2647_v2 = vpop.permute.xlu0 %2646  ;;  %2617 = vst.msk [vmem:[#allocation5 + $0x10] sm:$0x3] %vm7310_vm12, %v2613_v22  ;;  %vm7171_vm12 = vcmask 123984  }
 0x4c8   : >> { %2652 = vst.msk [vmem:[#allocation5] sm:$0xff] %vm7311_vm1, %v2647_v2  ;;  %vm7315_vm1 = vcmask 435584  }
 0x4ca   : >> { %v2409_v47 = vpop.permute.xlu1 %2408 }
 0x4cb   : >> { %v2659_v25 = vpop.permute.xlu0 %2658  ;;  %v2445_v46 = vld [vmem:[#allocation5 + $0x8] sm:$0xff]  ;;  %2415 = vst.msk [vmem:[#allocation5 + $0x18] sm:$0x3] %vm2414_vm7, %v2409_v47 }
 0x4cc   : >> { %2664 = vst.msk [vmem:[#allocation5] sm:$0xff] %vm7312_vm8, %v2659_v25  ;;  %4339 = vmatprep.mubr.msk.f32.mxu0 %vm2454_vm11, %v2445_v46  ;;  %vm7316_vm8 = vcmask 638528  }
 0x4cd   : >> { %2530 = vmatmul.mubr.f32.vlgmr.msra.gmra.mrb[0].mxu0 %v2444_v27 }
 0x4ce   : >> { %v2671_v4 = vpop.permute.xlu1 %2670 }
 0x4cf   : >> { %v2625_v50 = vpop.permute.xlu0 %2624  ;;  %2676 = vst.msk [vmem:[#allocation5] sm:$0xff] %vm7313_vm14, %v2671_v4  ;;  %vm7318_vm14 = vcmask 484784  }
 0x4d0   : >> { %2629 = vst.msk [vmem:[#allocation5 + $0x10] sm:$0x3] %vm7314_vm5, %v2625_v50  ;;  %vm7319_vm5 = vcmask 736928  }
 0x4d2   : >> { %v2637_v29 = vpop.permute.xlu1 %2636 }
 0x4d3   : >> { %v2423_v60 = vpop.permute.xlu0 %2422  ;;  %2641 = vst.msk [vmem:[#allocation5 + $0x10] sm:$0x3] %vm7315_vm1, %v2637_v29  ;;  %vm7320_vm1 = vcmask 533984  }
 0x4d4   : >> { %2429 = vst.msk [vmem:[#allocation5 + $0x18] sm:$0x3] %vm7171_vm12, %v2423_v60  ;;  %vm7327_vm12 = vcmask 730784  }
 0x4d6   : >> { %v2437_v33 = vpop.permute.xlu1 %2436 }
 0x4d7   : >> { %v2683_v34 = vpop.permute.xlu0 %2682  ;;  %2443 = vst.msk [vmem:[#allocation5 + $0x18] sm:$0x3] %vm7170_vm4, %v2437_v33  ;;  %vm7322_vm4 = vcmask 583184  }
 0x4d8   : >> { %2688 = vst.msk [vmem:[#allocation5] sm:$0xff] %vm7316_vm8, %v2683_v34  ;;  %vm7321_vm8 = vcmask 786128  }
 0x4da   : >> { %v2695_v5 = vpop.permute.xlu1 %2694 }
 0x4db   : >> { %v2649_v12 = vpop.permute.xlu0 %2648  ;;  %2700 = vst.msk [vmem:[#allocation5] sm:$0xff] %vm7317_vm0, %v2695_v5  ;;  %vm7323_vm0 = vcmask 835328  }
 0x4dc   : >> { %2653 = vst.msk [vmem:[#allocation5 + $0x10] sm:$0x3] %vm7318_vm14, %v2649_v12  ;;  %vm7324_vm14 = vcmask 632384  }
 0x4de   : >> { %v2707_v20 = vpop.permute.xlu1 %2706  ;;  %v2447_v62 = vld [vmem:[#allocation5 + $0x18] sm:$0x3] }
 0x4df   : >> { %v2661_v61 = vpop.permute.xlu0 %2660  ;;  %2712 = vst.msk [vmem:[#allocation5] sm:$0xff] %vm7319_vm5, %v2707_v20  ;;  %4340 = vmatprep.mubr.msk.f32.mxu0 %vm2454_vm11, %v2447_v62  ;;  %vm7325_vm5 = vcmask 884528  }
 0x4e0   : >> { %2665 = vst.msk [vmem:[#allocation5 + $0x10] sm:$0x3] %vm7320_vm1, %v2661_v61  ;;  %2535 = vmatmul.mubr.f32.gmra.mrb[2].mxu0 %v6547_v10  ;;  %vm7326_vm1 = vcmask 681584  }
 0x4e2   : >> { %v2719_v23 = vpop.permute.xlu1 %2718 }
 0x4e3   : >> { %v2673_v49 = vpop.permute.xlu0 %2672  ;;  %2724 = vst.msk [vmem:[#allocation5] sm:$0xff] %vm7321_vm8, %v2719_v23  ;;  %vm7329_vm8 = vcmask 982928  }
 0x4e4   : >> { %2677 = vst.msk [vmem:[#allocation5 + $0x10] sm:$0x3] %vm7322_vm4, %v2673_v49  ;;  %vm7328_vm4 = vcmask 933728  }
 0x4e6   : >> { %v2731_v63 = vpop.permute.xlu1 %2730 }
 0x4e7   : >> { %v2685_v37 = vpop.permute.xlu0 %2684  ;;  %2736 = vst.msk [vmem:[#allocation5] sm:$0xff] %vm7323_vm0, %v2731_v63  ;;  %vm7330_vm0 = vcmask 779984  }
 0x4e8   : >> { %2689 = vst.msk [vmem:[#allocation5 + $0x10] sm:$0x3] %vm7324_vm14, %v2685_v37  ;;  %vm7331_vm14 = vcmask 829184  }
 0x4ea   : >> { %v2743_v26 = vpop.permute.xlu1 %2742 }
 0x4eb   : >> { %v2697_v38 = vpop.permute.xlu0 %2696  ;;  %2748 = vst.msk [vmem:[#allocation5] sm:$0xff] %vm7325_vm5, %v2743_v26  ;;  %v7339_v26 = vld [vmem:[#allocation17_spill] sm:$0xff] }
 0x4ec   : >> { %2701 = vst.msk [vmem:[#allocation5 + $0x10] sm:$0x3] %vm7326_vm1, %v2697_v38  ;;  %vm2928_vm1 = vcmask 80896  }
 0x4ee   : >> { %v2709_v11 = vpop.permute.xlu1 %2708 }
 0x4ef   : >> { %v2794_v27 = vpop.permute.xlu0 %2793  ;;  %2713 = vst.msk [vmem:[#allocation5 + $0x10] sm:$0x3] %vm7327_vm12, %v2709_v11  ;;  %vm7338_vm12 = vcmask 1042416  }
 0x4f0   : >> { %2800 = vst.msk [vmem:[#allocation5 + $0x8] sm:$0xff] %vm2396_vm10, %v2794_v27  ;;  %vm7332_vm10 = vcmask 1032128  }
 0x4f2   : >> { %v2808_v32 = vpop.permute.xlu1 %2807 }
 0x4f3   : >> { %v2755_v8 = vpop.permute.xlu0 %2754  ;;  %2813 = vst.msk [vmem:[#allocation5 + $0x8] sm:$0xff] %vm2412_vm6, %v2808_v32  ;;  %vm7333_vm6 = vcmask 1048560  }
 0x4f4   : >> { %2760 = vst.msk [vmem:[#allocation5] sm:$0xff] %vm7328_vm4, %v2755_v8  ;;  %vm3082_vm4 = vcmask 126976  }
 0x4f6   : >> { %v2767_v51 = vpop.permute.xlu1 %2766 }
 0x4f7   : >> { %v2721_v41 = vpop.permute.xlu0 %2720  ;;  %2772 = vst.msk [vmem:[#allocation5] sm:$0xff] %vm7329_vm8, %v2767_v51  ;;  %v5111_v51 = vmov (%p2079_p12), 1966171168  }
 0x4f8   : >> { %2725 = vst.msk [vmem:[#allocation5 + $0x10] sm:$0x3] %vm7330_vm0, %v2721_v41  ;;  %v3100_v41 = vunpack.c.l.s4 (%p2079_p12), %v5111_v51  ;;  %v3564_v51 = vld [vmem:[%s6994_s5 + $0xb0] sm:$0xff] (%p2079_p12) }
 0x4fa   : >> { %v2733_v56 = vpop.permute.xlu1 %2732 }
 0x4fb   : >> { %v2820_v10 = vpop.permute.xlu0 %2819  ;;  %2737 = vst.msk [vmem:[#allocation5 + $0x10] sm:$0x3] %vm7331_vm14, %v2733_v56 }
 0x4fc   : >> { %2825 = vst.msk [vmem:[#allocation5 + $0x8] sm:$0xff] %vm2426_vm13, %v2820_v10  ;;  %vm7334_vm13 = vcmask 123984   ;;  %v3101_v10 = vunpack.c.0.s8 (%p2079_p12), %v3100_v41  ;;  %v3565_v41 = vld [vmem:[%s6994_s5 + $0xb8] sm:$0xff] (%p2079_p12) }
 0x4fe   : >> { %v2832_v35 = vpop.permute.xlu1 %2831 }
 0x4ff   : >> { %v2782_v9 = vpop.permute.xlu0 %2781  ;;  %2837 = vst.msk [vmem:[#allocation5 + $0x8] sm:$0xff] %vm2440_vm9, %v2832_v35  ;;  %vm7335_vm9 = vcmask 976784  }
 0x500   : >> { %2787 = vst.msk [vmem:[#allocation5] sm:$0xff] %vm7332_vm10, %v2782_v9  ;;  %v7340_v9 = vld [vmem:[#allocation15_spill] sm:$0xff] (%p2079_p12) }
 0x501   : >> { %2799 = vst.msk [vmem:[#allocation5] sm:$0xff] %vm7333_vm6, %v2794_v27 }
 0x502   : >> { %v2796_v39 = vpop.permute.xlu1 %2795 }
 0x503   : >> { %v2745_v0 = vpop.permute.xlu0 %2744  ;;  %2802 = vst.msk [vmem:[#allocation5 + $0x18] sm:$0x3] %vm2400_vm15, %v2796_v39  ;;  %vm7337_vm15 = vcmask 1025984  }
 0x504   : >> { %2749 = vst.msk [vmem:[#allocation5 + $0x10] sm:$0x3] %vm2337_vm3, %v2745_v0  ;;  %vm7336_vm3 = vcmask 173184  }
 0x506   : >> { %v2810_v42 = vpop.permute.xlu1 %2809  ;;  %v2840_v19 = vld [vmem:[#allocation5 + $0x8] sm:$0xff] }
 0x507   : >> { %v2757_v31 = vpop.permute.xlu0 %2756  ;;  %2814 = vst.msk [vmem:[#allocation5 + $0x18] sm:$0x3] %vm2414_vm7, %v2810_v42  ;;  %4394 = vmatprep.mubr.msk.f32.mxu1 %vm2454_vm11, %v2840_v19  ;;  %vm5110_vm7 = vmmov 1   ;;  %v7341_v42 = vlaneseq (%p2079_p12) }
 0x508   : >> { %2761 = vst.msk [vmem:[#allocation5 + $0x10] sm:$0x3] %vm2351_vm2, %v2757_v31  ;;  %v2839_v18 = vld [vmem:[#allocation5] sm:$0xff]  ;;  %vm5109_vm2 = vmmov 0   ;;  %v3548_v31 = vld [vmem:[%s6994_s5 + $0x30] sm:$0xff] (%p2079_p12) }
 0x509   : >> { %2914 = vmatmul.mubr.f32.vlgmr.msra.gmra.mrb[0].mxu1 %v2839_v18  ;;  %4593 = vmatprep.mubr.msk.f32.mxu0 %vm5109_vm2, %v5107_v17  ;;  %vm6625_vm8 = vcmp.lt.s32.totalorder (%p2079_p12), %v7341_v42, 16  ;;  %vm3109_vm0 = vcmp.ge.s32.totalorder (%p2079_p12), %v7341_v42, 16  ;;  %vm3110_vm14 = vcmp.lt.s32.totalorder (%p2079_p12), %v7341_v42, 32  ;;  %vm3132_vm6 = vcmp.ge.s32.totalorder (%p2079_p12), %v7341_v42, 32 }
 0x50a   : >> { %v2822_v30 = vpop.permute.xlu1 %2821  ;;  %vm3111_vm10 = vmand (%p2079_p12), %vm3109_vm0, %vm3110_vm14  ;;  %vm3226_vm0 = vcmp.lt.s32.totalorder (%p2079_p12), %v7341_v42, 112 }
 0x50b   : >> { %v2769_v43 = vpop.permute.xlu0 %2768  ;;  %2826 = vst.msk [vmem:[#allocation5 + $0x18] sm:$0x3] %vm7334_vm13, %v2822_v30  ;;  %vm3133_vm13 = vcmp.lt.s32.totalorder (%p2079_p12), %v7341_v42, 48 }
 0x50c   : >> { %2773 = vst.msk [vmem:[#allocation5 + $0x10] sm:$0x3] %vm7335_vm9, %v2769_v43  ;;  %vm3134_vm9 = vmand (%p2079_p12), %vm3132_vm6, %vm3133_vm13  ;;  %vm3249_vm6 = vcmp.lt.s32.totalorder (%p2079_p12), %v7341_v42, 128 }
 0x50e   : >> { %v2834_v21 = vpop.permute.xlu1 %2833 }
 0x50f   : >> { %v2784_v14 = vpop.permute.xlu0 %2783  ;;  %2838 = vst.msk [vmem:[#allocation5 + $0x18] sm:$0x3] %vm7336_vm3, %v2834_v21  ;;  %vm3155_vm3 = vcmp.ge.s32.totalorder (%p2079_p12), %v7341_v42, 48 }
 0x510   : >> { %2788 = vst.msk [vmem:[#allocation5 + $0x10] sm:$0x3] %vm7337_vm15, %v2784_v14  ;;  %vm3156_vm15 = vcmp.lt.s32.totalorder (%p2079_p12), %v7341_v42, 64 }
 0x511   : >> { %2801 = vst.msk [vmem:[#allocation5 + $0x10] sm:$0x3] %vm7338_vm12, %v2796_v39  ;;  %v6622_v39 = vsub.s32 (%p2079_p12), %v3101_v10, %v7340_v9  ;;  %vm3157_vm12 = vmand (%p2079_p12), %vm3155_vm3, %vm3156_vm15  ;;  %vm5120_vm3 = vmmov (%p2079_p12), 0   ;;  %vm3773_vm15 = vcmask (%p2079_p12), 982016  }
 0x516   : >> { %v2842_v22 = vld [vmem:[#allocation5 + $0x18] sm:$0x3] }
 0x517   : >> { %4395 = vmatprep.mubr.msk.f32.mxu1 %vm2454_vm11, %v2842_v22  ;;  %vm2932_vm11 = vcmask 1041408   ;;  %v4765_v22 = vpack.c.bf16 (%p2079_p12), %v3543_v59, %v3542_v52 }
 0x518   : >> { %v2841_v2 = vld [vmem:[#allocation5 + $0x10] sm:$0x3]  ;;  %vm4757_vm5 = vmpackc.low %vm2932_vm11, %vm5110_vm7  ;;  %vm3179_vm11 = vcmp.lt.s32.totalorder (%p2079_p12), %v7341_v42, 80 }
 0x519   : >> { %2919 = vmatmul.mubr.f32.gmra.mrb[2].mxu1 %v2841_v2  ;;  %v3576_v2 = vld [vmem:[%s6994_s5 + $0x110] sm:$0xff] (%p2079_p12) }
 0x51a   : >> { %4600 = vmatprep.mubr.msk.f32.mxu1 %vm5109_vm2, %v5107_v17  ;;  %vm3178_vm2 = vcmp.ge.s32.totalorder (%p2079_p12), %v7341_v42, 64 }
 0x51b   : > { %vm3180_vm7 = vmand (%p2079_p12), %vm3178_vm2, %vm3179_vm11  ;;  %vm3860_vm2 = vcmask (%p2079_p12), 687104   ;;  %vm3938_vm11 = vcmask (%p2079_p12), 73728  }
 0x5a0   : >> { %v2531_v47 = vpop.f32.mrb[0].mxu0 }
 0x5a1   : >> { %v2533_v25 = vpop.f32.mrb[1].mxu0  ;;  %v2532_v50 = vadd.f32 %v6190_v1, %v2531_v47  ;;  %v3577_v47 = vld [vmem:[%s6994_s5 + $0x118] sm:$0xff] (%p2079_p12) }
 0x5a3   : >> { %v2540_v34 = vmax.f32 %v2532_v50, 0.0  ;;  %v3561_v50 = vld [vmem:[%s6994_s5 + $0x98] sm:$0xff] (%p2079_p12) }
 0x5b3   : >> { %v2536_v46 = vpop.f32.mrb[2].mxu0 }
 0x5b4   : >> { %v2538_v4 = vpop.f32.mrb[3].mxu0  ;;  %v2537_v20 = vadd.f32 %v6190_v1, %v2536_v46  ;;  %v4799_v46 = vpack.c.bf16 (%p2079_p12), %v3577_v47, %v3576_v2  ;;  %v3586_v47 = vld [vmem:[%s6994_s5 + $0x160] sm:$0xff] (%p2079_p12) }
 0x5b5   : > { %v3560_v4 = vld [vmem:[%s6994_s5 + $0x90] sm:$0xff] (%p2079_p12) }
 0x5b6   : >> { %v2541_v23 = vmax.f32 %v2537_v20, 0.0 }
 0x5dc   : >> { %v2915_v29 = vpop.f32.mrb[0].mxu1 }
 0x5dd   : >> { %v2916_v60 = vadd.f32 %v6190_v1, %v2915_v29  ;;  %v2917_v33 = vpop.f32.mrb[1].mxu1  ;;  %v4767_v29 = vpack.c.bf16 (%p2079_p12), %v3561_v50, %v3560_v4 }
 0x5df   : >> { %v2924_v5 = vmax.f32 %v2916_v60, 0.0  ;;  %v3544_v60 = vld [vmem:[%s6994_s5 + $0x10] sm:$0xff] (%p2079_p12) }
 0x5e1   : >> { %v2926_v12 = vmax.f32 %v2540_v34, %v2924_v5  ;;  %v3545_v34 = vld [vmem:[%s6994_s5 + $0x18] sm:$0xff] (%p2079_p12) }
 0x5ec   : >> { %v2920_v61 = vpop.f32.mrb[2].mxu1 }
 0x5ed   : >> { %v2921_v62 = vadd.f32 %v6190_v1, %v2920_v61  ;;  %v2922_v17 = vpop.f32.mrb[3].mxu1  ;;  %v4769_v61 = vpack.c.bf16 (%p2079_p12), %v3545_v34, %v3544_v60  ;;  %v3571_v60 = vld [vmem:[%s6994_s5 + $0xe8] sm:$0xff] (%p2079_p12) }
 0x5ee   : > { %v3579_v17 = vld [vmem:[%s6994_s5 + $0x128] sm:$0xff] (%p2079_p12) }
 0x5ef   : >> { %v2925_v49 = vmax.f32 %v2921_v62, 0.0  ;;  %v3578_v62 = vld [vmem:[%s6994_s5 + $0x120] sm:$0xff] (%p2079_p12) }
 0x5f1   : >> { %v2927_v63 = vmax.f32 %v2541_v23, %v2925_v49  ;;  %v4802_v23 = vpack.c.bf16 (%p2079_p12), %v3579_v17, %v3578_v62  ;;  %v3562_v49 = vld [vmem:[%s6994_s5 + $0xa0] sm:$0xff] (%p2079_p12)  ;;  %v3588_v62 = vld [vmem:[%s6994_s5 + $0x170] sm:$0xff] (%p2079_p12)  ;;  %v3589_v17 = vld [vmem:[%s6994_s5 + $0x178] sm:$0xff] (%p2079_p12) }
 0x5f3   : >> { %v4756_v37 = vpack.c.bf16 %v2927_v63, %v2926_v12  ;;  %v3563_v63 = vld [vmem:[%s6994_s5 + $0xa8] sm:$0xff] (%p2079_p12) }
 0x5f5   : >> { %4758 = vmatpush3.bf16.msk.msra.mxu0 %vm4757_vm5, %v4756_v37  ;;  %4762 = vmatpush3.bf16.msk.msra.mxu1 %vm4757_vm5, %v4756_v37  ;;  %v3546_v37 = vld [vmem:[%s6994_s5 + $0x20] sm:$0xff] (%p2079_p12)  ;;  %vm3202_vm5 = vcmp.ge.s32.totalorder (%p2079_p12), %v7341_v42, 80 }
 0x5f6   : > { %4795 = vmatprep.subr.bf16.mxu1 (%p2079_p12), %v5114_v57  ;;  %4764 = vmatprep.subr.bf16.mxu0 (%p2079_p12), %v4763_v44  ;;  %v3569_v44 = vld [vmem:[%s6994_s5 + $0xd8] sm:$0xff] (%p2079_p12) }
 0x5f8   : >> { %4594 = vmatmul.mubr.msk.f32.vlgmr.msra.gmra.mrb[4].mxu0 %vm2928_vm1, %v5269_v13  ;;  %4601 = vmatmul.mubr.msk.f32.vlgmr.msra.gmra.mrb[4].mxu1 %vm2928_vm1, %v7339_v26  ;;  %v4771_v26 = vpack.c.bf16 (%p2079_p12), %v3563_v63, %v3562_v49  ;;  %v3573_v49 = vld [vmem:[%s6994_s5 + $0xf8] sm:$0xff] (%p2079_p12)  ;;  %vm3203_vm1 = vcmp.lt.s32.totalorder (%p2079_p12), %v7341_v42, 96 }
 0x5f9   : > { %4797 = vmatpush1.bf16.msra.mxu1 (%p2079_p12), %v4796_v58  ;;  %4766 = vmatpush3.bf16.msra.mxu0 (%p2079_p12), %v4765_v22  ;;  %v4811_v58 = vpack.c.bf16 (%p2079_p12), %v3585_v16, %v3584_v28  ;;  %v3553_v22 = vld [vmem:[%s6994_s5 + $0x58] sm:$0xff] (%p2079_p12) }
 0x5fa   : > { %4798 = vmatprep.subr.bf16.mxu1 (%p2079_p12), %v5114_v57  ;;  %4768 = vmatprep.subr.bf16.mxu0 (%p2079_p12), %v4767_v29  ;;  %v3570_v29 = vld [vmem:[%s6994_s5 + $0xe0] sm:$0xff] (%p2079_p12) }
 0x5fd   : > { %4800 = vmatpush1.bf16.msra.mxu1 (%p2079_p12), %v4799_v46  ;;  %4770 = vmatpush3.bf16.msra.mxu0 (%p2079_p12), %v4769_v61  ;;  %v3555_v61 = vld [vmem:[%s6994_s5 + $0x68] sm:$0xff] (%p2079_p12) }
 0x5fe   : > { %4801 = vmatprep.subr.bf16.mxu1 (%p2079_p12), %v5114_v57  ;;  %4772 = vmatprep.subr.bf16.mxu0 (%p2079_p12), %v4771_v26 }
 0x601   : > { %4803 = vmatpush1.bf16.msra.mxu1 (%p2079_p12), %v4802_v23  ;;  %v3572_v23 = vld [vmem:[%s6994_s5 + $0xf0] sm:$0xff] (%p2079_p12) }
 0x602   : > { %4804 = vmatprep.subr.bf16.mxu1 (%p2079_p12), %v5114_v57  ;;  %v4791_v26 = vpack.c.bf16 (%p2079_p12), %v3573_v49, %v3572_v23  ;;  %v3769_v23 = vld [vmem:[%s6996_s7 + $0x60] sm:$0xff] (%p2079_p12)  ;;  %v3770_v49 = vld [vmem:[%s6996_s7 + $0x68] sm:$0xff] (%p2079_p12) }
 0x6c8   : > { %2081 = sbr.rel (!%p2079_p12) target bundleno = 985 (0x3d9), region = 142 }
 0x6cb   : >> { %v3002_v38 = vpop.f32.mrb[4].mxu0  ;;  %v3075_v11 = vpop.f32.mrb[4].mxu1 }
 0x6cc   : >> { %v3079_v27 = vmax.f32 %v3002_v38, %v3075_v11  ;;  %v4595_v32 = vpop.f32.mrb[5].mxu0  ;;  %v4602_v8 = vpop.f32.mrb[5].mxu1  ;;  %v3547_v38 = vld [vmem:[%s6994_s5 + $0x28] sm:$0xff] (%p2079_p12)  ;;  %v3580_v11 = vld [vmem:[%s6994_s5 + $0x130] sm:$0xff] (%p2079_p12) }
 0x6cd   : > { %v4773_v32 = vpack.c.bf16 (%p2079_p12), %v3547_v38, %v3546_v37  ;;  %v4817_v37 = vpack.c.bf16 (%p2079_p12), %v3589_v17, %v3588_v62  ;;  %v3556_v38 = vld [vmem:[%s6994_s5 + $0x70] sm:$0xff] (%p2079_p12)  ;;  %v3768_v62 = vld [vmem:[%s6996_s7 + $0x58] sm:$0xff] (%p2079_p12) }
 0x6ce   : >> { %3083 = vst.msk [vmem:[%s3081_s12] sm:$0x1f] %vm3082_vm4, %v3079_v27  ;;  %v3581_v27 = vld [vmem:[%s6994_s5 + $0x138] sm:$0xff] (%p2079_p12)  ;;  %vm3204_vm4 = vmand (%p2079_p12), %vm3202_vm5, %vm3203_vm1 }
 0x6cf   : > { %v4805_v8 = vpack.c.bf16 %v3581_v27, %v3580_v11  ;;  %4774 = vmatpush3.bf16.msra.mxu0 %v4773_v32  ;;  %v3557_v11 = vld [vmem:[%s6994_s5 + $0x78] sm:$0xff] }
 0x6d1   : > { %4806 = vmatpush1.bf16.msra.mxu1 %v4805_v8  ;;  %v3590_v8 = vld [vmem:[%s6994_s5 + $0x180] sm:$0xff] }
 0x6d2   : > { %4807 = vmatprep.subr.bf16.mxu1 %v5114_v57 }
 0x6d5   : > { %v4401_v56 = vld.sshfl [vmem:[#allocation3 + $0x1] sm:$0x1 pattern:$0x75316420]  ;;  %v3539_v18 = vld [vmem:[#allocation3 + $0x24] sm:$0x1] }
 0x6d6   : > { %v4415_v35 = vld.sshfl [vmem:[#allocation3 + $0x1a] sm:$0x1 pattern:$0x75316420]  ;;  %v3105_v30 = vrot.slane %v4401_v56, %v6622_v39  ;;  %v3084_v13 = vld [vmem:[#allocation3] sm:$0x1] }
 0x6d7   : > { %v4408_v0 = vld.sshfl [vmem:[#allocation3 + $0xc] sm:$0x1 pattern:$0x75316420]  ;;  %v3413_v43 = vrot.slane %v4415_v35, %v6622_v39  ;;  %3540 = vst.msk [vmem:[#allocation6 + $0x3] sm:$0x1] %vm6625_vm8, %v3539_v18 }
 0x6d8   : > { %v4402_v19 = vld.sshfl [vmem:[#allocation3 + $0x2] sm:$0x1 pattern:$0x75316420]  ;;  %3089 = vst.msk [vmem:[#allocation6] sm:$0x1] %vm6625_vm8, %v3084_v13  ;;  %3106 = vrot.lane.b32.xlu0 %v3105_v30, %s5112_s13  ;;  %v3269_v6 = vrot.slane %v4408_v0, %v6622_v39  ;;  %v4775_v0 = vpack.c.bf16 %v3565_v41, %v3564_v51 }
 0x6d9   : > { %v3396_v15 = vld [vmem:[#allocation3 + $0x19] sm:$0x1]  ;;  %3414 = vrot.lane.b32.xlu1 %v3413_v43, %s5112_s13  ;;  %v3128_v40 = vrot.slane %v4402_v19, %v6622_v39  ;;  %v4409_v45 = vld.sshfl [vmem:[#allocation3 + $0x10] sm:$0x1 pattern:$0x75316420] }
 0x6da   : > { %3397 = vst.msk [vmem:[#allocation6 + $0x2] sm:$0x1] %vm6625_vm8, %v3396_v15  ;;  %v3252_v48 = vld [vmem:[#allocation3 + $0xb] sm:$0x1]  ;;  %v3290_v55 = vrot.slane %v4409_v45, %v6622_v39  ;;  %v3549_v19 = vld [vmem:[%s6994_s5 + $0x38] sm:$0xff]  ;;  %v3582_v30 = vld [vmem:[%s6994_s5 + $0x140] sm:$0xff]  ;;  %4776 = vmatprep.subr.bf16.mxu0 %v4775_v0 }
 0x6db   : > { %v4416_v53 = vld.sshfl [vmem:[#allocation3 + $0x1b] sm:$0x1 pattern:$0x75316420]  ;;  %3253 = vst.msk [vmem:[#allocation6 + $0x1] sm:$0x1] %vm6625_vm8, %v3252_v48  ;;  %v4777_v13 = vpack.c.bf16 %v3549_v19, %v3548_v31 }
 0x6dc   : > { %3270 = vrot.lane.b32.xlu0 %v3269_v6, %s5112_s13  ;;  %v3433_v7 = vrot.slane %v4416_v53, %v6622_v39  ;;  %v4403_v24 = vld.sshfl [vmem:[#allocation3 + $0x3] sm:$0x1 pattern:$0x75316420]  ;;  %v3583_v43 = vld [vmem:[%s6994_s5 + $0x148] sm:$0xff]  ;;  %vm3225_vm8 = vcmp.ge.s32.totalorder %v7341_v42, 96 }
 0x6dd   : > { %3129 = vrot.lane.b32.xlu1 %v3128_v40, %s5113_s25  ;;  %v4410_v3 = vld.sshfl [vmem:[#allocation3 + $0x11] sm:$0x1 pattern:$0x75316420]  ;;  %v3151_v1 = vrot.slane %v4403_v24, %v6622_v39  ;;  %v4808_v15 = vpack.c.bf16 %v3583_v43, %v3582_v30  ;;  %v3566_v6 = vld [vmem:[%s6994_s5 + $0xc0] sm:$0xff]  ;;  %v3567_v40 = vld [vmem:[%s6994_s5 + $0xc8] sm:$0xff]  ;;  %4778 = vmatpush3.bf16.msra.mxu0 %v4777_v13 }
 0x6de   : > { %v3310_v21 = vrot.slane %v4410_v3, %v6622_v39  ;;  %v4417_v14 = vld.sshfl [vmem:[#allocation3 + $0x1c] sm:$0x1 pattern:$0x75316420]  ;;  %v4779_v54 = vpack.c.bf16 %v3567_v40, %v3566_v6  ;;  %v3591_v51 = vld [vmem:[%s6994_s5 + $0x188] sm:$0xff]  ;;  %vm3227_vm14 = vmand %vm3225_vm8, %vm3226_vm0 }
 0x6df   : > { %v4404_v25 = vld.sshfl [vmem:[#allocation3 + $0x4] sm:$0x1 pattern:$0x75316420]  ;;  %v3453_v5 = vrot.slane %v4417_v14, %v6622_v39  ;;  %4809 = vmatpush1.bf16.msra.mxu1 %v4808_v15  ;;  %v3552_v14 = vld [vmem:[%s6994_s5 + $0x50] sm:$0xff] }
 0x6e0   : > { %3291 = vrot.lane.b32.xlu0 %v3290_v55, %s5113_s25  ;;  %v4411_v33 = vld.sshfl [vmem:[#allocation3 + $0x12] sm:$0x1 pattern:$0x75316420]  ;;  %v3174_v12 = vrot.slane %v4404_v25, %v6622_v39  ;;  %v3550_v55 = vld [vmem:[%s6994_s5 + $0x40] sm:$0xff]  ;;  %4780 = vmatprep.subr.bf16.mxu0 %v4779_v54  ;;  %v3587_v25 = vld [vmem:[%s6994_s5 + $0x168] sm:$0xff]  ;;  %v4785_v46 = vpack.c.bf16 %v3553_v22, %v3552_v14 }
 0x6e1   : > { %3434 = vrot.lane.b32.xlu1 %v3433_v7, %s5113_s25  ;;  %v4418_v20 = vld.sshfl [vmem:[#allocation3 + $0x20] sm:$0x1 pattern:$0x75316420]  ;;  %v3330_v56 = vrot.slane %v4411_v33, %v6622_v39  ;;  %v3551_v7 = vld [vmem:[%s6994_s5 + $0x48] sm:$0xff]  ;;  %4810 = vmatprep.subr.bf16.mxu1 %v5114_v57  ;;  %v4814_v50 = vpack.c.bf16 %v3587_v25, %v3586_v47  ;;  %v3759_v25 = vld [vmem:[%s6996_s7 + $0x10] sm:$0xff] }
 0x6e2   : > { %v3474_v10 = vrot.slane %v4418_v20, %v6622_v39  ;;  %v4405_v35 = vld.sshfl [vmem:[#allocation3 + $0x8] sm:$0x1 pattern:$0x75316420]  ;;  %v4781_v3 = vpack.c.bf16 %v3551_v7, %v3550_v55  ;;  %v3554_v33 = vld [vmem:[%s6994_s5 + $0x60] sm:$0xff]  ;;  %v4787_v20 = vpack.c.bf16 %v3571_v60, %v3570_v29  ;;  %v3763_v60 = vld [vmem:[%s6996_s7 + $0x30] sm:$0xff] }
 0x6e3   : > { %v4412_v18 = vld.sshfl [vmem:[#allocation3 + $0x13] sm:$0x1 pattern:$0x75316420]  ;;  %v3198_v45 = vrot.slane %v4405_v35, %v6622_v39  ;;  %4812 = vmatpush1.bf16.msra.mxu1 %v4811_v58  ;;  %v4789_v63 = vpack.c.bf16 %v3555_v61, %v3554_v33  ;;  %v3600_v58 = vsub.s32 1, %v7340_v9  ;;  %v3764_v33 = vld [vmem:[%s6996_s7 + $0x38] sm:$0xff] }
 0x6e4   : > { %3152 = vrot.lane.b32.xlu0 %v3151_v1, %s5115_s29  ;;  %v3350_v48 = vrot.slane %v4412_v18, %v6622_v39  ;;  %v4419_v53 = vld.sshfl [vmem:[#allocation3 + $0x21] sm:$0x1 pattern:$0x75316420]  ;;  %4782 = vmatpush3.bf16.msra.mxu0 %v4781_v3  ;;  %v3767_v61 = vld [vmem:[%s6996_s7 + $0x50] sm:$0xff]  ;;  %s3953_s25 = sshll.u32 %s5282_s30, 4  ;;  %s6946_s25 = int_to_ptr.vmem [resolvable:$true] %s3953_s25 }
 0x6e5   : > { %3311 = vrot.lane.b32.xlu1 %v3310_v21, %s5115_s29  ;;  %v4406_v24 = vld.sshfl [vmem:[#allocation3 + $0x9] sm:$0x1 pattern:$0x75316420]  ;;  %v3494_v52 = vrot.slane %v4419_v53, %v6622_v39  ;;  %v4783_v21 = vpack.c.bf16 %v3569_v44, %v3568_v36  ;;  %4813 = vmatprep.subr.bf16.mxu1 %v5114_v57  ;;  %v3608_v36 = vsub.s32 3, %v7340_v9  ;;  %v3596_v44 = vsub.s32 0, %v7340_v9  ;;  %p4984_p2 = scmp.lt.s32.totalorder %s6946_s25, %s4982_s14 }
 0x6e6   : > { %v3221_v59 = vrot.slane %v4406_v24, %v6622_v39  ;;  %v4413_v1 = vld.sshfl [vmem:[#allocation3 + $0x14] sm:$0x1 pattern:$0x75316420]  ;;  %v4838_v17 = vpack.c.bf16 %v3768_v62, %v3767_v61 }
 0x6e7   : > { %v4420_v2 = vld.sshfl [vmem:[#allocation3 + $0x22] sm:$0x1 pattern:$0x75316420]  ;;  %4784 = vmatprep.subr.bf16.mxu0 %v4783_v21  ;;  %v3370_v34 = vrot.slane %v4413_v1, %v6622_v39  ;;  %4815 = vmatpush1.bf16.msra.mxu1 %v4814_v50  ;;  %v3762_v50 = vld [vmem:[%s6996_s7 + $0x28] sm:$0xff] }
 0x6e8   : > { %3454 = vrot.lane.b32.xlu0 %v3453_v5, %s5115_s29  ;;  %v4407_v4 = vld.sshfl [vmem:[#allocation3 + $0xa] sm:$0x1 pattern:$0x75316420]  ;;  %v3514_v5 = vrot.slane %v4420_v2, %v6622_v39  ;;  %4786 = vmatpush3.bf16.msra.mxu0 %v4785_v46  ;;  %s7346_s29 = sand.u32 1, %s5039_s18  }
 0x6e9   : > { %3175 = vrot.lane.b32.xlu1 %v3174_v12, %s5116_s15  ;;  %v4414_v12 = vld.sshfl [vmem:[#allocation3 + $0x18] sm:$0x1 pattern:$0x75316420]  ;;  %4788 = vmatprep.subr.bf16.mxu0 %v4787_v20  ;;  %v3244_v27 = vrot.slane %v4407_v4, %v6622_v39  ;;  %v3761_v4 = vld [vmem:[%s6996_s7 + $0x20] sm:$0xff]  ;;  %s3941_s24 = scalar_lea.sflag [#allocation8], %s7346_s29 }
 0x6ea   : > { %v3391_v32 = vrot.slane %v4414_v12, %v6622_v39  ;;  %v4421_v41 = vld.sshfl [vmem:[#allocation3 + $0x23] sm:$0x1 pattern:$0x75316420]  ;;  %4816 = vmatprep.subr.bf16.mxu1 %v5114_v57  ;;  %v4829_v29 = vpack.c.bf16 %v3762_v50, %v3761_v4  ;;  %v3766_v12 = vld [vmem:[%s6996_s7 + $0x48] sm:$0xff] }
 0x6eb   : > { %4818 = vmatpush1.bf16.msra.mxu1 %v4817_v37  ;;  %v3534_v35 = vrot.slane %v4421_v41, %v6622_v39  ;;  %v7344_v37 = vmov 0.0   ;;  %v3852_v41 = vld [vmem:[%s6998_s9 + $0x20] sm:$0xff] }
 0x6ec   : > { %3331 = vrot.lane.b32.xlu0 %v3330_v56, %s5116_s15  ;;  %4790 = vmatpush3.bf16.msra.mxu0 %v4789_v63  ;;  %v4793_v56 = vpack.c.bf16 %v3557_v11, %v3556_v38  ;;  %v4841_v63 = vpack.c.bf16 %v3770_v49, %v3769_v23  ;;  %v3848_v38 = vld [vmem:[%s6998_s9] sm:$0xff]  ;;  %v3849_v11 = vld [vmem:[%s6998_s9 + $0x8] sm:$0xff] }
 0x6ed   : > { %3475 = vrot.lane.b32.xlu1 %v3474_v10, %s5116_s15  ;;  %s5118_s15 = smov 96   ;;  %4792 = vmatprep.subr.bf16.mxu0 %v4791_v26  ;;  %v4820_v10 = vpack.c.bf16 %v3591_v51, %v3590_v8  ;;  %v3771_v26 = vld [vmem:[%s6996_s7 + $0x70] sm:$0xff]  ;;  %v3851_v8 = vld [vmem:[%s6998_s9 + $0x18] sm:$0xff] }
 0x6ee   : > { %4819 = vmatprep.subr.bf16.mxu1 %v5114_v57 }
 0x6ef   : > { %4821 = vmatpush1.bf16.msra.mxu1 %v4820_v10 }
 0x6f0   : > { %3199 = vrot.lane.b32.xlu0 %v3198_v45, %s5117_s0  ;;  %4794 = vmatpush3.bf16.msra.mxu0 %v4793_v56  ;;  %v3853_v56 = vld [vmem:[%s6998_s9 + $0x28] sm:$0xff] }
 0x6f1   : > { %3351 = vrot.lane.b32.xlu1 %v3350_v48, %s5117_s0  ;;  %4822 = vmatprep.subr.bf16.mxu0 %v5114_v57  ;;  %v4850_v10 = vpack.c.bf16 %v3853_v56, %v3852_v41 }
 0x6f2   : > { %4843 = vmatprep.subr.bf16.mxu1 %v5114_v57 }
 0x6f4   : > { %3495 = vrot.lane.b32.xlu0 %v3494_v52, %s5117_s0  ;;  %v3604_v52 = vsub.s32 2, %v7340_v9  ;;  %v3760_v9 = vld [vmem:[%s6996_s7 + $0x18] sm:$0xff]  ;;  %s6944_s0 = scalar_lea.hbm %s7000_s11, %s4426_s16 }
 0x6f5   : > { %3222 = vrot.lane.b32.xlu1 %v3221_v59, %s5118_s15  ;;  %v3758_v59 = vld [vmem:[%s6996_s7 + $0x8] sm:$0xff]  ;;  %v4826_v46 = vpack.c.bf16 %v3760_v9, %v3759_v25 }
 0x6f8   : > { %3371 = vrot.lane.b32.xlu0 %v3370_v34, %s5118_s15  ;;  %v4832_v34 = vpack.c.bf16 %v3764_v33, %v3763_v60 }
 0x6f9   : > { %3515 = vrot.lane.b32.xlu1 %v3514_v5, %s5118_s15  ;;  %s5119_s15 = smov 112   ;;  %v3765_v5 = vld [vmem:[%s6996_s7 + $0x40] sm:$0xff] }
 0x6fa   : > { %v4835_v20 = vpack.c.bf16 %v3766_v12, %v3765_v5 }
 0x6fc   : > { %3245 = vrot.lane.b32.xlu0 %v3244_v27, %s5119_s15  ;;  %v3850_v27 = vld [vmem:[%s6998_s9 + $0x10] sm:$0xff] }
 0x6fd   : > { %3392 = vrot.lane.b32.xlu1 %v3391_v32, %s5119_s15  ;;  %v4844_v32 = vpack.c.bf16 %v3849_v11, %v3848_v38  ;;  %v4847_v51 = vpack.c.bf16 %v3851_v8, %v3850_v27 }
 0x700   : > { %3535 = vrot.lane.b32.xlu0 %v3534_v35, %s5119_s15  ;;  %v3854_v35 = vld [vmem:[%s6998_s9 + $0x30] sm:$0xff]  ;;  %s4977_s15 = scalar_lea.vmem %s6946_s25, 16 }
 0x701   : > { %p4978_p13 = scmp.ne.s32.totalorder %s6946_s25, %s4977_s15  ;;  %p4985_p3 = scmp.lt.s32.totalorder %s4983_s1, %s4977_s15 }
 0x703   : > { %p4979_p0 = pnand %p4978_p13, %p5220_p5  ;;  %p4986_p4 = por %p4985_p3, %p4984_p2 }
 0x705   : > { %p4980_p1 = pneg %p4979_p0 }
 0x707   : > { %p4987_p7 = pnand %p4986_p4, %p4980_p1 }
 0x74a   : > { %v3107_v0 = vpop.permute.xlu0 %3106 }
 0x74b   : > { %v3415_v39 = vpop.permute.xlu1 %3414  ;;  %3112 = vst.msk [vmem:[#allocation6] sm:$0x1] %vm3111_vm10, %v3107_v0  ;;  %v3855_v0 = vld [vmem:[%s6998_s9 + $0x38] sm:$0xff] }
 0x74c   : > { %3417 = vst.msk [vmem:[#allocation6 + $0x2] sm:$0x1] %vm3111_vm10, %v3415_v39  ;;  %v4853_v39 = vpack.c.bf16 %v3855_v0, %v3854_v35 }
 0x74e   : > { %v3271_v31 = vpop.permute.xlu0 %3270 }
 0x74f   : > { %v3130_v19 = vpop.permute.xlu1 %3129  ;;  %3273 = vst.msk [vmem:[#allocation6 + $0x1] sm:$0x1] %vm3111_vm10, %v3271_v31  ;;  %vm3248_vm10 = vcmp.ge.s32.totalorder %v7341_v42, 112  ;;  %v3757_v42 = vld [vmem:[%s6996_s7] sm:$0xff] }
 0x750   : > { %3135 = vst.msk [vmem:[#allocation6] sm:$0x1] %vm3134_vm9, %v3130_v19  ;;  %vm3250_vm13 = vmand %vm3248_vm10, %vm3249_vm6  ;;  %v4823_v21 = vpack.c.bf16 %v3758_v59, %v3757_v42 }
 0x752   : > { %v3292_v18 = vpop.permute.xlu0 %3291 }
 0x753   : > { %v3435_v30 = vpop.permute.xlu1 %3434  ;;  %3294 = vst.msk [vmem:[#allocation6 + $0x1] sm:$0x1] %vm3134_vm9, %v3292_v18  ;;  %v3592_v18 = vld [vmem:[%s6995_s6] sm:$0x1] }
 0x754   : > { %3437 = vst.msk [vmem:[#allocation6 + $0x2] sm:$0x1] %vm3134_vm9, %v3435_v30  ;;  %vm3613_vm9 = vcmask 130048  }
 0x756   : > { %v3153_v43 = vpop.permute.xlu0 %3152 }
 0x757   : > { %v3312_v13 = vpop.permute.xlu1 %3311  ;;  %3158 = vst.msk [vmem:[#allocation6] sm:$0x1] %vm3157_vm12, %v3153_v43 }
 0x758   : > { %3314 = vst.msk [vmem:[#allocation6 + $0x1] sm:$0x1] %vm3157_vm12, %v3312_v13 }
 0x75a   : > { %v3455_v15 = vpop.permute.xlu0 %3454 }
 0x75b   : > { %v3176_v6 = vpop.permute.xlu1 %3175  ;;  %3457 = vst.msk [vmem:[#allocation6 + $0x2] sm:$0x1] %vm3157_vm12, %v3455_v15  ;;  %vm7345_vm12 = vcmask 1043456  }
 0x75c   : > { %3181 = vst.msk [vmem:[#allocation6] sm:$0x1] %vm3180_vm7, %v3176_v6 }
 0x75e   : > { %v3332_v40 = vpop.permute.xlu0 %3331 }
 0x75f   : > { %v3476_v45 = vpop.permute.xlu1 %3475  ;;  %3334 = vst.msk [vmem:[#allocation6 + $0x1] sm:$0x1] %vm3180_vm7, %v3332_v40 }
 0x760   : > { %3478 = vst.msk [vmem:[#allocation6 + $0x2] sm:$0x1] %vm3180_vm7, %v3476_v45  ;;  %v3856_v45 = vld [vmem:[%s6998_s9 + $0x40] sm:$0xff] }
 0x762   : > { %v3200_v48 = vpop.permute.xlu0 %3199 }
 0x763   : > { %v3352_v53 = vpop.permute.xlu1 %3351  ;;  %3205 = vst.msk [vmem:[#allocation6] sm:$0x1] %vm3204_vm4, %v3200_v48 }
 0x764   : > { %3354 = vst.msk [vmem:[#allocation6 + $0x1] sm:$0x1] %vm3204_vm4, %v3352_v53  ;;  %v3858_v53 = vld [vmem:[%s6998_s9 + $0x50] sm:$0xf] }
 0x766   : > { %v3496_v54 = vpop.permute.xlu0 %3495 }
 0x767   : > { %v3223_v55 = vpop.permute.xlu1 %3222  ;;  %3498 = vst.msk [vmem:[#allocation6 + $0x2] sm:$0x1] %vm3204_vm4, %v3496_v54  ;;  %v3772_v54 = vld [vmem:[%s6997_s8] sm:$0x1] }
 0x768   : > { %3228 = vst.msk [vmem:[#allocation6] sm:$0x1] %vm3227_vm14, %v3223_v55 }
 0x76a   : > { %v3372_v7 = vpop.permute.xlu0 %3371 }
 0x76b   : > { %v3516_v24 = vpop.permute.xlu1 %3515  ;;  %3374 = vst.msk [vmem:[#allocation6 + $0x1] sm:$0x1] %vm3227_vm14, %v3372_v7 }
 0x76c   : > { %3518 = vst.msk [vmem:[#allocation6 + $0x2] sm:$0x1] %vm3227_vm14, %v3516_v24 }
 0x76e   : > { %v3246_v28 = vpop.permute.xlu0 %3245 }
 0x76f   : > { %v3393_v16 = vpop.permute.xlu1 %3392  ;;  %3251 = vst.msk [vmem:[#allocation6] sm:$0x1] %vm3250_vm13, %v3246_v28 }
 0x770   : > { %3395 = vst.msk [vmem:[#allocation6 + $0x1] sm:$0x1] %vm3250_vm13, %v3393_v16  ;;  %v3859_v16 = vld [vmem:[%s6999_s10] sm:$0x1] }
 0x772   : > { %v3536_v3 = vpop.permute.xlu0 %3535 }
 0x773   : > { %3538 = vst.msk [vmem:[#allocation6 + $0x2] sm:$0x1] %vm3250_vm13, %v3536_v3 }
 0x77a   : > { %v3541_v1 = vld [vmem:[#allocation6] sm:$0xf] }
 0x77b   : > { %v3601_v14 = vrot.slane %v3541_v1, %v3600_v58  ;;  %v3609_v22 = vrot.slane %v3541_v1, %v3608_v36  ;;  %v3597_v2 = vrot.slane %v3541_v1, %v3596_v44  ;;  %v3605_v47 = vrot.slane %v3541_v1, %v3604_v52 }
 0x77d   : > { %3680 = vmatprep.mubr.f32.mxu0 %v3601_v14  ;;  %4422 = vmatprep.mubr.msk.f32.mxu1 %vm3613_vm9, %v3609_v22 }
 0x77e   : > { %3681 = vmatmul.mubr.f32.vlgmr.msra.gmra.mrb[0].mxu0 %v3597_v2  ;;  %3751 = vmatmul.mubr.f32.vlgmr.msra.gmra.mrb[0].mxu1 %v3605_v47 }
 0x77f   : > { %4824 = vmatpush3.bf16.msra.mxu0 %v4823_v21  ;;  %4633 = vmatprep.mubr.msk.f32.mxu0 %vm5120_vm3, %v7344_v37 }
 0x780   : > { %4825 = vmatprep.subr.bf16.mxu0 %v5114_v57  ;;  %4658 = vmatprep.mubr.msk.f32.mxu1 %vm5120_vm3, %v7344_v37 }
 0x781   : > { %4845 = vmatpush3.bf16.msra.mxu1 %v4844_v32 }
 0x782   : > { %4846 = vmatprep.subr.bf16.mxu1 %v5114_v57 }
 0x783   : > { %4827 = vmatpush3.bf16.msra.mxu0 %v4826_v46 }
 0x784   : > { %4828 = vmatprep.subr.bf16.mxu0 %v5114_v57 }
 0x785   : > { %4848 = vmatpush3.bf16.msra.mxu1 %v4847_v51 }
 0x786   : > { %4849 = vmatprep.subr.bf16.mxu1 %v5114_v57 }
 0x787   : > { %4830 = vmatpush3.bf16.msra.mxu0 %v4829_v29 }
 0x788   : > { %4831 = vmatprep.subr.bf16.mxu0 %v5114_v57 }
 0x789   : > { %4851 = vmatpush3.bf16.msra.mxu1 %v4850_v10 }
 0x78a   : > { %4852 = vmatprep.subr.bf16.mxu1 %v5114_v57 }
 0x78b   : > { %4833 = vmatpush3.bf16.msra.mxu0 %v4832_v34 }
 0x78c   : > { %4834 = vmatprep.subr.bf16.mxu0 %v5114_v57 }
 0x78d   : > { %4854 = vmatpush3.bf16.msra.mxu1 %v4853_v39 }
 0x78e   : > { %4855 = vmatprep.subr.bf16.mxu1 %v5114_v57 }
 0x78f   : > { %4836 = vmatpush3.bf16.msra.mxu0 %v4835_v20 }
 0x790   : > { %4837 = vmatprep.subr.bf16.mxu0 %v5114_v57 }
 0x793   : > { %4839 = vmatpush3.bf16.msra.mxu0 %v4838_v17 }
 0x794   : > { %4840 = vmatprep.subr.bf16.mxu0 %v5114_v57  ;;  %v3857_v57 = vld [vmem:[%s6998_s9 + $0x48] sm:$0xff] }
 0x795   : > { %v4856_v48 = vpack.c.bf16 %v3857_v57, %v3856_v45 }
 0x797   : > { %4842 = vmatpush3.bf16.msra.mxu0 %v4841_v63  ;;  %4857 = vmatpush3.bf16.msra.mxu1 %v4856_v48 }
 0x798   : > { %4631 = vmatprep.subr.mxu0 %v7344_v37  ;;  %4656 = vmatprep.subr.mxu1 %v7344_v37 }
 0x79b   : > { %4632 = vmatpush3.msra.mxu0 %v3771_v26  ;;  %4657 = vmatpush3.msk.msra.mxu1 %vm7345_vm12, %v3858_v53 }
 0x851   : > { %v4508_v31 = vpop.f32.mrb[0].mxu0  ;;  %v3752_v19 = vpop.f32.mrb[0].mxu1 }
 0x852   : > { %v4509_v30 = vpop.f32.mrb[1].mxu0  ;;  %v3754_v43 = vpop.f32.mrb[1].mxu1 }
 0x853   : > { %v4510_v13 = vadd.f32 %v4509_v30, %v4508_v31 }
 0x855   : > { %v3683_v15 = vadd.f32 %v4510_v13, %v3592_v18 }
 0x857   : > { %v3753_v6 = vadd.f32 %v3752_v19, %v3683_v15 }
 0x859   : > { %v3756_v40 = vmax.f32 %v3753_v6, 0.0 }
 0x85b   : > { %4634 = vmatmul.mubr.msk.f32.vlgmr.msra.gmra.mrb[2].mxu0 %vm3773_vm15, %v3756_v40 }
 0x92e   : > { %v3843_v55 = vpop.f32.mrb[2].mxu0 }
 0x92f   : > { %v3844_v7 = vadd.f32 %v3843_v55, %v3772_v54  ;;  %v4635_v24 = vpop.f32.mrb[3].mxu0 }
 0x931   : > { %v3847_v28 = vmax.f32 %v3844_v7, 0.0 }
 0x933   : > { %4659 = vmatmul.mubr.msk.f32.vlgmr.msra.gmra.mrb[2].mxu1 %vm3860_vm2, %v3847_v28 }
 0xa06   : > { %v3934_v3 = vpop.f32.mrb[2].mxu1 }
 0xa07   : > { %v3935_v58 = vadd.f32 %v3934_v3, %v3859_v16  ;;  %v4660_v36 = vpop.f32.mrb[3].mxu1 }
 0xa09   : > { %3939 = vst.msk [vmem:[%s5282_s30] sm:$0x1] %vm3938_vm11, %v3935_v58 }
 0xa0a   : > { %4990 = shalt.err (!%p4987_p7)
}
 0xa0b   : > { %s4991_s30 = scalar_lea.hbm %s6944_s0, 16  ;;  %s4995_s12 = scalar_lea.hbm %s7000_s11, 32 }
 0xa0c   : > { %p4992_p8 = scmp.ne.s32.totalorder %s6944_s0, %s4991_s30  ;;  %p4996_p11 = scmp.lt.u32.totalorder %s6944_s0, %s7000_s11 }
 0xa0d   : > { %p4997_p12 = scmp.lt.u32.totalorder %s4995_s12, %s4991_s30  ;;  %p4999_p0 = scmp.lt.u32.totalorder %s4991_s30, %s6944_s0 }
 0xa0e   : > { %p4993_p9 = pnand %p4992_p8, %p5220_p5 }
 0xa0f   : > { %p4998_p13 = por %p4997_p12, %p4996_p11 }
 0xa10   : > { %p4994_p10 = pneg %p4993_p9 }
 0xa11   : > { %p5000_p1 = por %p4999_p0, %p4998_p13 }
 0xa13   : > { %p5001_p2 = pnand %p5000_p1, %p4994_p10 }
 0xa15   : > { %5004 = shalt.err (!%p5001_p2)
}
 0xa16   : > { %4858 = dma.vmem_to_hbm [thread:$0]  (%p5220_p5), %s6946_s25, 16, %s6944_s0, %s3941_s24  }
 0xa17 PF: > { %p4864_p3 = scmp.ge.s32.totalorder %s5047_s20, 2  ;;  %s3965_s15 = sand.u32 1, %s5035_s17  }
 0xa18   : > { %s3966_s21 = scalar_lea.sflag [#allocation8], %s3965_s15 }
 0xa19   : > { %p4861_p4 = pnand %p4864_p3, %p5224_p6 }
 0xa1b   : > { %5030 = dma.done.wait (!%p4861_p4), %s3966_s21, 16  }
 0xa1c   : > { %5032 = vsyncadd (!%p4861_p4), %s3966_s21, 4294967280  ;;  %p21_p7 = scmp.ge.s32.totalorder %s5207_s23, 4   ;;  %s7347_s17 = smov %s5039_s18 }
 0xa1d   : > { %s7348_s18 = smov %s5043_s19  ;;  %s7349_s19 = smov %s5218_s26 }
 0xa1e   : > { %s7350_s20 = smov %s5207_s23  ;;  %23 = sbr.rel (!%p21_p7) target bundleno = 6 (0x6), region = 153 }
 0xa25   :  { %3970 = vsyncpa [#allocation8], 1 }
 0xa26   :  { %3972 = vsyncpa [#allocation8 + $0x1], 1 }

</bundles_post_ra>
